<compile_context>
chip_gen: v7x
topology: tpu7x:2x2x1
jax: 0.10.0
libtpu: 0.0.40
codegen_flags: <defaults>
</compile_context>

<pallas_src>
import jax
import jax.numpy as jnp
from jax.experimental import pallas as pl
from jax.experimental.pallas import tpu as pltpu


# ----------------------------------------------------------------------------
# Kernel
# ----------------------------------------------------------------------------
def make_rnn_kernel(num_layers: int, seq_len: int, compute_dtype, act_dtype,
                    unroll, proj_chunk: int):
    """Kernel ref order:
      x_ref (T, Bc, Din_p),
      [wih_t (in_l, H_p), whh_t (H_p, H_p), bias (1, H_p)] * num_layers,
      wfc_t (H_p, O_p), bfc (1, O_p),
      out_ref (Bc, O_p),
      xp_ref (T, Bc, H_p) f32 scratch,
      [hseq_ref (T, Bc, H_p) compute_dtype scratch]   # only if num_layers > 1
    """
    T = seq_len

    def kernel(*refs):
        x_ref = refs[0]
        idx = 1
        layer_refs = []
        for _ in range(num_layers):
            layer_refs.append(tuple(refs[idx:idx + 3]))
            idx += 3
        wfc_ref = refs[idx]
        bfc_ref = refs[idx + 1]
        out_ref = refs[idx + 2]
        xp_ref = refs[idx + 3]
        hseq_ref = refs[idx + 4] if num_layers > 1 else None

        Bc = out_ref.shape[0]

        h_last = None
        for layer, (wih_t_ref, whh_t_ref, bias_ref) in enumerate(layer_refs):
            H = whh_t_ref.shape[0]
            last_layer = layer == num_layers - 1

            # ---- hoisted, time-invariant input projection (chunked over T) ----
            # one (chunk*Bc, D_in) @ (D_in, H) MXU matmul per chunk + fused bias;
            # chunking bounds the transient f32 value feeding the xp_ref store.
            bias_f32 = bias_ref[...].astype(jnp.float32)
            for t0 in range(0, T, proj_chunk):
                tc = min(proj_chunk, T - t0)
                if layer == 0:
                    in_l = wih_t_ref.shape[0]
                    xs = x_ref[pl.ds(t0, tc)].reshape(tc * Bc, in_l)
                else:
                    xs = hseq_ref[pl.ds(t0, tc)].reshape(tc * Bc, H)
                xp = (jnp.dot(xs.astype(compute_dtype), wih_t_ref[...],
                              preferred_element_type=jnp.float32)
                      + bias_f32)                      # bias hoisted, fused bih+bhh
                xp_ref[pl.ds(t0, tc)] = xp.reshape(tc, Bc, H)

            # ---- serial recurrence: only h @ W_hh + Xp[t] left on the path ----
            def step(t, h, whh_t_ref=whh_t_ref, last_layer=last_layer):
                # TODO(synk): replace with matmul_push_rhs/acc_lhs/pop to keep
                # W_hh resident in the MXU across the T loop.
                pre = xp_ref[t] + jnp.dot(h.astype(compute_dtype), whh_t_ref[...],
                                          preferred_element_type=jnp.float32)
                h_act = jnp.tanh(pre.astype(act_dtype))   # bf16 EUP on v6e/v7x
                if not last_layer:                        # top layer: no seq store
                    hseq_ref[t] = h_act.astype(compute_dtype)
                return h_act.astype(jnp.float32)          # f32 carry

            h0 = jnp.zeros((Bc, H), jnp.float32)
            h_last = jax.lax.fori_loop(0, T, step, h0, unroll=unroll)

        # h_last == RNN output at the last timestep (x[:, -1, :] in PyTorch)
        y = (jnp.dot(h_last.astype(compute_dtype), wfc_ref[...],
                     preferred_element_type=jnp.float32)
             + bfc_ref[...].astype(jnp.float32))
        out_ref[...] = y.astype(out_ref.dtype)

    return kernel


# ----------------------------------------------------------------------------
# Wrapper helpers
# ----------------------------------------------------------------------------
def _round_up(n, m):
    return ((n + m - 1) // m) * m


def _device_defaults():
    """Generation-aware tiling / VMEM defaults (cosmetic for tiny shapes)."""
    kind = ""
    try:
        kind = jax.devices()[0].device_kind.lower()
    except Exception:
        pass
    bf16_act = ("v6" in kind) or ("v7" in kind) or ("7x" in kind)
    if "v7" in kind or "7x" in kind:
        # 2 TensorCores / chip, 64 MiB VMEM per core.
        return {"num_cores": 2, "vmem_cap": 48 << 20, "bc_cap": 256,
                "bf16_act": True}
    if "v5 lite" in kind or "v5e" in kind or "v5lite" in kind:
        # single TC, 128 MiB physical VMEM, no bf16 VPU/EUP.
        return {"num_cores": 1, "vmem_cap": 96 << 20, "bc_cap": 512,
                "bf16_act": False}
    if "v4" in kind:
        return {"num_cores": 2, "vmem_cap": 24 << 20, "bc_cap": 256,
                "bf16_act": False}
    # v6e / v5p / unknown: treat as single big core with generous VMEM.
    return {"num_cores": 1, "vmem_cap": 96 << 20, "bc_cap": 512,
            "bf16_act": bf16_act}


def _vmem_usage(T, Bc, Din_p, H_p, O_p, num_layers, wbytes, weight_bufs):
    use = 2 * T * Bc * Din_p * 4            # double-buffered input block
    use += 2 * Bc * O_p * 4                 # double-buffered output block
    wsum = 0
    for l in range(num_layers):
        in_l = Din_p if l == 0 else H_p
        wsum += (in_l * H_p + H_p * H_p) * wbytes + H_p * 4
    wsum += H_p * O_p * wbytes + O_p * 4
    use += weight_bufs * wsum               # weights / biases
    use += T * Bc * H_p * 4                 # xp scratch (f32)
    if num_layers > 1:
        use += T * Bc * H_p * wbytes        # hidden-sequence scratch
    return use


_SINGLE_BUFFER_WEIGHTS_OK = True            # flips off if pl.Buffered(1) rejected


# ----------------------------------------------------------------------------
# Forward
# ----------------------------------------------------------------------------
def nextgen_rnn_forward(x, params, *, weight_dtype=jnp.float32, batch_block=None):
    """x: (B, T, input_size), batch_first like the PyTorch module.

    weight_dtype: jnp.float32 or jnp.bfloat16.  The hidden-state carry and all
    MXU accumulation stay f32.
    """
    global _SINGLE_BUFFER_WEIGHTS_OK

    B, T, Din = x.shape
    layers = params["layers"]
    num_layers = len(layers)
    H = layers[0][1].shape[0]
    O = params["wfc"].shape[0]

    LANE, SUB = 128, 8
    Din_p = _round_up(Din, LANE)
    H_p = _round_up(H, LANE)
    O_p = _round_up(O, LANE)
    B_p = _round_up(B, SUB)

    dev = _device_defaults()
    wbytes = jnp.dtype(weight_dtype).itemsize

    # ---- batch block: one block per TensorCore, bounded by VMEM budget ----
    if batch_block is not None:
        Bc = _round_up(batch_block, SUB)
    else:
        Bc = _round_up(-(-B_p // dev["num_cores"]), SUB)
        Bc = min(Bc, dev["bc_cap"])
        while Bc > SUB and _vmem_usage(T, Bc, Din_p, H_p, O_p, num_layers,
                                       wbytes, 2) > dev["vmem_cap"]:
            Bc = _round_up(Bc // 2, SUB)
    B_p = _round_up(B_p, Bc)                # batch grid must divide evenly

    # ---- explicit VMEM limit from the actual buffer sum (+ headroom) ----
    usage = _vmem_usage(T, Bc, Din_p, H_p, O_p, num_layers, wbytes, 2)
    vmem_limit = int(min(dev["vmem_cap"],
                         max(32 << 20, usage + usage // 4 + (4 << 20))))

    # ---- unroll gated on carry size; projection chunked over T ----
    carry_bytes = Bc * H_p * 4
    if T <= 32 and carry_bytes <= 32 * 1024:
        unroll = True
    elif carry_bytes <= 128 * 1024:
        unroll = min(4, T)
    else:
        unroll = min(2, T)
    proj_chunk = max(1, min(T, max(8, -(-128 // Bc))))

    # bf16 activations only where the EUP supports bf16 (v6e/v7x).
    if jnp.dtype(weight_dtype) == jnp.dtype(jnp.bfloat16) and dev["bf16_act"]:
        act_dtype = jnp.bfloat16
    else:
        act_dtype = jnp.float32

    # ---- time-major, zero-padded input  (T, B_p, Din_p); padding is exact:
    # padded hidden units stay tanh(0)=0 and padded batch rows are sliced off.
    x_tm = jnp.transpose(x, (1, 0, 2))
    x_tm = jnp.pad(x_tm, ((0, 0), (0, B_p - B), (0, Din_p - Din)))

    inputs = [x_tm]
    weight_shapes = []
    for l, (wih, whh, bih, bhh) in enumerate(layers):
        in_l = Din_p if l == 0 else H_p
        wih_t = jnp.zeros((in_l, H_p), jnp.float32).at[:wih.shape[1], :H].set(wih.T)
        whh_t = jnp.zeros((H_p, H_p), jnp.float32).at[:H, :H].set(whh.T)
        bias = jnp.zeros((1, H_p), jnp.float32).at[0, :H].set(bih + bhh)
        inputs += [wih_t.astype(weight_dtype), whh_t.astype(weight_dtype), bias]
        weight_shapes += [(in_l, H_p), (H_p, H_p), (1, H_p)]
    wfc_t = jnp.zeros((H_p, O_p), jnp.float32).at[:H, :O].set(params["wfc"].T)
    bfc = jnp.zeros((1, O_p), jnp.float32).at[0, :O].set(params["bfc"])
    inputs += [wfc_t.astype(weight_dtype), bfc]
    weight_shapes += [(H_p, O_p), (1, O_p)]

    # scratch: Xp always; hidden-sequence buffer only when a next layer reads it.
    scratch_shapes = [pltpu.VMEM((T, Bc, H_p), jnp.float32)]
    if num_layers > 1:
        scratch_shapes.append(pltpu.VMEM((T, Bc, H_p), weight_dtype))

    kernel = make_rnn_kernel(num_layers, T, weight_dtype, act_dtype, unroll,
                             proj_chunk)

    def run(single_buffer_weights):
        if single_buffer_weights:
            def wspec(s):
                return pl.BlockSpec(s, lambda b: (0,) * len(s),
                                    pipeline_mode=pl.Buffered(1))
        else:
            def wspec(s):
                return pl.BlockSpec(s, lambda b: (0,) * len(s))
        in_specs = [pl.BlockSpec((T, Bc, Din_p), lambda b: (0, b, 0))]
        in_specs += [wspec(s) for s in weight_shapes]
        return pl.pallas_call(
            kernel,
            out_shape=jax.ShapeDtypeStruct((B_p, O_p), x.dtype),
            grid=(B_p // Bc,),
            in_specs=in_specs,
            out_specs=pl.BlockSpec((Bc, O_p), lambda b: (b, 0)),
            scratch_shapes=scratch_shapes,
            compiler_params=pltpu.CompilerParams(
                dimension_semantics=("parallel",),
                vmem_limit_bytes=vmem_limit),
        )(*inputs)

    if _SINGLE_BUFFER_WEIGHTS_OK:
        try:
            out_p = run(True)
        except Exception:
            # pl.Buffered(1) unsupported on this jax/Mosaic build -> fall back
            # to the default double-buffered weight specs.
            _SINGLE_BUFFER_WEIGHTS_OK = False
            out_p = run(False)
    else:
        out_p = run(False)

    return out_p[:B, :O]


# ----------------------------------------------------------------------------
# Pure-JAX reference & init
# ----------------------------------------------------------------------------
def rnn_reference(x, params):
    """Pure-JAX reference matching torch.nn.RNN(tanh, batch_first) + Linear."""
    B, T, _ = x.shape
    h_seq = x.astype(jnp.float32)
    for (wih, whh, bih, bhh) in params["layers"]:
        H = whh.shape[0]
        h = jnp.zeros((B, H), jnp.float32)
        outs = []
        for t in range(T):
            h = jnp.tanh(h_seq[:, t, :] @ wih.T + bih + h @ whh.T + bhh)
            outs.append(h)
        h_seq = jnp.stack(outs, axis=1)
    return h_seq[:, -1, :] @ params["wfc"].T + params["bfc"]


def init_params(key, num_layers, input_size, hidden_size, output_size):
    """Deterministic init matching the shapes of nn.RNN + nn.Linear."""
    params = {"layers": []}
    scale = 1.0 / jnp.sqrt(jnp.float32(hidden_size))
    for l in range(num_layers):
        in_l = input_size if l == 0 else hidden_size
        key, k1, k2, k3, k4 = jax.random.split(key, 5)
        wih = jax.random.uniform(k1, (hidden_size, in_l), jnp.float32, -scale, scale)
        whh = jax.random.uniform(k2, (hidden_size, hidden_size), jnp.float32, -scale, scale)
        bih = jax.random.uniform(k3, (hidden_size,), jnp.float32, -scale, scale)
        bhh = jax.random.uniform(k4, (hidden_size,), jnp.float32, -scale, scale)
        params["layers"].append((wih, whh, bih, bhh))
    key, k1, k2 = jax.random.split(key, 3)
    params["wfc"] = jax.random.uniform(k1, (output_size, hidden_size), jnp.float32, -scale, scale)
    params["bfc"] = jax.random.uniform(k2, (output_size,), jnp.float32, -scale, scale)
    return params


if __name__ == "__main__":
    # Small shapes consistent with the module's forward.
    num_layers = 2
    input_size = 16
    hidden_size = 32
    output_size = 8
    seq_len = 8
    batch = 2

    key = jax.random.PRNGKey(0)
    key, kx = jax.random.split(key)
    x = jax.random.normal(kx, (batch, seq_len, input_size), jnp.float32)
    params = init_params(key, num_layers, input_size, hidden_size, output_size)

    ref = rnn_reference(x, params)

    # f32 weights: numerically faithful to the PyTorch module.
    out = jax.block_until_ready(nextgen_rnn_forward(x, params))
    assert out.shape == (batch, output_size)
    assert jnp.allclose(out, ref, atol=1e-4, rtol=1e-4), (out, ref)

    # bf16 weights (native MXU dtype); f32 carry, bf16 activations on v6e/v7x.
    out_bf16 = jax.block_until_ready(
        nextgen_rnn_forward(x, params, weight_dtype=jnp.bfloat16))
    assert out_bf16.shape == (batch, output_size)
    assert float(jnp.max(jnp.abs(out_bf16 - ref))) < 1e-1, (out_bf16, ref)

    # Multi-block batch grid (exercises the 'parallel' batch tiling path).
    key, kx2 = jax.random.split(key)
    x2 = jax.random.normal(kx2, (10, seq_len, input_size), jnp.float32)
    ref2 = rnn_reference(x2, params)
    out2 = jax.block_until_ready(nextgen_rnn_forward(x2, params, batch_block=8))
    assert out2.shape == (10, output_size)
    assert jnp.allclose(out2, ref2, atol=1e-4, rtol=1e-4), (out2, ref2)

    print("KERNEL_OK")
</pallas_src>

<mosaic_0001>
module attributes {stable_mosaic.version = 11 : i64} {
  func.func @kernel(%arg0: i32, %arg1: memref<8x8x128xf32, #tpu.memory_space<vmem>>, %arg2: memref<128x128xf32, #tpu.memory_space<vmem>>, %arg3: memref<128x128xf32, #tpu.memory_space<vmem>>, %arg4: memref<1x128xf32, #tpu.memory_space<vmem>>, %arg5: memref<128x128xf32, #tpu.memory_space<vmem>>, %arg6: memref<128x128xf32, #tpu.memory_space<vmem>>, %arg7: memref<1x128xf32, #tpu.memory_space<vmem>>, %arg8: memref<128x128xf32, #tpu.memory_space<vmem>>, %arg9: memref<1x128xf32, #tpu.memory_space<vmem>>, %arg10: memref<8x128xf32, #tpu.memory_space<vmem>>, %arg11: memref<8x8x128xf32, #tpu.memory_space<vmem>>, %arg12: memref<8x8x128xf32, #tpu.memory_space<vmem>>) attributes {dimension_semantics = [#tpu.dimension_semantics<parallel>], iteration_bounds = array<i64: 1>, scalar_prefetch = 0 : i64, scratch_operands = 2 : i64, tpu.core_type = #tpu.core_type<tc>, window_params = [{transform_indices = @transform_0, window_bounds = array<i64: 8, 8, 128>}, {pipeline_mode = #tpu.pipeline_mode<synchronous>, transform_indices = @transform_1, window_bounds = array<i64: 128, 128>}, {pipeline_mode = #tpu.pipeline_mode<synchronous>, transform_indices = @transform_2, window_bounds = array<i64: 128, 128>}, {pipeline_mode = #tpu.pipeline_mode<synchronous>, transform_indices = @transform_3, window_bounds = array<i64: 1, 128>}, {pipeline_mode = #tpu.pipeline_mode<synchronous>, transform_indices = @transform_4, window_bounds = array<i64: 128, 128>}, {pipeline_mode = #tpu.pipeline_mode<synchronous>, transform_indices = @transform_5, window_bounds = array<i64: 128, 128>}, {pipeline_mode = #tpu.pipeline_mode<synchronous>, transform_indices = @transform_6, window_bounds = array<i64: 1, 128>}, {pipeline_mode = #tpu.pipeline_mode<synchronous>, transform_indices = @transform_7, window_bounds = array<i64: 128, 128>}, {pipeline_mode = #tpu.pipeline_mode<synchronous>, transform_indices = @transform_8, window_bounds = array<i64: 1, 128>}, {transform_indices = @transform_9, window_bounds = array<i64: 8, 128>}]} {
    %c0 = arith.constant 0 : index
    %c0_0 = arith.constant 0 : index
    %0 = vector.load %arg4[%c0, %c0_0] : memref<1x128xf32, #tpu.memory_space<vmem>>, vector<1x128xf32>
    %c0_1 = arith.constant 0 : index
    %c0_2 = arith.constant 0 : index
    %c0_3 = arith.constant 0 : index
    %1 = vector.load %arg1[%c0_1, %c0_2, %c0_3] : memref<8x8x128xf32, #tpu.memory_space<vmem>>, vector<8x8x128xf32>
    %2 = vector.shape_cast %1 : vector<8x8x128xf32> to vector<64x128xf32>
    %c0_4 = arith.constant 0 : index
    %c0_5 = arith.constant 0 : index
    %3 = vector.load %arg2[%c0_4, %c0_5] : memref<128x128xf32, #tpu.memory_space<vmem>>, vector<128x128xf32>
    %cst = arith.constant dense<0.000000e+00> : vector<64x128xf32>
    %4 = tpu.matmul %2, %3, %cst {dimension_numbers = #tpu.dot_dimension_numbers<[1], [0], [0], [1], [0, 0, 1, 1], [], []>} : vector<64x128xf32>, vector<128x128xf32>, vector<64x128xf32> -> vector<64x128xf32>
    %5 = vector.broadcast %0 : vector<1x128xf32> to vector<64x128xf32>
    %6 = arith.addf %4, %5 : vector<64x128xf32>
    %7 = vector.shape_cast %6 : vector<64x128xf32> to vector<8x8x128xf32>
    %c0_6 = arith.constant 0 : index
    %c0_7 = arith.constant 0 : index
    %c0_8 = arith.constant 0 : index
    %8 = vector.load %arg11[%c0_6, %c0_7, %c0_8] : memref<8x8x128xf32, #tpu.memory_space<vmem>>, vector<8x8x128xf32>
    tpu.vector_store %arg11[%c0_6, %c0_7, %c0_8], %7 {strides = array<i32>} : memref<8x8x128xf32, #tpu.memory_space<vmem>>, vector<8x8x128xf32>,
    %cst_9 = arith.constant 0.000000e+00 : f32
    %9 = vector.broadcast %cst_9 : f32 to vector<8x128xf32>
    %c0_i32 = arith.constant 0 : i32
    %10 = arith.index_cast %c0_i32 : i32 to index
    %c0_10 = arith.constant 0 : index
    %c0_11 = arith.constant 0 : index
    %11 = vector.load %arg11[%10, %c0_10, %c0_11] : memref<8x8x128xf32, #tpu.memory_space<vmem>>, vector<1x8x128xf32>
    %12 = vector.shape_cast %11 : vector<1x8x128xf32> to vector<8x128xf32>
    %c0_12 = arith.constant 0 : index
    %c0_13 = arith.constant 0 : index
    %13 = vector.load %arg3[%c0_12, %c0_13] : memref<128x128xf32, #tpu.memory_space<vmem>>, vector<128x128xf32>
    %cst_14 = arith.constant dense<0.000000e+00> : vector<8x128xf32>
    %14 = tpu.matmul %9, %13, %cst_14 {dimension_numbers = #tpu.dot_dimension_numbers<[1], [0], [0], [1], [0, 0, 1, 1], [], []>} : vector<8x128xf32>, vector<128x128xf32>, vector<8x128xf32> -> vector<8x128xf32>
    %15 = arith.addf %12, %14 : vector<8x128xf32>
    %16 = math.tanh %15 : vector<8x128xf32>
    %17 = arith.index_cast %c0_i32 : i32 to index
    %c0_15 = arith.constant 0 : index
    %c0_16 = arith.constant 0 : index
    %18 = vector.load %arg12[%17, %c0_15, %c0_16] : memref<8x8x128xf32, #tpu.memory_space<vmem>>, vector<1x8x128xf32>
    %19 = vector.shape_cast %18 : vector<1x8x128xf32> to vector<8x128xf32>
    %20 = vector.shape_cast %16 : vector<8x128xf32> to vector<1x8x128xf32>
    tpu.vector_store %arg12[%17, %c0_15, %c0_16], %20 {strides = array<i32>} : memref<8x8x128xf32, #tpu.memory_space<vmem>>, vector<1x8x128xf32>,
    %c1_i32 = arith.constant 1 : i32
    %21 = arith.index_cast %c1_i32 : i32 to index
    %c0_17 = arith.constant 0 : index
    %c0_18 = arith.constant 0 : index
    %22 = vector.load %arg11[%21, %c0_17, %c0_18] : memref<8x8x128xf32, #tpu.memory_space<vmem>>, vector<1x8x128xf32>
    %23 = vector.shape_cast %22 : vector<1x8x128xf32> to vector<8x128xf32>
    %c0_19 = arith.constant 0 : index
    %c0_20 = arith.constant 0 : index
    %24 = vector.load %arg3[%c0_19, %c0_20] : memref<128x128xf32, #tpu.memory_space<vmem>>, vector<128x128xf32>
    %cst_21 = arith.constant dense<0.000000e+00> : vector<8x128xf32>
    %25 = tpu.matmul %16, %24, %cst_21 {dimension_numbers = #tpu.dot_dimension_numbers<[1], [0], [0], [1], [0, 0, 1, 1], [], []>} : vector<8x128xf32>, vector<128x128xf32>, vector<8x128xf32> -> vector<8x128xf32>
    %26 = arith.addf %23, %25 : vector<8x128xf32>
    %27 = math.tanh %26 : vector<8x128xf32>
    %28 = arith.index_cast %c1_i32 : i32 to index
    %c0_22 = arith.constant 0 : index
    %c0_23 = arith.constant 0 : index
    %29 = vector.load %arg12[%28, %c0_22, %c0_23] : memref<8x8x128xf32, #tpu.memory_space<vmem>>, vector<1x8x128xf32>
    %30 = vector.shape_cast %29 : vector<1x8x128xf32> to vector<8x128xf32>
    %31 = vector.shape_cast %27 : vector<8x128xf32> to vector<1x8x128xf32>
    tpu.vector_store %arg12[%28, %c0_22, %c0_23], %31 {strides = array<i32>} : memref<8x8x128xf32, #tpu.memory_space<vmem>>, vector<1x8x128xf32>,
    %c2_i32 = arith.constant 2 : i32
    %32 = arith.index_cast %c2_i32 : i32 to index
    %c0_24 = arith.constant 0 : index
    %c0_25 = arith.constant 0 : index
    %33 = vector.load %arg11[%32, %c0_24, %c0_25] : memref<8x8x128xf32, #tpu.memory_space<vmem>>, vector<1x8x128xf32>
    %34 = vector.shape_cast %33 : vector<1x8x128xf32> to vector<8x128xf32>
    %c0_26 = arith.constant 0 : index
    %c0_27 = arith.constant 0 : index
    %35 = vector.load %arg3[%c0_26, %c0_27] : memref<128x128xf32, #tpu.memory_space<vmem>>, vector<128x128xf32>
    %cst_28 = arith.constant dense<0.000000e+00> : vector<8x128xf32>
    %36 = tpu.matmul %27, %35, %cst_28 {dimension_numbers = #tpu.dot_dimension_numbers<[1], [0], [0], [1], [0, 0, 1, 1], [], []>} : vector<8x128xf32>, vector<128x128xf32>, vector<8x128xf32> -> vector<8x128xf32>
    %37 = arith.addf %34, %36 : vector<8x128xf32>
    %38 = math.tanh %37 : vector<8x128xf32>
    %39 = arith.index_cast %c2_i32 : i32 to index
    %c0_29 = arith.constant 0 : index
    %c0_30 = arith.constant 0 : index
    %40 = vector.load %arg12[%39, %c0_29, %c0_30] : memref<8x8x128xf32, #tpu.memory_space<vmem>>, vector<1x8x128xf32>
    %41 = vector.shape_cast %40 : vector<1x8x128xf32> to vector<8x128xf32>
    %42 = vector.shape_cast %38 : vector<8x128xf32> to vector<1x8x128xf32>
    tpu.vector_store %arg12[%39, %c0_29, %c0_30], %42 {strides = array<i32>} : memref<8x8x128xf32, #tpu.memory_space<vmem>>, vector<1x8x128xf32>,
    %c3_i32 = arith.constant 3 : i32
    %43 = arith.index_cast %c3_i32 : i32 to index
    %c0_31 = arith.constant 0 : index
    %c0_32 = arith.constant 0 : index
    %44 = vector.load %arg11[%43, %c0_31, %c0_32] : memref<8x8x128xf32, #tpu.memory_space<vmem>>, vector<1x8x128xf32>
    %45 = vector.shape_cast %44 : vector<1x8x128xf32> to vector<8x128xf32>
    %c0_33 = arith.constant 0 : index
    %c0_34 = arith.constant 0 : index
    %46 = vector.load %arg3[%c0_33, %c0_34] : memref<128x128xf32, #tpu.memory_space<vmem>>, vector<128x128xf32>
    %cst_35 = arith.constant dense<0.000000e+00> : vector<8x128xf32>
    %47 = tpu.matmul %38, %46, %cst_35 {dimension_numbers = #tpu.dot_dimension_numbers<[1], [0], [0], [1], [0, 0, 1, 1], [], []>} : vector<8x128xf32>, vector<128x128xf32>, vector<8x128xf32> -> vector<8x128xf32>
    %48 = arith.addf %45, %47 : vector<8x128xf32>
    %49 = math.tanh %48 : vector<8x128xf32>
    %50 = arith.index_cast %c3_i32 : i32 to index
    %c0_36 = arith.constant 0 : index
    %c0_37 = arith.constant 0 : index
    %51 = vector.load %arg12[%50, %c0_36, %c0_37] : memref<8x8x128xf32, #tpu.memory_space<vmem>>, vector<1x8x128xf32>
    %52 = vector.shape_cast %51 : vector<1x8x128xf32> to vector<8x128xf32>
    %53 = vector.shape_cast %49 : vector<8x128xf32> to vector<1x8x128xf32>
    tpu.vector_store %arg12[%50, %c0_36, %c0_37], %53 {strides = array<i32>} : memref<8x8x128xf32, #tpu.memory_space<vmem>>, vector<1x8x128xf32>,
    %c4_i32 = arith.constant 4 : i32
    %54 = arith.index_cast %c4_i32 : i32 to index
    %c0_38 = arith.constant 0 : index
    %c0_39 = arith.constant 0 : index
    %55 = vector.load %arg11[%54, %c0_38, %c0_39] : memref<8x8x128xf32, #tpu.memory_space<vmem>>, vector<1x8x128xf32>
    %56 = vector.shape_cast %55 : vector<1x8x128xf32> to vector<8x128xf32>
    %c0_40 = arith.constant 0 : index
    %c0_41 = arith.constant 0 : index
    %57 = vector.load %arg3[%c0_40, %c0_41] : memref<128x128xf32, #tpu.memory_space<vmem>>, vector<128x128xf32>
    %cst_42 = arith.constant dense<0.000000e+00> : vector<8x128xf32>
    %58 = tpu.matmul %49, %57, %cst_42 {dimension_numbers = #tpu.dot_dimension_numbers<[1], [0], [0], [1], [0, 0, 1, 1], [], []>} : vector<8x128xf32>, vector<128x128xf32>, vector<8x128xf32> -> vector<8x128xf32>
    %59 = arith.addf %56, %58 : vector<8x128xf32>
    %60 = math.tanh %59 : vector<8x128xf32>
    %61 = arith.index_cast %c4_i32 : i32 to index
    %c0_43 = arith.constant 0 : index
    %c0_44 = arith.constant 0 : index
    %62 = vector.load %arg12[%61, %c0_43, %c0_44] : memref<8x8x128xf32, #tpu.memory_space<vmem>>, vector<1x8x128xf32>
    %63 = vector.shape_cast %62 : vector<1x8x128xf32> to vector<8x128xf32>
    %64 = vector.shape_cast %60 : vector<8x128xf32> to vector<1x8x128xf32>
    tpu.vector_store %arg12[%61, %c0_43, %c0_44], %64 {strides = array<i32>} : memref<8x8x128xf32, #tpu.memory_space<vmem>>, vector<1x8x128xf32>,
    %c5_i32 = arith.constant 5 : i32
    %65 = arith.index_cast %c5_i32 : i32 to index
    %c0_45 = arith.constant 0 : index
    %c0_46 = arith.constant 0 : index
    %66 = vector.load %arg11[%65, %c0_45, %c0_46] : memref<8x8x128xf32, #tpu.memory_space<vmem>>, vector<1x8x128xf32>
    %67 = vector.shape_cast %66 : vector<1x8x128xf32> to vector<8x128xf32>
    %c0_47 = arith.constant 0 : index
    %c0_48 = arith.constant 0 : index
    %68 = vector.load %arg3[%c0_47, %c0_48] : memref<128x128xf32, #tpu.memory_space<vmem>>, vector<128x128xf32>
    %cst_49 = arith.constant dense<0.000000e+00> : vector<8x128xf32>
    %69 = tpu.matmul %60, %68, %cst_49 {dimension_numbers = #tpu.dot_dimension_numbers<[1], [0], [0], [1], [0, 0, 1, 1], [], []>} : vector<8x128xf32>, vector<128x128xf32>, vector<8x128xf32> -> vector<8x128xf32>
    %70 = arith.addf %67, %69 : vector<8x128xf32>
    %71 = math.tanh %70 : vector<8x128xf32>
    %72 = arith.index_cast %c5_i32 : i32 to index
    %c0_50 = arith.constant 0 : index
    %c0_51 = arith.constant 0 : index
    %73 = vector.load %arg12[%72, %c0_50, %c0_51] : memref<8x8x128xf32, #tpu.memory_space<vmem>>, vector<1x8x128xf32>
    %74 = vector.shape_cast %73 : vector<1x8x128xf32> to vector<8x128xf32>
    %75 = vector.shape_cast %71 : vector<8x128xf32> to vector<1x8x128xf32>
    tpu.vector_store %arg12[%72, %c0_50, %c0_51], %75 {strides = array<i32>} : memref<8x8x128xf32, #tpu.memory_space<vmem>>, vector<1x8x128xf32>,
    %c6_i32 = arith.constant 6 : i32
    %76 = arith.index_cast %c6_i32 : i32 to index
    %c0_52 = arith.constant 0 : index
    %c0_53 = arith.constant 0 : index
    %77 = vector.load %arg11[%76, %c0_52, %c0_53] : memref<8x8x128xf32, #tpu.memory_space<vmem>>, vector<1x8x128xf32>
    %78 = vector.shape_cast %77 : vector<1x8x128xf32> to vector<8x128xf32>
    %c0_54 = arith.constant 0 : index
    %c0_55 = arith.constant 0 : index
    %79 = vector.load %arg3[%c0_54, %c0_55] : memref<128x128xf32, #tpu.memory_space<vmem>>, vector<128x128xf32>
    %cst_56 = arith.constant dense<0.000000e+00> : vector<8x128xf32>
    %80 = tpu.matmul %71, %79, %cst_56 {dimension_numbers = #tpu.dot_dimension_numbers<[1], [0], [0], [1], [0, 0, 1, 1], [], []>} : vector<8x128xf32>, vector<128x128xf32>, vector<8x128xf32> -> vector<8x128xf32>
    %81 = arith.addf %78, %80 : vector<8x128xf32>
    %82 = math.tanh %81 : vector<8x128xf32>
    %83 = arith.index_cast %c6_i32 : i32 to index
    %c0_57 = arith.constant 0 : index
    %c0_58 = arith.constant 0 : index
    %84 = vector.load %arg12[%83, %c0_57, %c0_58] : memref<8x8x128xf32, #tpu.memory_space<vmem>>, vector<1x8x128xf32>
    %85 = vector.shape_cast %84 : vector<1x8x128xf32> to vector<8x128xf32>
    %86 = vector.shape_cast %82 : vector<8x128xf32> to vector<1x8x128xf32>
    tpu.vector_store %arg12[%83, %c0_57, %c0_58], %86 {strides = array<i32>} : memref<8x8x128xf32, #tpu.memory_space<vmem>>, vector<1x8x128xf32>,
    %c7_i32 = arith.constant 7 : i32
    %87 = arith.index_cast %c7_i32 : i32 to index
    %c0_59 = arith.constant 0 : index
    %c0_60 = arith.constant 0 : index
    %88 = vector.load %arg11[%87, %c0_59, %c0_60] : memref<8x8x128xf32, #tpu.memory_space<vmem>>, vector<1x8x128xf32>
    %89 = vector.shape_cast %88 : vector<1x8x128xf32> to vector<8x128xf32>
    %c0_61 = arith.constant 0 : index
    %c0_62 = arith.constant 0 : index
    %90 = vector.load %arg3[%c0_61, %c0_62] : memref<128x128xf32, #tpu.memory_space<vmem>>, vector<128x128xf32>
    %cst_63 = arith.constant dense<0.000000e+00> : vector<8x128xf32>
    %91 = tpu.matmul %82, %90, %cst_63 {dimension_numbers = #tpu.dot_dimension_numbers<[1], [0], [0], [1], [0, 0, 1, 1], [], []>} : vector<8x128xf32>, vector<128x128xf32>, vector<8x128xf32> -> vector<8x128xf32>
    %92 = arith.addf %89, %91 : vector<8x128xf32>
    %93 = math.tanh %92 : vector<8x128xf32>
    %94 = arith.index_cast %c7_i32 : i32 to index
    %c0_64 = arith.constant 0 : index
    %c0_65 = arith.constant 0 : index
    %95 = vector.load %arg12[%94, %c0_64, %c0_65] : memref<8x8x128xf32, #tpu.memory_space<vmem>>, vector<1x8x128xf32>
    %96 = vector.shape_cast %95 : vector<1x8x128xf32> to vector<8x128xf32>
    %97 = vector.shape_cast %93 : vector<8x128xf32> to vector<1x8x128xf32>
    tpu.vector_store %arg12[%94, %c0_64, %c0_65], %97 {strides = array<i32>} : memref<8x8x128xf32, #tpu.memory_space<vmem>>, vector<1x8x128xf32>,
    %c8_i32 = arith.constant 8 : i32
    %c0_66 = arith.constant 0 : index
    %c0_67 = arith.constant 0 : index
    %98 = vector.load %arg7[%c0_66, %c0_67] : memref<1x128xf32, #tpu.memory_space<vmem>>, vector<1x128xf32>
    %c0_68 = arith.constant 0 : index
    %c0_69 = arith.constant 0 : index
    %c0_70 = arith.constant 0 : index
    %99 = vector.load %arg12[%c0_68, %c0_69, %c0_70] : memref<8x8x128xf32, #tpu.memory_space<vmem>>, vector<8x8x128xf32>
    %100 = vector.shape_cast %99 : vector<8x8x128xf32> to vector<64x128xf32>
    %c0_71 = arith.constant 0 : index
    %c0_72 = arith.constant 0 : index
    %101 = vector.load %arg5[%c0_71, %c0_72] : memref<128x128xf32, #tpu.memory_space<vmem>>, vector<128x128xf32>
    %cst_73 = arith.constant dense<0.000000e+00> : vector<64x128xf32>
    %102 = tpu.matmul %100, %101, %cst_73 {dimension_numbers = #tpu.dot_dimension_numbers<[1], [0], [0], [1], [0, 0, 1, 1], [], []>} : vector<64x128xf32>, vector<128x128xf32>, vector<64x128xf32> -> vector<64x128xf32>
    %103 = vector.broadcast %98 : vector<1x128xf32> to vector<64x128xf32>
    %104 = arith.addf %102, %103 : vector<64x128xf32>
    %105 = vector.shape_cast %104 : vector<64x128xf32> to vector<8x8x128xf32>
    %c0_74 = arith.constant 0 : index
    %c0_75 = arith.constant 0 : index
    %c0_76 = arith.constant 0 : index
    %106 = vector.load %arg11[%c0_74, %c0_75, %c0_76] : memref<8x8x128xf32, #tpu.memory_space<vmem>>, vector<8x8x128xf32>
    tpu.vector_store %arg11[%c0_74, %c0_75, %c0_76], %105 {strides = array<i32>} : memref<8x8x128xf32, #tpu.memory_space<vmem>>, vector<8x8x128xf32>,
    %cst_77 = arith.constant 0.000000e+00 : f32
    %107 = vector.broadcast %cst_77 : f32 to vector<8x128xf32>
    %c0_i32_78 = arith.constant 0 : i32
    %108 = arith.index_cast %c0_i32_78 : i32 to index
    %c0_79 = arith.constant 0 : index
    %c0_80 = arith.constant 0 : index
    %109 = vector.load %arg11[%108, %c0_79, %c0_80] : memref<8x8x128xf32, #tpu.memory_space<vmem>>, vector<1x8x128xf32>
    %110 = vector.shape_cast %109 : vector<1x8x128xf32> to vector<8x128xf32>
    %c0_81 = arith.constant 0 : index
    %c0_82 = arith.constant 0 : index
    %111 = vector.load %arg6[%c0_81, %c0_82] : memref<128x128xf32, #tpu.memory_space<vmem>>, vector<128x128xf32>
    %cst_83 = arith.constant dense<0.000000e+00> : vector<8x128xf32>
    %112 = tpu.matmul %107, %111, %cst_83 {dimension_numbers = #tpu.dot_dimension_numbers<[1], [0], [0], [1], [0, 0, 1, 1], [], []>} : vector<8x128xf32>, vector<128x128xf32>, vector<8x128xf32> -> vector<8x128xf32>
    %113 = arith.addf %110, %112 : vector<8x128xf32>
    %114 = math.tanh %113 : vector<8x128xf32>
    %c1_i32_84 = arith.constant 1 : i32
    %115 = arith.index_cast %c1_i32_84 : i32 to index
    %c0_85 = arith.constant 0 : index
    %c0_86 = arith.constant 0 : index
    %116 = vector.load %arg11[%115, %c0_85, %c0_86] : memref<8x8x128xf32, #tpu.memory_space<vmem>>, vector<1x8x128xf32>
    %117 = vector.shape_cast %116 : vector<1x8x128xf32> to vector<8x128xf32>
    %c0_87 = arith.constant 0 : index
    %c0_88 = arith.constant 0 : index
    %118 = vector.load %arg6[%c0_87, %c0_88] : memref<128x128xf32, #tpu.memory_space<vmem>>, vector<128x128xf32>
    %cst_89 = arith.constant dense<0.000000e+00> : vector<8x128xf32>
    %119 = tpu.matmul %114, %118, %cst_89 {dimension_numbers = #tpu.dot_dimension_numbers<[1], [0], [0], [1], [0, 0, 1, 1], [], []>} : vector<8x128xf32>, vector<128x128xf32>, vector<8x128xf32> -> vector<8x128xf32>
    %120 = arith.addf %117, %119 : vector<8x128xf32>
    %121 = math.tanh %120 : vector<8x128xf32>
    %c2_i32_90 = arith.constant 2 : i32
    %122 = arith.index_cast %c2_i32_90 : i32 to index
    %c0_91 = arith.constant 0 : index
    %c0_92 = arith.constant 0 : index
    %123 = vector.load %arg11[%122, %c0_91, %c0_92] : memref<8x8x128xf32, #tpu.memory_space<vmem>>, vector<1x8x128xf32>
    %124 = vector.shape_cast %123 : vector<1x8x128xf32> to vector<8x128xf32>
    %c0_93 = arith.constant 0 : index
    %c0_94 = arith.constant 0 : index
    %125 = vector.load %arg6[%c0_93, %c0_94] : memref<128x128xf32, #tpu.memory_space<vmem>>, vector<128x128xf32>
    %cst_95 = arith.constant dense<0.000000e+00> : vector<8x128xf32>
    %126 = tpu.matmul %121, %125, %cst_95 {dimension_numbers = #tpu.dot_dimension_numbers<[1], [0], [0], [1], [0, 0, 1, 1], [], []>} : vector<8x128xf32>, vector<128x128xf32>, vector<8x128xf32> -> vector<8x128xf32>
    %127 = arith.addf %124, %126 : vector<8x128xf32>
    %128 = math.tanh %127 : vector<8x128xf32>
    %c3_i32_96 = arith.constant 3 : i32
    %129 = arith.index_cast %c3_i32_96 : i32 to index
    %c0_97 = arith.constant 0 : index
    %c0_98 = arith.constant 0 : index
    %130 = vector.load %arg11[%129, %c0_97, %c0_98] : memref<8x8x128xf32, #tpu.memory_space<vmem>>, vector<1x8x128xf32>
    %131 = vector.shape_cast %130 : vector<1x8x128xf32> to vector<8x128xf32>
    %c0_99 = arith.constant 0 : index
    %c0_100 = arith.constant 0 : index
    %132 = vector.load %arg6[%c0_99, %c0_100] : memref<128x128xf32, #tpu.memory_space<vmem>>, vector<128x128xf32>
    %cst_101 = arith.constant dense<0.000000e+00> : vector<8x128xf32>
    %133 = tpu.matmul %128, %132, %cst_101 {dimension_numbers = #tpu.dot_dimension_numbers<[1], [0], [0], [1], [0, 0, 1, 1], [], []>} : vector<8x128xf32>, vector<128x128xf32>, vector<8x128xf32> -> vector<8x128xf32>
    %134 = arith.addf %131, %133 : vector<8x128xf32>
    %135 = math.tanh %134 : vector<8x128xf32>
    %c4_i32_102 = arith.constant 4 : i32
    %136 = arith.index_cast %c4_i32_102 : i32 to index
    %c0_103 = arith.constant 0 : index
    %c0_104 = arith.constant 0 : index
    %137 = vector.load %arg11[%136, %c0_103, %c0_104] : memref<8x8x128xf32, #tpu.memory_space<vmem>>, vector<1x8x128xf32>
    %138 = vector.shape_cast %137 : vector<1x8x128xf32> to vector<8x128xf32>
    %c0_105 = arith.constant 0 : index
    %c0_106 = arith.constant 0 : index
    %139 = vector.load %arg6[%c0_105, %c0_106] : memref<128x128xf32, #tpu.memory_space<vmem>>, vector<128x128xf32>
    %cst_107 = arith.constant dense<0.000000e+00> : vector<8x128xf32>
    %140 = tpu.matmul %135, %139, %cst_107 {dimension_numbers = #tpu.dot_dimension_numbers<[1], [0], [0], [1], [0, 0, 1, 1], [], []>} : vector<8x128xf32>, vector<128x128xf32>, vector<8x128xf32> -> vector<8x128xf32>
    %141 = arith.addf %138, %140 : vector<8x128xf32>
    %142 = math.tanh %141 : vector<8x128xf32>
    %c5_i32_108 = arith.constant 5 : i32
    %143 = arith.index_cast %c5_i32_108 : i32 to index
    %c0_109 = arith.constant 0 : index
    %c0_110 = arith.constant 0 : index
    %144 = vector.load %arg11[%143, %c0_109, %c0_110] : memref<8x8x128xf32, #tpu.memory_space<vmem>>, vector<1x8x128xf32>
    %145 = vector.shape_cast %144 : vector<1x8x128xf32> to vector<8x128xf32>
    %c0_111 = arith.constant 0 : index
    %c0_112 = arith.constant 0 : index
    %146 = vector.load %arg6[%c0_111, %c0_112] : memref<128x128xf32, #tpu.memory_space<vmem>>, vector<128x128xf32>
    %cst_113 = arith.constant dense<0.000000e+00> : vector<8x128xf32>
    %147 = tpu.matmul %142, %146, %cst_113 {dimension_numbers = #tpu.dot_dimension_numbers<[1], [0], [0], [1], [0, 0, 1, 1], [], []>} : vector<8x128xf32>, vector<128x128xf32>, vector<8x128xf32> -> vector<8x128xf32>
    %148 = arith.addf %145, %147 : vector<8x128xf32>
    %149 = math.tanh %148 : vector<8x128xf32>
    %c6_i32_114 = arith.constant 6 : i32
    %150 = arith.index_cast %c6_i32_114 : i32 to index
    %c0_115 = arith.constant 0 : index
    %c0_116 = arith.constant 0 : index
    %151 = vector.load %arg11[%150, %c0_115, %c0_116] : memref<8x8x128xf32, #tpu.memory_space<vmem>>, vector<1x8x128xf32>
    %152 = vector.shape_cast %151 : vector<1x8x128xf32> to vector<8x128xf32>
    %c0_117 = arith.constant 0 : index
    %c0_118 = arith.constant 0 : index
    %153 = vector.load %arg6[%c0_117, %c0_118] : memref<128x128xf32, #tpu.memory_space<vmem>>, vector<128x128xf32>
    %cst_119 = arith.constant dense<0.000000e+00> : vector<8x128xf32>
    %154 = tpu.matmul %149, %153, %cst_119 {dimension_numbers = #tpu.dot_dimension_numbers<[1], [0], [0], [1], [0, 0, 1, 1], [], []>} : vector<8x128xf32>, vector<128x128xf32>, vector<8x128xf32> -> vector<8x128xf32>
    %155 = arith.addf %152, %154 : vector<8x128xf32>
    %156 = math.tanh %155 : vector<8x128xf32>
    %c7_i32_120 = arith.constant 7 : i32
    %157 = arith.index_cast %c7_i32_120 : i32 to index
    %c0_121 = arith.constant 0 : index
    %c0_122 = arith.constant 0 : index
    %158 = vector.load %arg11[%157, %c0_121, %c0_122] : memref<8x8x128xf32, #tpu.memory_space<vmem>>, vector<1x8x128xf32>
    %159 = vector.shape_cast %158 : vector<1x8x128xf32> to vector<8x128xf32>
    %c0_123 = arith.constant 0 : index
    %c0_124 = arith.constant 0 : index
    %160 = vector.load %arg6[%c0_123, %c0_124] : memref<128x128xf32, #tpu.memory_space<vmem>>, vector<128x128xf32>
    %cst_125 = arith.constant dense<0.000000e+00> : vector<8x128xf32>
    %161 = tpu.matmul %156, %160, %cst_125 {dimension_numbers = #tpu.dot_dimension_numbers<[1], [0], [0], [1], [0, 0, 1, 1], [], []>} : vector<8x128xf32>, vector<128x128xf32>, vector<8x128xf32> -> vector<8x128xf32>
    %162 = arith.addf %159, %161 : vector<8x128xf32>
    %163 = math.tanh %162 : vector<8x128xf32>
    %c8_i32_126 = arith.constant 8 : i32
    %c0_127 = arith.constant 0 : index
    %c0_128 = arith.constant 0 : index
    %164 = vector.load %arg8[%c0_127, %c0_128] : memref<128x128xf32, #tpu.memory_space<vmem>>, vector<128x128xf32>
    %cst_129 = arith.constant dense<0.000000e+00> : vector<8x128xf32>
    %165 = tpu.matmul %163, %164, %cst_129 {dimension_numbers = #tpu.dot_dimension_numbers<[1], [0], [0], [1], [0, 0, 1, 1], [], []>} : vector<8x128xf32>, vector<128x128xf32>, vector<8x128xf32> -> vector<8x128xf32>
    %c0_130 = arith.constant 0 : index
    %c0_131 = arith.constant 0 : index
    %166 = vector.load %arg9[%c0_130, %c0_131] : memref<1x128xf32, #tpu.memory_space<vmem>>, vector<1x128xf32>
    %167 = vector.broadcast %166 : vector<1x128xf32> to vector<8x128xf32>
    %168 = arith.addf %165, %167 : vector<8x128xf32>
    %c0_132 = arith.constant 0 : index
    %c0_133 = arith.constant 0 : index
    %169 = vector.load %arg10[%c0_132, %c0_133] : memref<8x128xf32, #tpu.memory_space<vmem>>, vector<8x128xf32>
    tpu.vector_store %arg10[%c0_132, %c0_133], %168 {strides = array<i32>} : memref<8x128xf32, #tpu.memory_space<vmem>>, vector<8x128xf32>,
    return
  }
  func.func @transform_0(%arg0: i32) -> (i32, i32, i32) {
    %c0_i32 = arith.constant 0 : i32
    %c0_i32_0 = arith.constant 0 : i32
    %c0_i32_1 = arith.constant 0 : i32
    return %c0_i32, %arg0, %c0_i32_0 : i32, i32, i32
  }
  func.func @transform_1(%arg0: i32) -> (i32, i32) {
    %c0_i32 = arith.constant 0 : i32
    %c0_i32_0 = arith.constant 0 : i32
    %c0_i32_1 = arith.constant 0 : i32
    return %c0_i32, %c0_i32_0 : i32, i32
  }
  func.func @transform_2(%arg0: i32) -> (i32, i32) {
    %c0_i32 = arith.constant 0 : i32
    %c0_i32_0 = arith.constant 0 : i32
    %c0_i32_1 = arith.constant 0 : i32
    return %c0_i32, %c0_i32_0 : i32, i32
  }
  func.func @transform_3(%arg0: i32) -> (i32, i32) {
    %c0_i32 = arith.constant 0 : i32
    %c0_i32_0 = arith.constant 0 : i32
    %c0_i32_1 = arith.constant 0 : i32
    return %c0_i32, %c0_i32_0 : i32, i32
  }
  func.func @transform_4(%arg0: i32) -> (i32, i32) {
    %c0_i32 = arith.constant 0 : i32
    %c0_i32_0 = arith.constant 0 : i32
    %c0_i32_1 = arith.constant 0 : i32
    return %c0_i32, %c0_i32_0 : i32, i32
  }
  func.func @transform_5(%arg0: i32) -> (i32, i32) {
    %c0_i32 = arith.constant 0 : i32
    %c0_i32_0 = arith.constant 0 : i32
    %c0_i32_1 = arith.constant 0 : i32
    return %c0_i32, %c0_i32_0 : i32, i32
  }
  func.func @transform_6(%arg0: i32) -> (i32, i32) {
    %c0_i32 = arith.constant 0 : i32
    %c0_i32_0 = arith.constant 0 : i32
    %c0_i32_1 = arith.constant 0 : i32
    return %c0_i32, %c0_i32_0 : i32, i32
  }
  func.func @transform_7(%arg0: i32) -> (i32, i32) {
    %c0_i32 = arith.constant 0 : i32
    %c0_i32_0 = arith.constant 0 : i32
    %c0_i32_1 = arith.constant 0 : i32
    return %c0_i32, %c0_i32_0 : i32, i32
  }
  func.func @transform_8(%arg0: i32) -> (i32, i32) {
    %c0_i32 = arith.constant 0 : i32
    %c0_i32_0 = arith.constant 0 : i32
    %c0_i32_1 = arith.constant 0 : i32
    return %c0_i32, %c0_i32_0 : i32, i32
  }
  func.func @transform_9(%arg0: i32) -> (i32, i32) {
    %c0_i32 = arith.constant 0 : i32
    %c0_i32_0 = arith.constant 0 : i32
    return %arg0, %c0_i32 : i32, i32
  }
}

module attributes {stable_mosaic.version = 11 : i64} {
  func.func @kernel(%arg0: i32, %arg1: memref<8x8x128xf32, #tpu.memory_space<vmem>>, %arg2: memref<128x128xf32, #tpu.memory_space<vmem>>, %arg3: memref<128x128xf32, #tpu.memory_space<vmem>>, %arg4: memref<1x128xf32, #tpu.memory_space<vmem>>, %arg5: memref<128x128xf32, #tpu.memory_space<vmem>>, %arg6: memref<128x128xf32, #tpu.memory_space<vmem>>, %arg7: memref<1x128xf32, #tpu.memory_space<vmem>>, %arg8: memref<128x128xf32, #tpu.memory_space<vmem>>, %arg9: memref<1x128xf32, #tpu.memory_space<vmem>>, %arg10: memref<8x128xf32, #tpu.memory_space<vmem>>, %arg11: memref<8x8x128xf32, #tpu.memory_space<vmem>>, %arg12: memref<8x8x128xf32, #tpu.memory_space<vmem>>) attributes {dimension_semantics = [#tpu.dimension_semantics<parallel>], iteration_bounds = array<i64: 1>, scalar_prefetch = 0 : i64, scratch_operands = 2 : i64, tpu.core_type = #tpu.core_type<tc>, window_params = [{transform_indices = @transform_0, window_bounds = array<i64: 8, 8, 128>}, {pipeline_mode = #tpu.pipeline_mode<synchronous>, transform_indices = @transform_1, window_bounds = array<i64: 128, 128>}, {pipeline_mode = #tpu.pipeline_mode<synchronous>, transform_indices = @transform_2, window_bounds = array<i64: 128, 128>}, {pipeline_mode = #tpu.pipeline_mode<synchronous>, transform_indices = @transform_3, window_bounds = array<i64: 1, 128>}, {pipeline_mode = #tpu.pipeline_mode<synchronous>, transform_indices = @transform_4, window_bounds = array<i64: 128, 128>}, {pipeline_mode = #tpu.pipeline_mode<synchronous>, transform_indices = @transform_5, window_bounds = array<i64: 128, 128>}, {pipeline_mode = #tpu.pipeline_mode<synchronous>, transform_indices = @transform_6, window_bounds = array<i64: 1, 128>}, {pipeline_mode = #tpu.pipeline_mode<synchronous>, transform_indices = @transform_7, window_bounds = array<i64: 128, 128>}, {pipeline_mode = #tpu.pipeline_mode<synchronous>, transform_indices = @transform_8, window_bounds = array<i64: 1, 128>}, {transform_indices = @transform_9, window_bounds = array<i64: 8, 128>}]} {
    %c0 = arith.constant 0 : index
    %c0_0 = arith.constant 0 : index
    %0 = vector.load %arg4[%c0, %c0_0] : memref<1x128xf32, #tpu.memory_space<vmem>>, vector<1x128xf32>
    %c0_1 = arith.constant 0 : index
    %c0_2 = arith.constant 0 : index
    %c0_3 = arith.constant 0 : index
    %1 = vector.load %arg1[%c0_1, %c0_2, %c0_3] : memref<8x8x128xf32, #tpu.memory_space<vmem>>, vector<8x8x128xf32>
    %2 = vector.shape_cast %1 : vector<8x8x128xf32> to vector<64x128xf32>
    %c0_4 = arith.constant 0 : index
    %c0_5 = arith.constant 0 : index
    %3 = vector.load %arg2[%c0_4, %c0_5] : memref<128x128xf32, #tpu.memory_space<vmem>>, vector<128x128xf32>
    %cst = arith.constant dense<0.000000e+00> : vector<64x128xf32>
    %4 = tpu.matmul %2, %3, %cst {dimension_numbers = #tpu.dot_dimension_numbers<[1], [0], [0], [1], [0, 0, 1, 1], [], []>} : vector<64x128xf32>, vector<128x128xf32>, vector<64x128xf32> -> vector<64x128xf32>
    %5 = vector.broadcast %0 : vector<1x128xf32> to vector<64x128xf32>
    %6 = arith.addf %4, %5 : vector<64x128xf32>
    %7 = vector.shape_cast %6 : vector<64x128xf32> to vector<8x8x128xf32>
    %c0_6 = arith.constant 0 : index
    %c0_7 = arith.constant 0 : index
    %c0_8 = arith.constant 0 : index
    %8 = vector.load %arg11[%c0_6, %c0_7, %c0_8] : memref<8x8x128xf32, #tpu.memory_space<vmem>>, vector<8x8x128xf32>
    tpu.vector_store %arg11[%c0_6, %c0_7, %c0_8], %7 {strides = array<i32>} : memref<8x8x128xf32, #tpu.memory_space<vmem>>, vector<8x8x128xf32>,
    %cst_9 = arith.constant 0.000000e+00 : f32
    %9 = vector.broadcast %cst_9 : f32 to vector<8x128xf32>
    %c0_i32 = arith.constant 0 : i32
    %10 = arith.index_cast %c0_i32 : i32 to index
    %c0_10 = arith.constant 0 : index
    %c0_11 = arith.constant 0 : index
    %11 = vector.load %arg11[%10, %c0_10, %c0_11] : memref<8x8x128xf32, #tpu.memory_space<vmem>>, vector<1x8x128xf32>
    %12 = vector.shape_cast %11 : vector<1x8x128xf32> to vector<8x128xf32>
    %c0_12 = arith.constant 0 : index
    %c0_13 = arith.constant 0 : index
    %13 = vector.load %arg3[%c0_12, %c0_13] : memref<128x128xf32, #tpu.memory_space<vmem>>, vector<128x128xf32>
    %cst_14 = arith.constant dense<0.000000e+00> : vector<8x128xf32>
    %14 = tpu.matmul %9, %13, %cst_14 {dimension_numbers = #tpu.dot_dimension_numbers<[1], [0], [0], [1], [0, 0, 1, 1], [], []>} : vector<8x128xf32>, vector<128x128xf32>, vector<8x128xf32> -> vector<8x128xf32>
    %15 = arith.addf %12, %14 : vector<8x128xf32>
    %16 = math.tanh %15 : vector<8x128xf32>
    %17 = arith.index_cast %c0_i32 : i32 to index
    %c0_15 = arith.constant 0 : index
    %c0_16 = arith.constant 0 : index
    %18 = vector.load %arg12[%17, %c0_15, %c0_16] : memref<8x8x128xf32, #tpu.memory_space<vmem>>, vector<1x8x128xf32>
    %19 = vector.shape_cast %18 : vector<1x8x128xf32> to vector<8x128xf32>
    %20 = vector.shape_cast %16 : vector<8x128xf32> to vector<1x8x128xf32>
    tpu.vector_store %arg12[%17, %c0_15, %c0_16], %20 {strides = array<i32>} : memref<8x8x128xf32, #tpu.memory_space<vmem>>, vector<1x8x128xf32>,
    %c1_i32 = arith.constant 1 : i32
    %21 = arith.index_cast %c1_i32 : i32 to index
    %c0_17 = arith.constant 0 : index
    %c0_18 = arith.constant 0 : index
    %22 = vector.load %arg11[%21, %c0_17, %c0_18] : memref<8x8x128xf32, #tpu.memory_space<vmem>>, vector<1x8x128xf32>
    %23 = vector.shape_cast %22 : vector<1x8x128xf32> to vector<8x128xf32>
    %c0_19 = arith.constant 0 : index
    %c0_20 = arith.constant 0 : index
    %24 = vector.load %arg3[%c0_19, %c0_20] : memref<128x128xf32, #tpu.memory_space<vmem>>, vector<128x128xf32>
    %cst_21 = arith.constant dense<0.000000e+00> : vector<8x128xf32>
    %25 = tpu.matmul %16, %24, %cst_21 {dimension_numbers = #tpu.dot_dimension_numbers<[1], [0], [0], [1], [0, 0, 1, 1], [], []>} : vector<8x128xf32>, vector<128x128xf32>, vector<8x128xf32> -> vector<8x128xf32>
    %26 = arith.addf %23, %25 : vector<8x128xf32>
    %27 = math.tanh %26 : vector<8x128xf32>
    %28 = arith.index_cast %c1_i32 : i32 to index
    %c0_22 = arith.constant 0 : index
    %c0_23 = arith.constant 0 : index
    %29 = vector.load %arg12[%28, %c0_22, %c0_23] : memref<8x8x128xf32, #tpu.memory_space<vmem>>, vector<1x8x128xf32>
    %30 = vector.shape_cast %29 : vector<1x8x128xf32> to vector<8x128xf32>
    %31 = vector.shape_cast %27 : vector<8x128xf32> to vector<1x8x128xf32>
    tpu.vector_store %arg12[%28, %c0_22, %c0_23], %31 {strides = array<i32>} : memref<8x8x128xf32, #tpu.memory_space<vmem>>, vector<1x8x128xf32>,
    %c2_i32 = arith.constant 2 : i32
    %32 = arith.index_cast %c2_i32 : i32 to index
    %c0_24 = arith.constant 0 : index
    %c0_25 = arith.constant 0 : index
    %33 = vector.load %arg11[%32, %c0_24, %c0_25] : memref<8x8x128xf32, #tpu.memory_space<vmem>>, vector<1x8x128xf32>
    %34 = vector.shape_cast %33 : vector<1x8x128xf32> to vector<8x128xf32>
    %c0_26 = arith.constant 0 : index
    %c0_27 = arith.constant 0 : index
    %35 = vector.load %arg3[%c0_26, %c0_27] : memref<128x128xf32, #tpu.memory_space<vmem>>, vector<128x128xf32>
    %cst_28 = arith.constant dense<0.000000e+00> : vector<8x128xf32>
    %36 = tpu.matmul %27, %35, %cst_28 {dimension_numbers = #tpu.dot_dimension_numbers<[1], [0], [0], [1], [0, 0, 1, 1], [], []>} : vector<8x128xf32>, vector<128x128xf32>, vector<8x128xf32> -> vector<8x128xf32>
    %37 = arith.addf %34, %36 : vector<8x128xf32>
    %38 = math.tanh %37 : vector<8x128xf32>
    %39 = arith.index_cast %c2_i32 : i32 to index
    %c0_29 = arith.constant 0 : index
    %c0_30 = arith.constant 0 : index
    %40 = vector.load %arg12[%39, %c0_29, %c0_30] : memref<8x8x128xf32, #tpu.memory_space<vmem>>, vector<1x8x128xf32>
    %41 = vector.shape_cast %40 : vector<1x8x128xf32> to vector<8x128xf32>
    %42 = vector.shape_cast %38 : vector<8x128xf32> to vector<1x8x128xf32>
    tpu.vector_store %arg12[%39, %c0_29, %c0_30], %42 {strides = array<i32>} : memref<8x8x128xf32, #tpu.memory_space<vmem>>, vector<1x8x128xf32>,
    %c3_i32 = arith.constant 3 : i32
    %43 = arith.index_cast %c3_i32 : i32 to index
    %c0_31 = arith.constant 0 : index
    %c0_32 = arith.constant 0 : index
    %44 = vector.load %arg11[%43, %c0_31, %c0_32] : memref<8x8x128xf32, #tpu.memory_space<vmem>>, vector<1x8x128xf32>
    %45 = vector.shape_cast %44 : vector<1x8x128xf32> to vector<8x128xf32>
    %c0_33 = arith.constant 0 : index
    %c0_34 = arith.constant 0 : index
    %46 = vector.load %arg3[%c0_33, %c0_34] : memref<128x128xf32, #tpu.memory_space<vmem>>, vector<128x128xf32>
    %cst_35 = arith.constant dense<0.000000e+00> : vector<8x128xf32>
    %47 = tpu.matmul %38, %46, %cst_35 {dimension_numbers = #tpu.dot_dimension_numbers<[1], [0], [0], [1], [0, 0, 1, 1], [], []>} : vector<8x128xf32>, vector<128x128xf32>, vector<8x128xf32> -> vector<8x128xf32>
    %48 = arith.addf %45, %47 : vector<8x128xf32>
    %49 = math.tanh %48 : vector<8x128xf32>
    %50 = arith.index_cast %c3_i32 : i32 to index
    %c0_36 = arith.constant 0 : index
    %c0_37 = arith.constant 0 : index
    %51 = vector.load %arg12[%50, %c0_36, %c0_37] : memref<8x8x128xf32, #tpu.memory_space<vmem>>, vector<1x8x128xf32>
    %52 = vector.shape_cast %51 : vector<1x8x128xf32> to vector<8x128xf32>
    %53 = vector.shape_cast %49 : vector<8x128xf32> to vector<1x8x128xf32>
    tpu.vector_store %arg12[%50, %c0_36, %c0_37], %53 {strides = array<i32>} : memref<8x8x128xf32, #tpu.memory_space<vmem>>, vector<1x8x128xf32>,
    %c4_i32 = arith.constant 4 : i32
    %54 = arith.index_cast %c4_i32 : i32 to index
    %c0_38 = arith.constant 0 : index
    %c0_39 = arith.constant 0 : index
    %55 = vector.load %arg11[%54, %c0_38, %c0_39] : memref<8x8x128xf32, #tpu.memory_space<vmem>>, vector<1x8x128xf32>
    %56 = vector.shape_cast %55 : vector<1x8x128xf32> to vector<8x128xf32>
    %c0_40 = arith.constant 0 : index
    %c0_41 = arith.constant 0 : index
    %57 = vector.load %arg3[%c0_40, %c0_41] : memref<128x128xf32, #tpu.memory_space<vmem>>, vector<128x128xf32>
    %cst_42 = arith.constant dense<0.000000e+00> : vector<8x128xf32>
    %58 = tpu.matmul %49, %57, %cst_42 {dimension_numbers = #tpu.dot_dimension_numbers<[1], [0], [0], [1], [0, 0, 1, 1], [], []>} : vector<8x128xf32>, vector<128x128xf32>, vector<8x128xf32> -> vector<8x128xf32>
    %59 = arith.addf %56, %58 : vector<8x128xf32>
    %60 = math.tanh %59 : vector<8x128xf32>
    %61 = arith.index_cast %c4_i32 : i32 to index
    %c0_43 = arith.constant 0 : index
    %c0_44 = arith.constant 0 : index
    %62 = vector.load %arg12[%61, %c0_43, %c0_44] : memref<8x8x128xf32, #tpu.memory_space<vmem>>, vector<1x8x128xf32>
    %63 = vector.shape_cast %62 : vector<1x8x128xf32> to vector<8x128xf32>
    %64 = vector.shape_cast %60 : vector<8x128xf32> to vector<1x8x128xf32>
    tpu.vector_store %arg12[%61, %c0_43, %c0_44], %64 {strides = array<i32>} : memref<8x8x128xf32, #tpu.memory_space<vmem>>, vector<1x8x128xf32>,
    %c5_i32 = arith.constant 5 : i32
    %65 = arith.index_cast %c5_i32 : i32 to index
    %c0_45 = arith.constant 0 : index
    %c0_46 = arith.constant 0 : index
    %66 = vector.load %arg11[%65, %c0_45, %c0_46] : memref<8x8x128xf32, #tpu.memory_space<vmem>>, vector<1x8x128xf32>
    %67 = vector.shape_cast %66 : vector<1x8x128xf32> to vector<8x128xf32>
    %c0_47 = arith.constant 0 : index
    %c0_48 = arith.constant 0 : index
    %68 = vector.load %arg3[%c0_47, %c0_48] : memref<128x128xf32, #tpu.memory_space<vmem>>, vector<128x128xf32>
    %cst_49 = arith.constant dense<0.000000e+00> : vector<8x128xf32>
    %69 = tpu.matmul %60, %68, %cst_49 {dimension_numbers = #tpu.dot_dimension_numbers<[1], [0], [0], [1], [0, 0, 1, 1], [], []>} : vector<8x128xf32>, vector<128x128xf32>, vector<8x128xf32> -> vector<8x128xf32>
    %70 = arith.addf %67, %69 : vector<8x128xf32>
    %71 = math.tanh %70 : vector<8x128xf32>
    %72 = arith.index_cast %c5_i32 : i32 to index
    %c0_50 = arith.constant 0 : index
    %c0_51 = arith.constant 0 : index
    %73 = vector.load %arg12[%72, %c0_50, %c0_51] : memref<8x8x128xf32, #tpu.memory_space<vmem>>, vector<1x8x128xf32>
    %74 = vector.shape_cast %73 : vector<1x8x128xf32> to vector<8x128xf32>
    %75 = vector.shape_cast %71 : vector<8x128xf32> to vector<1x8x128xf32>
    tpu.vector_store %arg12[%72, %c0_50, %c0_51], %75 {strides = array<i32>} : memref<8x8x128xf32, #tpu.memory_space<vmem>>, vector<1x8x128xf32>,
    %c6_i32 = arith.constant 6 : i32
    %76 = arith.index_cast %c6_i32 : i32 to index
    %c0_52 = arith.constant 0 : index
    %c0_53 = arith.constant 0 : index
    %77 = vector.load %arg11[%76, %c0_52, %c0_53] : memref<8x8x128xf32, #tpu.memory_space<vmem>>, vector<1x8x128xf32>
    %78 = vector.shape_cast %77 : vector<1x8x128xf32> to vector<8x128xf32>
    %c0_54 = arith.constant 0 : index
    %c0_55 = arith.constant 0 : index
    %79 = vector.load %arg3[%c0_54, %c0_55] : memref<128x128xf32, #tpu.memory_space<vmem>>, vector<128x128xf32>
    %cst_56 = arith.constant dense<0.000000e+00> : vector<8x128xf32>
    %80 = tpu.matmul %71, %79, %cst_56 {dimension_numbers = #tpu.dot_dimension_numbers<[1], [0], [0], [1], [0, 0, 1, 1], [], []>} : vector<8x128xf32>, vector<128x128xf32>, vector<8x128xf32> -> vector<8x128xf32>
    %81 = arith.addf %78, %80 : vector<8x128xf32>
    %82 = math.tanh %81 : vector<8x128xf32>
    %83 = arith.index_cast %c6_i32 : i32 to index
    %c0_57 = arith.constant 0 : index
    %c0_58 = arith.constant 0 : index
    %84 = vector.load %arg12[%83, %c0_57, %c0_58] : memref<8x8x128xf32, #tpu.memory_space<vmem>>, vector<1x8x128xf32>
    %85 = vector.shape_cast %84 : vector<1x8x128xf32> to vector<8x128xf32>
    %86 = vector.shape_cast %82 : vector<8x128xf32> to vector<1x8x128xf32>
    tpu.vector_store %arg12[%83, %c0_57, %c0_58], %86 {strides = array<i32>} : memref<8x8x128xf32, #tpu.memory_space<vmem>>, vector<1x8x128xf32>,
    %c7_i32 = arith.constant 7 : i32
    %87 = arith.index_cast %c7_i32 : i32 to index
    %c0_59 = arith.constant 0 : index
    %c0_60 = arith.constant 0 : index
    %88 = vector.load %arg11[%87, %c0_59, %c0_60] : memref<8x8x128xf32, #tpu.memory_space<vmem>>, vector<1x8x128xf32>
    %89 = vector.shape_cast %88 : vector<1x8x128xf32> to vector<8x128xf32>
    %c0_61 = arith.constant 0 : index
    %c0_62 = arith.constant 0 : index
    %90 = vector.load %arg3[%c0_61, %c0_62] : memref<128x128xf32, #tpu.memory_space<vmem>>, vector<128x128xf32>
    %cst_63 = arith.constant dense<0.000000e+00> : vector<8x128xf32>
    %91 = tpu.matmul %82, %90, %cst_63 {dimension_numbers = #tpu.dot_dimension_numbers<[1], [0], [0], [1], [0, 0, 1, 1], [], []>} : vector<8x128xf32>, vector<128x128xf32>, vector<8x128xf32> -> vector<8x128xf32>
    %92 = arith.addf %89, %91 : vector<8x128xf32>
    %93 = math.tanh %92 : vector<8x128xf32>
    %94 = arith.index_cast %c7_i32 : i32 to index
    %c0_64 = arith.constant 0 : index
    %c0_65 = arith.constant 0 : index
    %95 = vector.load %arg12[%94, %c0_64, %c0_65] : memref<8x8x128xf32, #tpu.memory_space<vmem>>, vector<1x8x128xf32>
    %96 = vector.shape_cast %95 : vector<1x8x128xf32> to vector<8x128xf32>
    %97 = vector.shape_cast %93 : vector<8x128xf32> to vector<1x8x128xf32>
    tpu.vector_store %arg12[%94, %c0_64, %c0_65], %97 {strides = array<i32>} : memref<8x8x128xf32, #tpu.memory_space<vmem>>, vector<1x8x128xf32>,
    %c8_i32 = arith.constant 8 : i32
    %c0_66 = arith.constant 0 : index
    %c0_67 = arith.constant 0 : index
    %98 = vector.load %arg7[%c0_66, %c0_67] : memref<1x128xf32, #tpu.memory_space<vmem>>, vector<1x128xf32>
    %c0_68 = arith.constant 0 : index
    %c0_69 = arith.constant 0 : index
    %c0_70 = arith.constant 0 : index
    %99 = vector.load %arg12[%c0_68, %c0_69, %c0_70] : memref<8x8x128xf32, #tpu.memory_space<vmem>>, vector<8x8x128xf32>
    %100 = vector.shape_cast %99 : vector<8x8x128xf32> to vector<64x128xf32>
    %c0_71 = arith.constant 0 : index
    %c0_72 = arith.constant 0 : index
    %101 = vector.load %arg5[%c0_71, %c0_72] : memref<128x128xf32, #tpu.memory_space<vmem>>, vector<128x128xf32>
    %cst_73 = arith.constant dense<0.000000e+00> : vector<64x128xf32>
    %102 = tpu.matmul %100, %101, %cst_73 {dimension_numbers = #tpu.dot_dimension_numbers<[1], [0], [0], [1], [0, 0, 1, 1], [], []>} : vector<64x128xf32>, vector<128x128xf32>, vector<64x128xf32> -> vector<64x128xf32>
    %103 = vector.broadcast %98 : vector<1x128xf32> to vector<64x128xf32>
    %104 = arith.addf %102, %103 : vector<64x128xf32>
    %105 = vector.shape_cast %104 : vector<64x128xf32> to vector<8x8x128xf32>
    %c0_74 = arith.constant 0 : index
    %c0_75 = arith.constant 0 : index
    %c0_76 = arith.constant 0 : index
    %106 = vector.load %arg11[%c0_74, %c0_75, %c0_76] : memref<8x8x128xf32, #tpu.memory_space<vmem>>, vector<8x8x128xf32>
    tpu.vector_store %arg11[%c0_74, %c0_75, %c0_76], %105 {strides = array<i32>} : memref<8x8x128xf32, #tpu.memory_space<vmem>>, vector<8x8x128xf32>,
    %cst_77 = arith.constant 0.000000e+00 : f32
    %107 = vector.broadcast %cst_77 : f32 to vector<8x128xf32>
    %c0_i32_78 = arith.constant 0 : i32
    %108 = arith.index_cast %c0_i32_78 : i32 to index
    %c0_79 = arith.constant 0 : index
    %c0_80 = arith.constant 0 : index
    %109 = vector.load %arg11[%108, %c0_79, %c0_80] : memref<8x8x128xf32, #tpu.memory_space<vmem>>, vector<1x8x128xf32>
    %110 = vector.shape_cast %109 : vector<1x8x128xf32> to vector<8x128xf32>
    %c0_81 = arith.constant 0 : index
    %c0_82 = arith.constant 0 : index
    %111 = vector.load %arg6[%c0_81, %c0_82] : memref<128x128xf32, #tpu.memory_space<vmem>>, vector<128x128xf32>
    %cst_83 = arith.constant dense<0.000000e+00> : vector<8x128xf32>
    %112 = tpu.matmul %107, %111, %cst_83 {dimension_numbers = #tpu.dot_dimension_numbers<[1], [0], [0], [1], [0, 0, 1, 1], [], []>} : vector<8x128xf32>, vector<128x128xf32>, vector<8x128xf32> -> vector<8x128xf32>
    %113 = arith.addf %110, %112 : vector<8x128xf32>
    %114 = math.tanh %113 : vector<8x128xf32>
    %c1_i32_84 = arith.constant 1 : i32
    %115 = arith.index_cast %c1_i32_84 : i32 to index
    %c0_85 = arith.constant 0 : index
    %c0_86 = arith.constant 0 : index
    %116 = vector.load %arg11[%115, %c0_85, %c0_86] : memref<8x8x128xf32, #tpu.memory_space<vmem>>, vector<1x8x128xf32>
    %117 = vector.shape_cast %116 : vector<1x8x128xf32> to vector<8x128xf32>
    %c0_87 = arith.constant 0 : index
    %c0_88 = arith.constant 0 : index
    %118 = vector.load %arg6[%c0_87, %c0_88] : memref<128x128xf32, #tpu.memory_space<vmem>>, vector<128x128xf32>
    %cst_89 = arith.constant dense<0.000000e+00> : vector<8x128xf32>
    %119 = tpu.matmul %114, %118, %cst_89 {dimension_numbers = #tpu.dot_dimension_numbers<[1], [0], [0], [1], [0, 0, 1, 1], [], []>} : vector<8x128xf32>, vector<128x128xf32>, vector<8x128xf32> -> vector<8x128xf32>
    %120 = arith.addf %117, %119 : vector<8x128xf32>
    %121 = math.tanh %120 : vector<8x128xf32>
    %c2_i32_90 = arith.constant 2 : i32
    %122 = arith.index_cast %c2_i32_90 : i32 to index
    %c0_91 = arith.constant 0 : index
    %c0_92 = arith.constant 0 : index
    %123 = vector.load %arg11[%122, %c0_91, %c0_92] : memref<8x8x128xf32, #tpu.memory_space<vmem>>, vector<1x8x128xf32>
    %124 = vector.shape_cast %123 : vector<1x8x128xf32> to vector<8x128xf32>
    %c0_93 = arith.constant 0 : index
    %c0_94 = arith.constant 0 : index
    %125 = vector.load %arg6[%c0_93, %c0_94] : memref<128x128xf32, #tpu.memory_space<vmem>>, vector<128x128xf32>
    %cst_95 = arith.constant dense<0.000000e+00> : vector<8x128xf32>
    %126 = tpu.matmul %121, %125, %cst_95 {dimension_numbers = #tpu.dot_dimension_numbers<[1], [0], [0], [1], [0, 0, 1, 1], [], []>} : vector<8x128xf32>, vector<128x128xf32>, vector<8x128xf32> -> vector<8x128xf32>
    %127 = arith.addf %124, %126 : vector<8x128xf32>
    %128 = math.tanh %127 : vector<8x128xf32>
    %c3_i32_96 = arith.constant 3 : i32
    %129 = arith.index_cast %c3_i32_96 : i32 to index
    %c0_97 = arith.constant 0 : index
    %c0_98 = arith.constant 0 : index
    %130 = vector.load %arg11[%129, %c0_97, %c0_98] : memref<8x8x128xf32, #tpu.memory_space<vmem>>, vector<1x8x128xf32>
    %131 = vector.shape_cast %130 : vector<1x8x128xf32> to vector<8x128xf32>
    %c0_99 = arith.constant 0 : index
    %c0_100 = arith.constant 0 : index
    %132 = vector.load %arg6[%c0_99, %c0_100] : memref<128x128xf32, #tpu.memory_space<vmem>>, vector<128x128xf32>
    %cst_101 = arith.constant dense<0.000000e+00> : vector<8x128xf32>
    %133 = tpu.matmul %128, %132, %cst_101 {dimension_numbers = #tpu.dot_dimension_numbers<[1], [0], [0], [1], [0, 0, 1, 1], [], []>} : vector<8x128xf32>, vector<128x128xf32>, vector<8x128xf32> -> vector<8x128xf32>
    %134 = arith.addf %131, %133 : vector<8x128xf32>
    %135 = math.tanh %134 : vector<8x128xf32>
    %c4_i32_102 = arith.constant 4 : i32
    %136 = arith.index_cast %c4_i32_102 : i32 to index
    %c0_103 = arith.constant 0 : index
    %c0_104 = arith.constant 0 : index
    %137 = vector.load %arg11[%136, %c0_103, %c0_104] : memref<8x8x128xf32, #tpu.memory_space<vmem>>, vector<1x8x128xf32>
    %138 = vector.shape_cast %137 : vector<1x8x128xf32> to vector<8x128xf32>
    %c0_105 = arith.constant 0 : index
    %c0_106 = arith.constant 0 : index
    %139 = vector.load %arg6[%c0_105, %c0_106] : memref<128x128xf32, #tpu.memory_space<vmem>>, vector<128x128xf32>
    %cst_107 = arith.constant dense<0.000000e+00> : vector<8x128xf32>
    %140 = tpu.matmul %135, %139, %cst_107 {dimension_numbers = #tpu.dot_dimension_numbers<[1], [0], [0], [1], [0, 0, 1, 1], [], []>} : vector<8x128xf32>, vector<128x128xf32>, vector<8x128xf32> -> vector<8x128xf32>
    %141 = arith.addf %138, %140 : vector<8x128xf32>
    %142 = math.tanh %141 : vector<8x128xf32>
    %c5_i32_108 = arith.constant 5 : i32
    %143 = arith.index_cast %c5_i32_108 : i32 to index
    %c0_109 = arith.constant 0 : index
    %c0_110 = arith.constant 0 : index
    %144 = vector.load %arg11[%143, %c0_109, %c0_110] : memref<8x8x128xf32, #tpu.memory_space<vmem>>, vector<1x8x128xf32>
    %145 = vector.shape_cast %144 : vector<1x8x128xf32> to vector<8x128xf32>
    %c0_111 = arith.constant 0 : index
    %c0_112 = arith.constant 0 : index
    %146 = vector.load %arg6[%c0_111, %c0_112] : memref<128x128xf32, #tpu.memory_space<vmem>>, vector<128x128xf32>
    %cst_113 = arith.constant dense<0.000000e+00> : vector<8x128xf32>
    %147 = tpu.matmul %142, %146, %cst_113 {dimension_numbers = #tpu.dot_dimension_numbers<[1], [0], [0], [1], [0, 0, 1, 1], [], []>} : vector<8x128xf32>, vector<128x128xf32>, vector<8x128xf32> -> vector<8x128xf32>
    %148 = arith.addf %145, %147 : vector<8x128xf32>
    %149 = math.tanh %148 : vector<8x128xf32>
    %c6_i32_114 = arith.constant 6 : i32
    %150 = arith.index_cast %c6_i32_114 : i32 to index
    %c0_115 = arith.constant 0 : index
    %c0_116 = arith.constant 0 : index
    %151 = vector.load %arg11[%150, %c0_115, %c0_116] : memref<8x8x128xf32, #tpu.memory_space<vmem>>, vector<1x8x128xf32>
    %152 = vector.shape_cast %151 : vector<1x8x128xf32> to vector<8x128xf32>
    %c0_117 = arith.constant 0 : index
    %c0_118 = arith.constant 0 : index
    %153 = vector.load %arg6[%c0_117, %c0_118] : memref<128x128xf32, #tpu.memory_space<vmem>>, vector<128x128xf32>
    %cst_119 = arith.constant dense<0.000000e+00> : vector<8x128xf32>
    %154 = tpu.matmul %149, %153, %cst_119 {dimension_numbers = #tpu.dot_dimension_numbers<[1], [0], [0], [1], [0, 0, 1, 1], [], []>} : vector<8x128xf32>, vector<128x128xf32>, vector<8x128xf32> -> vector<8x128xf32>
    %155 = arith.addf %152, %154 : vector<8x128xf32>
    %156 = math.tanh %155 : vector<8x128xf32>
    %c7_i32_120 = arith.constant 7 : i32
    %157 = arith.index_cast %c7_i32_120 : i32 to index
    %c0_121 = arith.constant 0 : index
    %c0_122 = arith.constant 0 : index
    %158 = vector.load %arg11[%157, %c0_121, %c0_122] : memref<8x8x128xf32, #tpu.memory_space<vmem>>, vector<1x8x128xf32>
    %159 = vector.shape_cast %158 : vector<1x8x128xf32> to vector<8x128xf32>
    %c0_123 = arith.constant 0 : index
    %c0_124 = arith.constant 0 : index
    %160 = vector.load %arg6[%c0_123, %c0_124] : memref<128x128xf32, #tpu.memory_space<vmem>>, vector<128x128xf32>
    %cst_125 = arith.constant dense<0.000000e+00> : vector<8x128xf32>
    %161 = tpu.matmul %156, %160, %cst_125 {dimension_numbers = #tpu.dot_dimension_numbers<[1], [0], [0], [1], [0, 0, 1, 1], [], []>} : vector<8x128xf32>, vector<128x128xf32>, vector<8x128xf32> -> vector<8x128xf32>
    %162 = arith.addf %159, %161 : vector<8x128xf32>
    %163 = math.tanh %162 : vector<8x128xf32>
    %c8_i32_126 = arith.constant 8 : i32
    %c0_127 = arith.constant 0 : index
    %c0_128 = arith.constant 0 : index
    %164 = vector.load %arg8[%c0_127, %c0_128] : memref<128x128xf32, #tpu.memory_space<vmem>>, vector<128x128xf32>
    %cst_129 = arith.constant dense<0.000000e+00> : vector<8x128xf32>
    %165 = tpu.matmul %163, %164, %cst_129 {dimension_numbers = #tpu.dot_dimension_numbers<[1], [0], [0], [1], [0, 0, 1, 1], [], []>} : vector<8x128xf32>, vector<128x128xf32>, vector<8x128xf32> -> vector<8x128xf32>
    %c0_130 = arith.constant 0 : index
    %c0_131 = arith.constant 0 : index
    %166 = vector.load %arg9[%c0_130, %c0_131] : memref<1x128xf32, #tpu.memory_space<vmem>>, vector<1x128xf32>
    %167 = vector.broadcast %166 : vector<1x128xf32> to vector<8x128xf32>
    %168 = arith.addf %165, %167 : vector<8x128xf32>
    %c0_132 = arith.constant 0 : index
    %c0_133 = arith.constant 0 : index
    %169 = vector.load %arg10[%c0_132, %c0_133] : memref<8x128xf32, #tpu.memory_space<vmem>>, vector<8x128xf32>
    tpu.vector_store %arg10[%c0_132, %c0_133], %168 {strides = array<i32>} : memref<8x128xf32, #tpu.memory_space<vmem>>, vector<8x128xf32>,
    return
  }
  func.func @transform_0(%arg0: i32) -> (i32, i32, i32) {
    %c0_i32 = arith.constant 0 : i32
    %c0_i32_0 = arith.constant 0 : i32
    %c0_i32_1 = arith.constant 0 : i32
    return %c0_i32, %arg0, %c0_i32_0 : i32, i32, i32
  }
  func.func @transform_1(%arg0: i32) -> (i32, i32) {
    %c0_i32 = arith.constant 0 : i32
    %c0_i32_0 = arith.constant 0 : i32
    %c0_i32_1 = arith.constant 0 : i32
    return %c0_i32, %c0_i32_0 : i32, i32
  }
  func.func @transform_2(%arg0: i32) -> (i32, i32) {
    %c0_i32 = arith.constant 0 : i32
    %c0_i32_0 = arith.constant 0 : i32
    %c0_i32_1 = arith.constant 0 : i32
    return %c0_i32, %c0_i32_0 : i32, i32
  }
  func.func @transform_3(%arg0: i32) -> (i32, i32) {
    %c0_i32 = arith.constant 0 : i32
    %c0_i32_0 = arith.constant 0 : i32
    %c0_i32_1 = arith.constant 0 : i32
    return %c0_i32, %c0_i32_0 : i32, i32
  }
  func.func @transform_4(%arg0: i32) -> (i32, i32) {
    %c0_i32 = arith.constant 0 : i32
    %c0_i32_0 = arith.constant 0 : i32
    %c0_i32_1 = arith.constant 0 : i32
    return %c0_i32, %c0_i32_0 : i32, i32
  }
  func.func @transform_5(%arg0: i32) -> (i32, i32) {
    %c0_i32 = arith.constant 0 : i32
    %c0_i32_0 = arith.constant 0 : i32
    %c0_i32_1 = arith.constant 0 : i32
    return %c0_i32, %c0_i32_0 : i32, i32
  }
  func.func @transform_6(%arg0: i32) -> (i32, i32) {
    %c0_i32 = arith.constant 0 : i32
    %c0_i32_0 = arith.constant 0 : i32
    %c0_i32_1 = arith.constant 0 : i32
    return %c0_i32, %c0_i32_0 : i32, i32
  }
  func.func @transform_7(%arg0: i32) -> (i32, i32) {
    %c0_i32 = arith.constant 0 : i32
    %c0_i32_0 = arith.constant 0 : i32
    %c0_i32_1 = arith.constant 0 : i32
    return %c0_i32, %c0_i32_0 : i32, i32
  }
  func.func @transform_8(%arg0: i32) -> (i32, i32) {
    %c0_i32 = arith.constant 0 : i32
    %c0_i32_0 = arith.constant 0 : i32
    %c0_i32_1 = arith.constant 0 : i32
    return %c0_i32, %c0_i32_0 : i32, i32
  }
  func.func @transform_9(%arg0: i32) -> (i32, i32) {
    %c0_i32 = arith.constant 0 : i32
    %c0_i32_0 = arith.constant 0 : i32
    return %arg0, %c0_i32 : i32, i32
  }
}

</mosaic_0001>

<bundles_post_ra>
// kernel: tpu_custom_call.1
= control target key start
LH: loop header
LB: loop body
LE: loop exit
PB: predicated region body
PF: predicated region fallthrough
CT: control target
= control target key end

     0   :  { %14 = vsyncpa [#allocation5], 0  ;;  %s4151_s0 = inlined_call_operand.hbm [shape: f32[8,8,128], index: 0, kind: input, shape index: {}]   ;;  %s4152_s1 = inlined_call_operand.hbm [shape: f32[128,128], index: 1, kind: input, shape index: {}]   ;;  %s4153_s2 = inlined_call_operand.hbm [shape: f32[128,128], index: 2, kind: input, shape index: {}]   ;;  %s4154_s3 = inlined_call_operand.vmem [shape: f32[1,128], index: 3, kind: input, shape index: {}]   ;;  %s4155_s4 = inlined_call_operand.hbm [shape: f32[128,128], index: 4, kind: input, shape index: {}]   ;;  %s4156_s5 = inlined_call_operand.hbm [shape: f32[128,128], index: 5, kind: input, shape index: {}]   ;;  %s4157_s6 = inlined_call_operand.vmem [shape: f32[1,128], index: 6, kind: input, shape index: {}]   ;;  %s4158_s7 = inlined_call_operand.hbm [shape: f32[128,128], index: 7, kind: input, shape index: {}]   ;;  %s4159_s8 = inlined_call_operand.vmem [shape: f32[1,128], index: 8, kind: input, shape index: {}]   ;;  %s4160_s9 = inlined_call_operand.hbm [shape: f32[8,128], index: 9, kind: output, shape index: {}]  }
   0x1   :  { %15 = vsyncpa [#allocation8], 0 }
   0x2   :  { %16 = vsyncpa [#allocation11], 0 }
   0x3   :  { %17 = vsyncpa [#allocation14], 0 }
   0x4   :  { %18 = vsyncpa [#allocation6], 0  ;;  %s3552_s30 = smov [#allocation7]   ;;  %s3553_s11 = smov [#allocation10]  }
   0x5   :  { %s36_s10 = sshll.u32 %s3552_s30, 4  ;;  %s62_s12 = sshll.u32 %s3553_s11, 4  ;;  %s37_s10 = int_to_ptr.vmem [resolvable:$true] %s36_s10  ;;  %s3614_s12 = int_to_ptr.vmem [resolvable:$true] %s62_s12 }
   0x6   :  { %s3388_s15 = scalar_lea.hbm %s4152_s1, 2048 }
   0x7   :  { %p3389_p0 = scmp.ne.s32.totalorder %s4152_s1, %s3388_s15  ;;  %p3392_p1 = scmp.lt.u32.totalorder %s3388_s15, %s4152_s1 }
   0x9   :  { %p3394_p2 = pnand %p3392_p1, %p3389_p0 }
   0xb   :  { %3397 = shalt.err (!%p3394_p2)
}
   0xc   :  { %s3398_s20 = scalar_lea.vmem %s37_s10, 2048  ;;  %p3403_p4 = scmp.lt.s32.totalorder %s37_s10, %s37_s10 }
   0xd   :  { %p3399_p3 = scmp.ne.s32.totalorder %s37_s10, %s3398_s20  ;;  %p3404_p5 = scmp.lt.s32.totalorder %s3398_s20, %s3398_s20 }
   0xf   :  { %p3405_p6 = por %p3404_p5, %p3403_p4 }
  0x11   :  { %p3406_p7 = pnand %p3405_p6, %p3399_p3 }
  0x13   :  { %3409 = shalt.err (!%p3406_p7)
}
  0x14   :  { %s3554_s21 = smov 128   ;;  %s3555_s22 = smov 8  }
  0x15   :  { %42 = dma.hbm_to_vmem [thread:$0]  %s4152_s1, 2048, %s37_s10, [#allocation8], %s3554_s21, %s3554_s21, %s3555_s22  }
  0x16   :  { %s3410_s27 = scalar_lea.hbm %s4155_s4, 2048 }
  0x17   :  { %p3411_p8 = scmp.ne.s32.totalorder %s4155_s4, %s3410_s27  ;;  %p3414_p9 = scmp.lt.u32.totalorder %s3410_s27, %s4155_s4 }
  0x19   :  { %p3416_p10 = pnand %p3414_p9, %p3411_p8 }
  0x1b   :  { %3419 = shalt.err (!%p3416_p10)
}
  0x1c   :  { %s3420_s13 = scalar_lea.vmem %s3614_s12, 2048  ;;  %p3425_p12 = scmp.lt.s32.totalorder %s3614_s12, %s3614_s12 }
  0x1d   :  { %p3421_p11 = scmp.ne.s32.totalorder %s3614_s12, %s3420_s13  ;;  %p3426_p13 = scmp.lt.s32.totalorder %s3420_s13, %s3420_s13 }
  0x1f   :  { %p3427_p0 = por %p3426_p13, %p3425_p12 }
  0x21   :  { %p3428_p1 = pnand %p3427_p0, %p3421_p11 }
  0x23   :  { %3431 = shalt.err (!%p3428_p1)
}
  0x24   :  { %68 = dma.hbm_to_vmem [thread:$0]  %s4155_s4, 2048, %s3614_s12, [#allocation11], %s3554_s21, %s3554_s21, %s3555_s22  }
  0x25   :  { %s3556_s14 = smov [#allocation4]   ;;  %s3557_s16 = smov [#allocation9]  }
  0x26   :  { %s24_s15 = sshll.u32 %s3556_s14, 4  ;;  %s48_s17 = sshll.u32 %s3557_s16, 4  ;;  %s25_s15 = int_to_ptr.vmem [resolvable:$true] %s24_s15  ;;  %s3651_s17 = int_to_ptr.vmem [resolvable:$true] %s48_s17 }
  0x27   :  { %s3432_s20 = scalar_lea.hbm %s4151_s0, 1024 }
  0x28   :  { %p3433_p2 = scmp.ne.s32.totalorder %s4151_s0, %s3432_s20  ;;  %p3436_p3 = scmp.lt.u32.totalorder %s3432_s20, %s4151_s0 }
  0x2a   :  { %p3438_p4 = pnand %p3436_p3, %p3433_p2 }
  0x2c   :  { %3441 = shalt.err (!%p3438_p4)
}
  0x2d   :  { %s3442_s4 = scalar_lea.vmem %s25_s15, 1024  ;;  %p3447_p6 = scmp.lt.s32.totalorder %s25_s15, %s25_s15 }
  0x2e   :  { %p3443_p5 = scmp.ne.s32.totalorder %s25_s15, %s3442_s4  ;;  %p3448_p7 = scmp.lt.s32.totalorder %s3442_s4, %s3442_s4 }
  0x30   :  { %p3449_p8 = por %p3448_p7, %p3447_p6 }
  0x32   :  { %p3450_p9 = pnand %p3449_p8, %p3443_p5 }
  0x34   :  { %3453 = shalt.err (!%p3450_p9)
}
  0x35   :  { %30 = dma.hbm_to_vmem [thread:$0]  %s4151_s0, 1024, %s25_s15, [#allocation5], %s3554_s21, %s3554_s21, %s3555_s22  }
  0x36   :  { %s3454_s30 = scalar_lea.hbm %s4153_s2, 2048 }
  0x37   :  { %p3455_p10 = scmp.ne.s32.totalorder %s4153_s2, %s3454_s30  ;;  %p3458_p11 = scmp.lt.u32.totalorder %s3454_s30, %s4153_s2 }
  0x39   :  { %p3460_p12 = pnand %p3458_p11, %p3455_p10 }
  0x3b   :  { %3463 = shalt.err (!%p3460_p12)
}
  0x3c   :  { %s3464_s14 = scalar_lea.vmem %s3651_s17, 2048  ;;  %p3469_p0 = scmp.lt.s32.totalorder %s3651_s17, %s3651_s17 }
  0x3d   :  { %p3465_p13 = scmp.ne.s32.totalorder %s3651_s17, %s3464_s14  ;;  %p3470_p1 = scmp.lt.s32.totalorder %s3464_s14, %s3464_s14 }
  0x3f   :  { %p3471_p2 = por %p3470_p1, %p3469_p0 }
  0x41   :  { %p3472_p3 = pnand %p3471_p2, %p3465_p13 }
  0x43   :  { %3475 = shalt.err (!%p3472_p3)
}
  0x44   :  { %54 = dma.hbm_to_vmem [thread:$0]  %s4153_s2, 2048, %s3651_s17, [#allocation8], %s3554_s21, %s3554_s21, %s3555_s22  }
  0x45   :  { %s3558_s16 = smov [#allocation12]   ;;  %s3559_s19 = smov [#allocation13]  }
  0x46   :  { %s74_s18 = sshll.u32 %s3558_s16, 4  ;;  %s88_s20 = sshll.u32 %s3559_s19, 4  ;;  %s75_s18 = int_to_ptr.vmem [resolvable:$true] %s74_s18  ;;  %s3688_s20 = int_to_ptr.vmem [resolvable:$true] %s88_s20 }
  0x47   :  { %s3476_s25 = scalar_lea.hbm %s4156_s5, 2048 }
  0x48   :  { %p3477_p4 = scmp.ne.s32.totalorder %s4156_s5, %s3476_s25  ;;  %p3480_p5 = scmp.lt.u32.totalorder %s3476_s25, %s4156_s5 }
  0x4a   :  { %p3482_p6 = pnand %p3480_p5, %p3477_p4 }
  0x4c   :  { %3485 = shalt.err (!%p3482_p6)
}
  0x4d   :  { %s3486_s2 = scalar_lea.vmem %s75_s18, 2048  ;;  %p3491_p8 = scmp.lt.s32.totalorder %s75_s18, %s75_s18 }
  0x4e   :  { %p3487_p7 = scmp.ne.s32.totalorder %s75_s18, %s3486_s2  ;;  %p3492_p9 = scmp.lt.s32.totalorder %s3486_s2, %s3486_s2 }
  0x50   :  { %p3493_p10 = por %p3492_p9, %p3491_p8 }
  0x52   :  { %p3494_p11 = pnand %p3493_p10, %p3487_p7 }
  0x54   :  { %3497 = shalt.err (!%p3494_p11)
}
  0x55   :  { %80 = dma.hbm_to_vmem [thread:$0]  %s4156_s5, 2048, %s75_s18, [#allocation11], %s3554_s21, %s3554_s21, %s3555_s22  }
  0x56   :  { %s3498_s11 = scalar_lea.hbm %s4158_s7, 2048 }
  0x57   :  { %p3499_p12 = scmp.ne.s32.totalorder %s4158_s7, %s3498_s11  ;;  %p3502_p13 = scmp.lt.u32.totalorder %s3498_s11, %s4158_s7 }
  0x59   :  { %p3504_p0 = pnand %p3502_p13, %p3499_p12 }
  0x5b   :  { %3507 = shalt.err (!%p3504_p0)
}
  0x5c   :  { %s3508_s0 = scalar_lea.vmem %s3688_s20, 2048  ;;  %p3513_p2 = scmp.lt.s32.totalorder %s3688_s20, %s3688_s20 }
  0x5d   :  { %p3509_p1 = scmp.ne.s32.totalorder %s3688_s20, %s3508_s0  ;;  %p3514_p3 = scmp.lt.s32.totalorder %s3508_s0, %s3508_s0 }
  0x5f   :  { %p3515_p4 = por %p3514_p3, %p3513_p2 }
  0x61   :  { %p3516_p5 = pnand %p3515_p4, %p3509_p1 }
  0x63   :  { %3519 = shalt.err (!%p3516_p5)
}
  0x64   :  { %94 = dma.hbm_to_vmem [thread:$0]  %s4158_s7, 2048, %s3688_s20, [#allocation14], %s3554_s21, %s3554_s21, %s3555_s22  }
  0x65   :  { %3542 = dma.done.wait [#allocation5], 1024  }
  0x66   :  { %3543 = vsyncadd [#allocation5], 4294966272 }
  0x67   :  { %3544 = dma.done.wait [#allocation8], 4096  }
  0x68   :  { %3545 = vsyncadd [#allocation8], 4294963200 }
  0x69   :  { %3546 = dma.done.wait [#allocation11], 4096  }
  0x6a   :  { %3547 = vsyncadd [#allocation11], 4294963200 }
  0x6b   :  { %3548 = dma.done.wait [#allocation14], 2048  }
  0x6c   :  { %3549 = vsyncadd [#allocation14], 4294965248  ;;  %v3560_v0 = vmov 0.0|0.0   ;;  %vm3561_vm0 = vmmov 0   ;;  %v3562_v1 = vmov 0.0   ;;  %v124_v2 = vld [vmem:[#allocation7] sm:$0xff] }
  0x6d   :  { %2904 = vmatprep.subr.bf16.mxu1 %v3560_v0  ;;  %2265 = vmatprep.mubr.msk.f32.mxu1 %vm3561_vm0, %v3562_v1  ;;  %v125_v3 = vld [vmem:[#allocation7 + $0x8] sm:$0xff]  ;;  %v260_v4 = vld [vmem:[#allocation9] sm:$0xff]  ;;  %v126_v7 = vld [vmem:[#allocation7 + $0x10] sm:$0xff]  ;;  %s3563_s18 = smov [#allocation15]  }
  0x6e   :  { %v2872_v5 = vpack.c.bf16 %v125_v3, %v124_v2  ;;  %v261_v6 = vld [vmem:[#allocation9 + $0x8] sm:$0xff]  ;;  %v127_v8 = vld [vmem:[#allocation7 + $0x18] sm:$0xff]  ;;  %v262_v11 = vld [vmem:[#allocation9 + $0x10] sm:$0xff]  ;;  %s1837_s19 = sshll.u32 %s3563_s18, 4  ;;  %s1838_s19 = int_to_ptr.vmem [resolvable:$true] %s1837_s19 }
  0x6f   :  { %v3728_v9 = vpack.c.bf16 %v261_v6, %v260_v4  ;;  %v2876_v10 = vpack.c.bf16 %v127_v8, %v126_v7  ;;  %v263_v12 = vld [vmem:[#allocation9 + $0x18] sm:$0xff]  ;;  %v128_v13 = vld [vmem:[#allocation7 + $0x20] sm:$0xff]  ;;  %v129_v14 = vld [vmem:[#allocation7 + $0x28] sm:$0xff]  ;;  %s3520_s20 = scalar_lea.vmem %s1838_s19, 128  ;;  %p3525_p7 = scmp.lt.s32.totalorder %s1838_s19, %s1838_s19 }
  0x70   :  { %2873 = vmatprep.subr.bf16.mxu0 %v2872_v5  ;;  %v3731_v15 = vpack.c.bf16 %v263_v12, %v262_v11  ;;  %v2880_v16 = vpack.c.bf16 %v129_v14, %v128_v13  ;;  %v264_v17 = vld [vmem:[#allocation9 + $0x20] sm:$0xff]  ;;  %v265_v18 = vld [vmem:[#allocation9 + $0x28] sm:$0xff]  ;;  %v130_v19 = vld [vmem:[#allocation7 + $0x30] sm:$0xff]  ;;  %p3521_p6 = scmp.ne.s32.totalorder %s1838_s19, %s3520_s20  ;;  %p3526_p8 = scmp.lt.s32.totalorder %s3520_s20, %s3520_s20 }
  0x71   :  { %2875 = vmatpush3.bf16.msra.mxu0 %v2872_v5  ;;  %2906 = vmatpush3.bf16.msra.mxu1 %v3728_v9  ;;  %v131_v20 = vld [vmem:[#allocation7 + $0x38] sm:$0xff]  ;;  %v3735_v21 = vpack.c.bf16 %v265_v18, %v264_v17  ;;  %v266_v23 = vld [vmem:[#allocation9 + $0x30] sm:$0xff]  ;;  %v132_v25 = vld [vmem:[#allocation7 + $0x40] sm:$0xff] }
  0x72   :  { %2877 = vmatprep.subr.bf16.mxu0 %v2876_v10  ;;  %2907 = vmatprep.subr.bf16.mxu1 %v3560_v0  ;;  %v2884_v22 = vpack.c.bf16 %v131_v20, %v130_v19  ;;  %v267_v24 = vld [vmem:[#allocation9 + $0x38] sm:$0xff]  ;;  %v133_v26 = vld [vmem:[#allocation7 + $0x48] sm:$0xff]  ;;  %v116_v27 = vld [vmem:[#allocation4] sm:$0xff]  ;;  %p3527_p9 = por %p3526_p8, %p3525_p7 }
  0x73   :  { %2221 = vmatprep.mubr.f32.mxu0 %v116_v27  ;;  %v3739_v28 = vpack.c.bf16 %v267_v24, %v266_v23  ;;  %v2888_v29 = vpack.c.bf16 %v133_v26, %v132_v25  ;;  %v268_v30 = vld [vmem:[#allocation9 + $0x40] sm:$0xff]  ;;  %v269_v31 = vld [vmem:[#allocation9 + $0x48] sm:$0xff]  ;;  %v134_v32 = vld [vmem:[#allocation7 + $0x50] sm:$0xff] }
  0x74   :  { %v135_v33 = vld [vmem:[#allocation7 + $0x58] sm:$0xff]  ;;  %v3743_v34 = vpack.c.bf16 %v269_v31, %v268_v30  ;;  %v270_v36 = vld [vmem:[#allocation9 + $0x50] sm:$0xff]  ;;  %v136_v38 = vld [vmem:[#allocation7 + $0x60] sm:$0xff]  ;;  %p3528_p10 = pnand %p3527_p9, %p3521_p6 }
  0x75   :  { %2879 = vmatpush3.bf16.msra.mxu0 %v2876_v10  ;;  %2909 = vmatpush3.bf16.msra.mxu1 %v3731_v15  ;;  %v2892_v35 = vpack.c.bf16 %v135_v33, %v134_v32  ;;  %v271_v37 = vld [vmem:[#allocation9 + $0x58] sm:$0xff]  ;;  %v137_v39 = vld [vmem:[#allocation7 + $0x68] sm:$0xff]  ;;  %v272_v42 = vld [vmem:[#allocation9 + $0x60] sm:$0xff] }
  0x76   :  { %2881 = vmatprep.subr.bf16.mxu0 %v2880_v16  ;;  %2910 = vmatprep.subr.bf16.mxu1 %v3560_v0  ;;  %v3747_v40 = vpack.c.bf16 %v271_v37, %v270_v36  ;;  %v2896_v41 = vpack.c.bf16 %v137_v39, %v136_v38  ;;  %v273_v43 = vld [vmem:[#allocation9 + $0x68] sm:$0xff]  ;;  %v138_v44 = vld [vmem:[#allocation7 + $0x70] sm:$0xff]  ;;  %v139_v45 = vld [vmem:[#allocation7 + $0x78] sm:$0xff] }
  0x77   :  { %v3751_v46 = vpack.c.bf16 %v273_v43, %v272_v42  ;;  %v2900_v47 = vpack.c.bf16 %v139_v45, %v138_v44  ;;  %v274_v48 = vld [vmem:[#allocation9 + $0x70] sm:$0xff]  ;;  %v275_v49 = vld [vmem:[#allocation9 + $0x78] sm:$0xff]  ;;  %v117_v51 = vld [vmem:[#allocation4 + $0x8] sm:$0xff] }
  0x78   :  { %v3755_v50 = vpack.c.bf16 %v275_v49, %v274_v48  ;;  %v118_v52 = vld [vmem:[#allocation4 + $0x10] sm:$0xff]  ;;  %v119_v53 = vld [vmem:[#allocation4 + $0x18] sm:$0xff]  ;;  %v120_v54 = vld [vmem:[#allocation4 + $0x20] sm:$0xff] }
  0x79   :  { %2883 = vmatpush3.bf16.msra.mxu0 %v2880_v16  ;;  %2912 = vmatpush3.bf16.msra.mxu1 %v3735_v21  ;;  %v121_v55 = vld [vmem:[#allocation4 + $0x28] sm:$0xff]  ;;  %v122_v56 = vld [vmem:[#allocation4 + $0x30] sm:$0xff]  ;;  %v123_v57 = vld [vmem:[#allocation4 + $0x38] sm:$0xff] }
  0x7a   :  { %2885 = vmatprep.subr.bf16.mxu0 %v2884_v22  ;;  %2913 = vmatprep.subr.bf16.mxu1 %v3560_v0  ;;  %v3801_v58 = vld [vmem:[%s4154_s3] ss:$0 sm:$0xff]  ;;  %v1004_v37 = vld [vmem:[#allocation10 + $0x10] sm:$0xff]  ;;  %v1005_v38 = vld [vmem:[#allocation10 + $0x18] sm:$0xff] }
  0x7b   :  { %v3100_v39 = vpack.c.bf16 %v1005_v38, %v1004_v37  ;;  %v1007_v42 = vld [vmem:[#allocation10 + $0x28] sm:$0xff]  ;;  %v1008_v44 = vld [vmem:[#allocation10 + $0x30] sm:$0xff]  ;;  %v1009_v45 = vld [vmem:[#allocation10 + $0x38] sm:$0xff] }
  0x7c   :  { %v1011_v48 = vld [vmem:[#allocation10 + $0x48] sm:$0xff] }
  0x7d   :  { %2887 = vmatpush3.bf16.msra.mxu0 %v2884_v22  ;;  %2915 = vmatpush3.bf16.msra.mxu1 %v3739_v28 }
  0x7e   :  { %2889 = vmatprep.subr.bf16.mxu0 %v2888_v29  ;;  %2916 = vmatprep.subr.bf16.mxu1 %v3560_v0 }
  0x81   :  { %2891 = vmatpush3.bf16.msra.mxu0 %v2888_v29  ;;  %2918 = vmatpush3.bf16.msra.mxu1 %v3743_v34 }
  0x82   :  { %2893 = vmatprep.subr.bf16.mxu0 %v2892_v35  ;;  %2919 = vmatprep.subr.bf16.mxu1 %v3560_v0 }
  0x85   :  { %2895 = vmatpush3.bf16.msra.mxu0 %v2892_v35  ;;  %2921 = vmatpush3.bf16.msra.mxu1 %v3747_v40 }
  0x86   :  { %2897 = vmatprep.subr.bf16.mxu0 %v2896_v41  ;;  %2922 = vmatprep.subr.bf16.mxu1 %v3560_v0 }
  0x89   :  { %2899 = vmatpush3.bf16.msra.mxu0 %v2896_v41  ;;  %2924 = vmatpush3.bf16.msra.mxu1 %v3751_v46  ;;  %v1006_v41 = vld [vmem:[#allocation10 + $0x20] sm:$0xff] }
  0x8a   :  { %2901 = vmatprep.subr.bf16.mxu0 %v2900_v47  ;;  %2925 = vmatprep.subr.bf16.mxu1 %v3560_v0  ;;  %v3104_v43 = vpack.c.bf16 %v1007_v42, %v1006_v41 }
  0x8d   :  { %2903 = vmatpush3.bf16.msra.mxu0 %v2900_v47  ;;  %2927 = vmatpush3.bf16.msra.mxu1 %v3755_v50  ;;  %v1010_v47 = vld [vmem:[#allocation10 + $0x40] sm:$0xff] }
  0x8e   :  { %2928 = vmatprep.subr.bf16.mxu0 %v3560_v0  ;;  %2952 = vmatprep.subr.bf16.mxu1 %v3560_v0  ;;  %v3112_v49 = vpack.c.bf16 %v1011_v48, %v1010_v47 }
  0x90   :  { %2222 = vmatmul.mubr.f32.vlgmr.msra.gmra.mrb[0].mxu0 %v117_v51  ;;  %2266 = vmatmul.mubr.f32.vlgmr.msra.gmra.mrb[0].mxu1 %v3562_v1  ;;  %v1013_v51 = vld [vmem:[#allocation10 + $0x58] sm:$0xff] }
  0x91   :  { %2930 = vmatpush3.bf16.msra.mxu0 %v3728_v9  ;;  %2954 = vmatpush3.bf16.msra.mxu1 %v3728_v9 }
  0x92   :  { %2931 = vmatprep.subr.bf16.mxu0 %v3560_v0  ;;  %2955 = vmatprep.subr.bf16.mxu1 %v3560_v0 }
  0x93   :  { %2335 = vmatprep.mubr.msk.f32.mxu1 %vm3561_vm0, %v3562_v1  ;;  %2224 = vmatprep.mubr.f32.mxu0 %v118_v52 }
  0x94   :  { %2225 = vmatmul.mubr.f32.gmra.mrb[2].mxu0 %v119_v53  ;;  %v1014_v53 = vld [vmem:[#allocation10 + $0x60] sm:$0xff] }
  0x95   :  { %2933 = vmatpush3.bf16.msra.mxu0 %v3731_v15  ;;  %2957 = vmatpush3.bf16.msra.mxu1 %v3731_v15 }
  0x96   :  { %2934 = vmatprep.subr.bf16.mxu0 %v3560_v0  ;;  %2958 = vmatprep.subr.bf16.mxu1 %v3560_v0 }
  0x97   :  { %2227 = vmatprep.mubr.f32.mxu0 %v120_v54  ;;  %v1015_v54 = vld [vmem:[#allocation10 + $0x68] sm:$0xff] }
  0x98   :  { %2228 = vmatmul.mubr.f32.gmra.mrb[4].mxu0 %v121_v55  ;;  %v3120_v55 = vpack.c.bf16 %v1015_v54, %v1014_v53 }
  0x99   :  { %2936 = vmatpush3.bf16.msra.mxu0 %v3735_v21  ;;  %2960 = vmatpush3.bf16.msra.mxu1 %v3735_v21 }
  0x9a   :  { %2937 = vmatprep.subr.bf16.mxu0 %v3560_v0  ;;  %2961 = vmatprep.subr.bf16.mxu1 %v3560_v0 }
  0x9b   :  { %2230 = vmatprep.mubr.f32.mxu0 %v122_v56  ;;  %v1016_v56 = vld [vmem:[#allocation10 + $0x70] sm:$0xff] }
  0x9c   :  { %2231 = vmatmul.mubr.f32.gmra.mrb[6].mxu0 %v123_v57  ;;  %v1017_v57 = vld [vmem:[#allocation10 + $0x78] sm:$0xff] }
  0x9d   :  { %2939 = vmatpush3.bf16.msra.mxu0 %v3739_v28  ;;  %2963 = vmatpush3.bf16.msra.mxu1 %v3739_v28 }
  0x9e   :  { %2940 = vmatprep.subr.bf16.mxu0 %v3560_v0  ;;  %2964 = vmatprep.subr.bf16.mxu1 %v3560_v0 }
  0x9f   :  { %2300 = vmatprep.mubr.msk.f32.mxu0 %vm3561_vm0, %v3562_v1 }
  0xa1   :  { %2942 = vmatpush3.bf16.msra.mxu0 %v3743_v34  ;;  %2966 = vmatpush3.bf16.msra.mxu1 %v3743_v34 }
  0xa2   :  { %2943 = vmatprep.subr.bf16.mxu0 %v3560_v0  ;;  %2967 = vmatprep.subr.bf16.mxu1 %v3560_v0 }
  0xa5   :  { %2945 = vmatpush3.bf16.msra.mxu0 %v3747_v40  ;;  %2969 = vmatpush3.bf16.msra.mxu1 %v3747_v40 }
  0xa6   :  { %2946 = vmatprep.subr.bf16.mxu0 %v3560_v0  ;;  %2970 = vmatprep.subr.bf16.mxu1 %v3560_v0 }
  0xa9   :  { %2948 = vmatpush3.bf16.msra.mxu0 %v3751_v46  ;;  %2972 = vmatpush3.bf16.msra.mxu1 %v3751_v46 }
  0xaa   :  { %2949 = vmatprep.subr.bf16.mxu0 %v3560_v0  ;;  %2973 = vmatprep.subr.bf16.mxu1 %v3560_v0 }
  0xad   :  { %2951 = vmatpush3.bf16.msra.mxu0 %v3755_v50  ;;  %2975 = vmatpush3.bf16.msra.mxu1 %v3755_v50 }
  0xae   :  { %2976 = vmatprep.subr.bf16.mxu0 %v3560_v0  ;;  %3000 = vmatprep.subr.bf16.mxu1 %v3560_v0 }
 0x163   :  { %v2223_v59 = vpop.f32.mrb[0].mxu0  ;;  %v342_v60 = vpop.f32.mrb[0].mxu1 }
 0x164   :  { %v212_v61 = vpop.f32.mrb[1].mxu0  ;;  %v2267_v62 = vpop.f32.mrb[1].mxu1  ;;  %v218_v11 = vadd.f32 %v2223_v59, %v3801_v58  ;;  %v3124_v59 = vpack.c.bf16 %v1017_v57, %v1016_v56 }
 0x165   :  { %v213_v63 = vadd.f32 %v3801_v58, %v212_v61  ;;  %v1139_v61 = vld [vmem:[#allocation12 + $0x8] sm:$0xff] }
 0x167   :  { %v346_v2 = vadd.f32 %v342_v60, %v213_v63  ;;  %v2226_v4 = vpop.f32.mrb[2].mxu0  ;;  %v1138_v60 = vld [vmem:[#allocation12] sm:$0xff]  ;;  %v1140_v63 = vld [vmem:[#allocation12 + $0x10] sm:$0xff] }
 0x168   :  { %v222_v5 = vpop.f32.mrb[3].mxu0  ;;  %v228_v23 = vadd.f32 %v2226_v4, %v3801_v58  ;;  %v3929_v62 = vpack.c.bf16 %v1139_v61, %v1138_v60  ;;  %v1142_v4 = vld [vmem:[#allocation12 + $0x20] sm:$0xff] }
 0x169   :  { %3356 = vtanh.f32 %v346_v2  ;;  %v223_v17 = vadd.f32 %v3801_v58, %v222_v5  ;;  %v1141_v2 = vld [vmem:[#allocation12 + $0x18] sm:$0xff]  ;;  %v1143_v5 = vld [vmem:[#allocation12 + $0x28] sm:$0xff] }
 0x16b   :  { %v3825_v6 = vpop.f32.mrb[4].mxu0 }
 0x16c   :  { %v3827_v7 = vpop.f32.mrb[5].mxu0 }
 0x16d   :  { %v233_v29 = vadd.f32 %v3801_v58, %v3827_v7  ;;  %v1144_v7 = vld [vmem:[#allocation12 + $0x30] sm:$0xff] }
 0x16f   :  { %v3829_v8 = vpop.f32.mrb[6].mxu0 }
 0x170   :  { %v3831_v10 = vpop.f32.mrb[7].mxu0 }
 0x173   :  { %v3804_v3 = vpop.eup %3356 }
 0x174   :  { %2301 = vmatmul.mubr.f32.vlgmr.msra.gmra.mrb[8].mxu0 %v3804_v3 }
 0x175   :  { %2978 = vmatpush3.bf16.msra.mxu0 %v3728_v9  ;;  %2370 = vmatprep.mubr.msk.f32.mxu0 %vm3561_vm0, %v3562_v1 }
 0x176   :  { %2979 = vmatprep.subr.bf16.mxu0 %v3560_v0 }
 0x179   :  { %2981 = vmatpush3.bf16.msra.mxu0 %v3731_v15 }
 0x17a   :  { %2982 = vmatprep.subr.bf16.mxu0 %v3560_v0 }
 0x17d   :  { %2984 = vmatpush3.bf16.msra.mxu0 %v3735_v21 }
 0x17e   :  { %2985 = vmatprep.subr.bf16.mxu0 %v3560_v0 }
 0x181   :  { %2987 = vmatpush3.bf16.msra.mxu0 %v3739_v28 }
 0x182   :  { %2988 = vmatprep.subr.bf16.mxu0 %v3560_v0 }
 0x185   :  { %2990 = vmatpush3.bf16.msra.mxu0 %v3743_v34 }
 0x186   :  { %2991 = vmatprep.subr.bf16.mxu0 %v3560_v0 }
 0x189   :  { %2993 = vmatpush3.bf16.msra.mxu0 %v3747_v40 }
 0x18a   :  { %2994 = vmatprep.subr.bf16.mxu0 %v3560_v0 }
 0x18d   :  { %2996 = vmatpush3.bf16.msra.mxu0 %v3751_v46 }
 0x18e   :  { %2997 = vmatprep.subr.bf16.mxu0 %v3560_v0 }
 0x191   :  { %2999 = vmatpush3.bf16.msra.mxu0 %v3755_v50 }
 0x192   :  { %3024 = vmatprep.subr.bf16.mxu0 %v3560_v0 }
 0x247   :  { %v433_v12 = vpop.f32.mrb[8].mxu0 }
 0x248   :  { %v437_v13 = vadd.f32 %v433_v12, %v218_v11  ;;  %v2302_v14 = vpop.f32.mrb[9].mxu0  ;;  %v1145_v11 = vld [vmem:[#allocation12 + $0x38] sm:$0xff] }
 0x249   :  { %v3941_v12 = vpack.c.bf16 %v1145_v11, %v1144_v7  ;;  %v1147_v14 = vld [vmem:[#allocation12 + $0x48] sm:$0xff] }
 0x24a   :  { %3358 = vtanh.f32 %v437_v13  ;;  %v1146_v13 = vld [vmem:[#allocation12 + $0x40] sm:$0xff] }
 0x254   :  { %v3834_v16 = vpop.eup %3358 }
 0x255   :  { %2336 = vmatmul.mubr.f32.vlgmr.msra.gmra.mrb[2].mxu1 %v3834_v16 }
 0x256   :  { %3002 = vmatpush3.bf16.msra.mxu1 %v3728_v9  ;;  %2405 = vmatprep.mubr.msk.f32.mxu1 %vm3561_vm0, %v3562_v1 }
 0x257   :  { %3003 = vmatprep.subr.bf16.mxu1 %v3560_v0 }
 0x25a   :  { %3005 = vmatpush3.bf16.msra.mxu1 %v3731_v15 }
 0x25b   :  { %3006 = vmatprep.subr.bf16.mxu1 %v3560_v0 }
 0x25e   :  { %3008 = vmatpush3.bf16.msra.mxu1 %v3735_v21 }
 0x25f   :  { %3009 = vmatprep.subr.bf16.mxu1 %v3560_v0 }
 0x262   :  { %3011 = vmatpush3.bf16.msra.mxu1 %v3739_v28 }
 0x263   :  { %3012 = vmatprep.subr.bf16.mxu1 %v3560_v0 }
 0x266   :  { %3014 = vmatpush3.bf16.msra.mxu1 %v3743_v34 }
 0x267   :  { %3015 = vmatprep.subr.bf16.mxu1 %v3560_v0 }
 0x26a   :  { %3017 = vmatpush3.bf16.msra.mxu1 %v3747_v40 }
 0x26b   :  { %3018 = vmatprep.subr.bf16.mxu1 %v3560_v0 }
 0x26e   :  { %3020 = vmatpush3.bf16.msra.mxu1 %v3751_v46 }
 0x26f   :  { %3021 = vmatprep.subr.bf16.mxu1 %v3560_v0 }
 0x272   :  { %3023 = vmatpush3.bf16.msra.mxu1 %v3755_v50 }
 0x273   :  { %3048 = vmatprep.subr.bf16.mxu1 %v3560_v0 }
 0x328   :  { %v525_v18 = vpop.f32.mrb[2].mxu1 }
 0x329   :  { %v529_v19 = vadd.f32 %v525_v18, %v223_v17  ;;  %v2337_v20 = vpop.f32.mrb[3].mxu1  ;;  %v1148_v17 = vld [vmem:[#allocation12 + $0x50] sm:$0xff]  ;;  %v1149_v18 = vld [vmem:[#allocation12 + $0x58] sm:$0xff] }
 0x32a   :  { %v1150_v20 = vld [vmem:[#allocation12 + $0x60] sm:$0xff] }
 0x32b   :  { %3360 = vtanh.f32 %v529_v19  ;;  %v3949_v19 = vpack.c.bf16 %v1149_v18, %v1148_v17  ;;  %v1740_v17 = vld [vmem:[#allocation13 + $0x18] sm:$0xff] }
 0x335   :  { %v3856_v22 = vpop.eup %3360 }
 0x336   :  { %2371 = vmatmul.mubr.f32.vlgmr.msra.gmra.mrb[10].mxu0 %v3856_v22 }
 0x337   :  { %3026 = vmatpush3.bf16.msra.mxu0 %v3728_v9  ;;  %2440 = vmatprep.mubr.msk.f32.mxu0 %vm3561_vm0, %v3562_v1 }
 0x338   :  { %3027 = vmatprep.subr.bf16.mxu0 %v3560_v0 }
 0x33b   :  { %3029 = vmatpush3.bf16.msra.mxu0 %v3731_v15 }
 0x33c   :  { %3030 = vmatprep.subr.bf16.mxu0 %v3560_v0 }
 0x33f   :  { %3032 = vmatpush3.bf16.msra.mxu0 %v3735_v21 }
 0x340   :  { %3033 = vmatprep.subr.bf16.mxu0 %v3560_v0 }
 0x343   :  { %3035 = vmatpush3.bf16.msra.mxu0 %v3739_v28 }
 0x344   :  { %3036 = vmatprep.subr.bf16.mxu0 %v3560_v0 }
 0x347   :  { %3038 = vmatpush3.bf16.msra.mxu0 %v3743_v34 }
 0x348   :  { %3039 = vmatprep.subr.bf16.mxu0 %v3560_v0 }
 0x34b   :  { %3041 = vmatpush3.bf16.msra.mxu0 %v3747_v40 }
 0x34c   :  { %3042 = vmatprep.subr.bf16.mxu0 %v3560_v0 }
 0x34f   :  { %3044 = vmatpush3.bf16.msra.mxu0 %v3751_v46 }
 0x350   :  { %3045 = vmatprep.subr.bf16.mxu0 %v3560_v0 }
 0x353   :  { %3047 = vmatpush3.bf16.msra.mxu0 %v3755_v50 }
 0x354   :  { %3072 = vmatprep.subr.bf16.mxu0 %v3560_v0 }
 0x409   :  { %v617_v24 = vpop.f32.mrb[10].mxu0 }
 0x40a   :  { %v621_v25 = vadd.f32 %v617_v24, %v228_v23  ;;  %v2372_v26 = vpop.f32.mrb[11].mxu0  ;;  %v1152_v24 = vld [vmem:[#allocation12 + $0x70] sm:$0xff] }
 0x40c   :  { %3362 = vtanh.f32 %v621_v25  ;;  %v1153_v25 = vld [vmem:[#allocation12 + $0x78] sm:$0xff] }
 0x40d   :  { %v3957_v26 = vpack.c.bf16 %v1153_v25, %v1152_v24  ;;  %v1744_v24 = vld [vmem:[#allocation13 + $0x38] sm:$0xff] }
 0x416   :  { %v3878_v27 = vpop.eup %3362 }
 0x417   :  { %2406 = vmatmul.mubr.f32.vlgmr.msra.gmra.mrb[4].mxu1 %v3878_v27 }
 0x418   :  { %3050 = vmatpush3.bf16.msra.mxu1 %v3728_v9  ;;  %2475 = vmatprep.mubr.msk.f32.mxu1 %vm3561_vm0, %v3562_v1 }
 0x419   :  { %3051 = vmatprep.subr.bf16.mxu1 %v3560_v0 }
 0x41c   :  { %3053 = vmatpush3.bf16.msra.mxu1 %v3731_v15 }
 0x41d   :  { %3054 = vmatprep.subr.bf16.mxu1 %v3560_v0 }
 0x420   :  { %3056 = vmatpush3.bf16.msra.mxu1 %v3735_v21 }
 0x421   :  { %3057 = vmatprep.subr.bf16.mxu1 %v3560_v0 }
 0x424   :  { %3059 = vmatpush3.bf16.msra.mxu1 %v3739_v28 }
 0x425   :  { %3060 = vmatprep.subr.bf16.mxu1 %v3560_v0 }
 0x428   :  { %3062 = vmatpush3.bf16.msra.mxu1 %v3743_v34 }
 0x429   :  { %3063 = vmatprep.subr.bf16.mxu1 %v3560_v0 }
 0x42c   :  { %3065 = vmatpush3.bf16.msra.mxu1 %v3747_v40 }
 0x42d   :  { %3066 = vmatprep.subr.bf16.mxu1 %v3560_v0 }
 0x430   :  { %3068 = vmatpush3.bf16.msra.mxu1 %v3751_v46 }
 0x431   :  { %3069 = vmatprep.subr.bf16.mxu1 %v3560_v0 }
 0x434   :  { %3071 = vmatpush3.bf16.msra.mxu1 %v3755_v50 }
 0x4ea   :  { %v709_v30 = vpop.f32.mrb[4].mxu1 }
 0x4eb   :  { %v713_v31 = vadd.f32 %v709_v30, %v233_v29  ;;  %v2407_v32 = vpop.f32.mrb[5].mxu1 }
 0x4ed   :  { %3364 = vtanh.f32 %v713_v31 }
 0x4f7   :  { %v3900_v33 = vpop.eup %3364 }
 0x4f8   :  { %2441 = vmatmul.mubr.f32.vlgmr.msra.gmra.mrb[12].mxu0 %v3900_v33 }
 0x4f9   :  { %3074 = vmatpush3.bf16.msra.mxu0 %v3728_v9  ;;  %2510 = vmatprep.mubr.msk.f32.mxu0 %vm3561_vm0, %v3562_v1  ;;  %v1002_v9 = vld [vmem:[#allocation10] sm:$0xff] }
 0x4fa   :  { %3075 = vmatprep.subr.bf16.mxu0 %v3560_v0 }
 0x4fd   :  { %3077 = vmatpush3.bf16.msra.mxu0 %v3731_v15  ;;  %v1003_v15 = vld [vmem:[#allocation10 + $0x8] sm:$0xff] }
 0x4fe   :  { %3078 = vmatprep.subr.bf16.mxu0 %v3560_v0 }
 0x501   :  { %3080 = vmatpush3.bf16.msra.mxu0 %v3735_v21  ;;  %v3096_v21 = vpack.c.bf16 %v1003_v15, %v1002_v9 }
 0x502   :  { %3081 = vmatprep.subr.bf16.mxu0 %v3560_v0 }
 0x503   :  { %3097 = vmatprep.subr.bf16.mxu1 %v3096_v21 }
 0x505   :  { %3083 = vmatpush3.bf16.msra.mxu0 %v3739_v28  ;;  %v238_v28 = vadd.f32 %v3825_v6, %v3801_v58  ;;  %v3937_v6 = vpack.c.bf16 %v1143_v5, %v1142_v4 }
 0x506   :  { %3084 = vmatprep.subr.bf16.mxu0 %v3560_v0 }
 0x509   :  { %3086 = vmatpush3.bf16.msra.mxu0 %v3743_v34 }
 0x50a   :  { %3087 = vmatprep.subr.bf16.mxu0 %v3560_v0 }
 0x50d   :  { %3089 = vmatpush3.bf16.msra.mxu0 %v3747_v40 }
 0x50e   :  { %3090 = vmatprep.subr.bf16.mxu0 %v3560_v0 }
 0x511   :  { %3092 = vmatpush3.bf16.msra.mxu0 %v3751_v46  ;;  %v3108_v46 = vpack.c.bf16 %v1009_v45, %v1008_v44 }
 0x512   :  { %3093 = vmatprep.subr.bf16.mxu0 %v3560_v0 }
 0x515   :  { %3095 = vmatpush3.bf16.msra.mxu0 %v3755_v50  ;;  %v1012_v50 = vld [vmem:[#allocation10 + $0x50] sm:$0xff] }
 0x516   :  { %3128 = vmatprep.subr.bf16.mxu0 %v3560_v0  ;;  %v3116_v52 = vpack.c.bf16 %v1013_v51, %v1012_v50 }
 0x5cb   :  { %v801_v34 = vpop.f32.mrb[12].mxu0 }
 0x5cc   :  { %v805_v35 = vadd.f32 %v801_v34, %v238_v28  ;;  %v2442_v36 = vpop.f32.mrb[13].mxu0  ;;  %v248_v34 = vadd.f32 %v3829_v8, %v3801_v58 }
 0x5ce   :  { %3366 = vtanh.f32 %v805_v35 }
 0x5d8   :  { %v3367_v40 = vpop.eup %3366 }
 0x5d9   :  { %2476 = vmatmul.mubr.f32.vlgmr.msra.gmra.mrb[6].mxu1 %v3367_v40 }
 0x5da   :  { %3099 = vmatpush3.bf16.msra.mxu1 %v3096_v21  ;;  %2545 = vmatprep.mubr.f32.mxu1 %v3804_v3  ;;  %v3933_v3 = vpack.c.bf16 %v1141_v2, %v1140_v63 }
 0x5db   :  { %3101 = vmatprep.subr.bf16.mxu1 %v3100_v39 }
 0x5de   :  { %3103 = vmatpush3.bf16.msra.mxu1 %v3100_v39  ;;  %v4017_v39 = vld [vmem:[%s4157_s6] ss:$0 sm:$0xff] }
 0x5df   :  { %3105 = vmatprep.subr.bf16.mxu1 %v3104_v43 }
 0x5e2   :  { %3107 = vmatpush3.bf16.msra.mxu1 %v3104_v43 }
 0x5e3   :  { %3109 = vmatprep.subr.bf16.mxu1 %v3108_v46 }
 0x5e6   :  { %3111 = vmatpush3.bf16.msra.mxu1 %v3108_v46 }
 0x5e7   :  { %3113 = vmatprep.subr.bf16.mxu1 %v3112_v49 }
 0x5ea   :  { %3115 = vmatpush3.bf16.msra.mxu1 %v3112_v49 }
 0x5eb   :  { %3117 = vmatprep.subr.bf16.mxu1 %v3116_v52 }
 0x5ee   :  { %3119 = vmatpush3.bf16.msra.mxu1 %v3116_v52 }
 0x5ef   :  { %3121 = vmatprep.subr.bf16.mxu1 %v3120_v55 }
 0x5f2   :  { %3123 = vmatpush3.bf16.msra.mxu1 %v3120_v55 }
 0x5f3   :  { %3125 = vmatprep.subr.bf16.mxu1 %v3124_v59 }
 0x5f6   :  { %3127 = vmatpush3.bf16.msra.mxu1 %v3124_v59 }
 0x5f7   :  { %3152 = vmatprep.subr.bf16.mxu1 %v3560_v0 }
 0x5f9   :  { %2546 = vmatmul.mubr.f32.vlgmr.msra.gmra.mrb[8].mxu1 %v3834_v16  ;;  %v3945_v16 = vpack.c.bf16 %v1147_v14, %v1146_v13  ;;  %v1738_v13 = vld [vmem:[#allocation13 + $0x8] sm:$0xff]  ;;  %v1739_v14 = vld [vmem:[#allocation13 + $0x10] sm:$0xff] }
 0x5fa   :  { %2548 = vmatprep.mubr.f32.mxu1 %v3856_v22  ;;  %3154 = vmatpush3.bf16.msra.mxu1 %v3929_v62  ;;  %v1151_v22 = vld [vmem:[#allocation12 + $0x68] sm:$0xff]  ;;  %v3324_v18 = vpack.c.bf16 %v1740_v17, %v1739_v14 }
 0x5fb   :  { %3155 = vmatprep.subr.bf16.mxu1 %v3560_v0  ;;  %v3953_v23 = vpack.c.bf16 %v1151_v22, %v1150_v20  ;;  %v1742_v20 = vld [vmem:[#allocation13 + $0x28] sm:$0xff] }
 0x5fd   :  { %2549 = vmatmul.mubr.f32.gmra.mrb[10].mxu1 %v3878_v27  ;;  %v243_v27 = vadd.f32 %v3801_v58, %v3831_v10 }
 0x5fe   :  { %2551 = vmatprep.mubr.f32.mxu1 %v3900_v33  ;;  %3157 = vmatpush3.bf16.msra.mxu1 %v3933_v3 }
 0x5ff   :  { %3158 = vmatprep.subr.bf16.mxu1 %v3560_v0 }
 0x601   :  { %2552 = vmatmul.mubr.f32.gmra.mrb[12].mxu1 %v3367_v40 }
 0x602   :  { %3160 = vmatpush3.bf16.msra.mxu1 %v3937_v6 }
 0x603   :  { %3161 = vmatprep.subr.bf16.mxu1 %v3560_v0 }
 0x606   :  { %3163 = vmatpush3.bf16.msra.mxu1 %v3941_v12 }
 0x607   :  { %3164 = vmatprep.subr.bf16.mxu1 %v3560_v0 }
 0x60a   :  { %3166 = vmatpush3.bf16.msra.mxu1 %v3945_v16 }
 0x60b   :  { %3167 = vmatprep.subr.bf16.mxu1 %v3560_v0 }
 0x60e   :  { %3169 = vmatpush3.bf16.msra.mxu1 %v3949_v19 }
 0x60f   :  { %3170 = vmatprep.subr.bf16.mxu1 %v3560_v0 }
 0x612   :  { %3172 = vmatpush3.bf16.msra.mxu1 %v3953_v23 }
 0x613   :  { %3173 = vmatprep.subr.bf16.mxu1 %v3560_v0 }
 0x616   :  { %3175 = vmatpush3.bf16.msra.mxu1 %v3957_v26 }
 0x617   :  { %3200 = vmatprep.subr.bf16.mxu1 %v3560_v0 }
 0x6ac   :  { %v893_v29 = vpop.f32.mrb[6].mxu1 }
 0x6ad   :  { %v897_v30 = vadd.f32 %v893_v29, %v243_v27  ;;  %v2477_v31 = vpop.f32.mrb[7].mxu1 }
 0x6af   :  { %3368 = vtanh.f32 %v897_v30 }
 0x6b9   :  { %v3369_v32 = vpop.eup %3368 }
 0x6ba   :  { %2511 = vmatmul.mubr.f32.vlgmr.msra.gmra.mrb[14].mxu0 %v3369_v32  ;;  %2554 = vmatprep.mubr.f32.mxu1 %v3369_v32 }
 0x6bb   :  { %3130 = vmatpush3.bf16.msra.mxu0 %v3929_v62  ;;  %2589 = vmatprep.mubr.msk.f32.mxu0 %vm3561_vm0, %v3562_v1 }
 0x6bc   :  { %3131 = vmatprep.subr.bf16.mxu0 %v3560_v0 }
 0x6bf   :  { %3133 = vmatpush3.bf16.msra.mxu0 %v3933_v3 }
 0x6c0   :  { %3134 = vmatprep.subr.bf16.mxu0 %v3560_v0 }
 0x6c3   :  { %3136 = vmatpush3.bf16.msra.mxu0 %v3937_v6 }
 0x6c4   :  { %3137 = vmatprep.subr.bf16.mxu0 %v3560_v0 }
 0x6c7   :  { %3139 = vmatpush3.bf16.msra.mxu0 %v3941_v12 }
 0x6c8   :  { %3140 = vmatprep.subr.bf16.mxu0 %v3560_v0 }
 0x6cb   :  { %3142 = vmatpush3.bf16.msra.mxu0 %v3945_v16 }
 0x6cc   :  { %v3974_v10 = vpop.f32.mrb[8].mxu1  ;;  %3143 = vmatprep.subr.bf16.mxu0 %v3560_v0 }
 0x6cd   :  { %v1090_v33 = vpop.f32.mrb[9].mxu1  ;;  %v1096_v45 = vadd.f32 %v3974_v10, %v4017_v39 }
 0x6ce   :  { %v1091_v40 = vadd.f32 %v4017_v39, %v1090_v33  ;;  %v1747_v33 = vld [vmem:[#allocation13 + $0x50] sm:$0xff] }
 0x6cf   :  { %3145 = vmatpush3.bf16.msra.mxu0 %v3949_v19 }
 0x6d0   :  { %v3978_v9 = vpop.f32.mrb[10].mxu1  ;;  %3146 = vmatprep.subr.bf16.mxu0 %v3560_v0 }
 0x6d1   :  { %v3981_v15 = vpop.f32.mrb[11].mxu1  ;;  %v1106_v55 = vadd.f32 %v3978_v9, %v4017_v39  ;;  %v1748_v9 = vld [vmem:[#allocation13 + $0x58] sm:$0xff] }
 0x6d2   :  { %v1101_v50 = vadd.f32 %v4017_v39, %v3981_v15  ;;  %v3336_v15 = vpack.c.bf16 %v1748_v9, %v1747_v33 }
 0x6d3   :  { %3148 = vmatpush3.bf16.msra.mxu0 %v3953_v23 }
 0x6d4   :  { %v3984_v21 = vpop.f32.mrb[12].mxu1  ;;  %3149 = vmatprep.subr.bf16.mxu0 %v3560_v0 }
 0x6d5   :  { %v3987_v28 = vpop.f32.mrb[13].mxu1 }
 0x6d6   :  { %v1111_v61 = vadd.f32 %v4017_v39, %v3987_v28  ;;  %v1750_v28 = vld [vmem:[#allocation13 + $0x68] sm:$0xff] }
 0x6d7   :  { %3151 = vmatpush3.bf16.msra.mxu0 %v3957_v26 }
 0x6d8   :  { %3176 = vmatprep.subr.bf16.mxu0 %v3560_v0 }
 0x6da   :  { %2590 = vmatmul.mubr.f32.vlgmr.msra.gmra.mrb[16].mxu0 %v3562_v1 }
 0x6db   :  { %3178 = vmatpush3.bf16.msra.mxu0 %v3929_v62  ;;  %2659 = vmatprep.mubr.msk.f32.mxu0 %vm3561_vm0, %v3562_v1 }
 0x6dc   :  { %3179 = vmatprep.subr.bf16.mxu0 %v3560_v0 }
 0x6df   :  { %3181 = vmatpush3.bf16.msra.mxu0 %v3933_v3 }
 0x6e0   :  { %3182 = vmatprep.subr.bf16.mxu0 %v3560_v0 }
 0x6e3   :  { %3184 = vmatpush3.bf16.msra.mxu0 %v3937_v6 }
 0x6e4   :  { %3185 = vmatprep.subr.bf16.mxu0 %v3560_v0 }
 0x6e7   :  { %3187 = vmatpush3.bf16.msra.mxu0 %v3941_v12 }
 0x6e8   :  { %3188 = vmatprep.subr.bf16.mxu0 %v3560_v0 }
 0x6eb   :  { %3190 = vmatpush3.bf16.msra.mxu0 %v3945_v16 }
 0x6ec   :  { %3191 = vmatprep.subr.bf16.mxu0 %v3560_v0 }
 0x6ef   :  { %3193 = vmatpush3.bf16.msra.mxu0 %v3949_v19 }
 0x6f0   :  { %3194 = vmatprep.subr.bf16.mxu0 %v3560_v0 }
 0x6f3   :  { %3196 = vmatpush3.bf16.msra.mxu0 %v3953_v23 }
 0x6f4   :  { %3197 = vmatprep.subr.bf16.mxu0 %v3560_v0 }
 0x6f7   :  { %3199 = vmatpush3.bf16.msra.mxu0 %v3957_v26 }
 0x6f8   :  { %3224 = vmatprep.subr.bf16.mxu0 %v3560_v0 }
 0x78d   :  { %v985_v35 = vpop.f32.mrb[14].mxu0 }
 0x78e   :  { %v989_v36 = vadd.f32 %v985_v35, %v248_v34  ;;  %v2512_v37 = vpop.f32.mrb[15].mxu0  ;;  %v1751_v35 = vld [vmem:[#allocation13 + $0x70] sm:$0xff] }
 0x790   :  { %3370 = vtanh.f32 %v989_v36  ;;  %v1752_v36 = vld [vmem:[#allocation13 + $0x78] sm:$0xff] }
 0x791   :  { %v3342_v37 = vpack.c.bf16 %v1752_v36, %v1751_v35 }
 0x79a   :  { %v3371_v38 = vpop.eup %3370 }
 0x79b   :  { %2555 = vmatmul.mubr.f32.gmra.mrb[14].mxu1 %v3371_v38 }
 0x79c   :  { %2624 = vmatprep.mubr.msk.f32.mxu1 %vm3561_vm0, %v3562_v1 }
 0x7ad   :  { %v1220_v41 = vpop.f32.mrb[16].mxu0 }
 0x7ae   :  { %v1224_v42 = vadd.f32 %v1220_v41, %v1091_v40  ;;  %v2591_v43 = vpop.f32.mrb[17].mxu0 }
 0x7b0   :  { %3372 = vtanh.f32 %v1224_v42 }
 0x7ba   :  { %v3373_v58 = vpop.eup %3372 }
 0x7bb   :  { %2625 = vmatmul.mubr.f32.vlgmr.msra.gmra.mrb[16].mxu1 %v3373_v58  ;;  %v1851_v58 = vld [vmem:[%s4159_s8] ss:$0 sm:$0xff] }
 0x7bc   :  { %3202 = vmatpush3.bf16.msra.mxu1 %v3929_v62  ;;  %2694 = vmatprep.mubr.msk.f32.mxu1 %vm3561_vm0, %v3562_v1 }
 0x7bd   :  { %3203 = vmatprep.subr.bf16.mxu1 %v3560_v0 }
 0x7c0   :  { %3205 = vmatpush3.bf16.msra.mxu1 %v3933_v3 }
 0x7c1   :  { %3206 = vmatprep.subr.bf16.mxu1 %v3560_v0 }
 0x7c4   :  { %3208 = vmatpush3.bf16.msra.mxu1 %v3937_v6 }
 0x7c5   :  { %3209 = vmatprep.subr.bf16.mxu1 %v3560_v0 }
 0x7c8   :  { %3211 = vmatpush3.bf16.msra.mxu1 %v3941_v12 }
 0x7c9   :  { %3212 = vmatprep.subr.bf16.mxu1 %v3560_v0 }
 0x7cc   :  { %3214 = vmatpush3.bf16.msra.mxu1 %v3945_v16 }
 0x7cd   :  { %3215 = vmatprep.subr.bf16.mxu1 %v3560_v0 }
 0x7d0   :  { %3217 = vmatpush3.bf16.msra.mxu1 %v3949_v19 }
 0x7d1   :  { %3218 = vmatprep.subr.bf16.mxu1 %v3560_v0 }
 0x7d4   :  { %3220 = vmatpush3.bf16.msra.mxu1 %v3953_v23 }
 0x7d5   :  { %3221 = vmatprep.subr.bf16.mxu1 %v3560_v0 }
 0x7d8   :  { %3223 = vmatpush3.bf16.msra.mxu1 %v3957_v26 }
 0x7d9   :  { %3248 = vmatprep.subr.bf16.mxu1 %v3560_v0 }
 0x86e   :  { %v4038_v8 = vpop.f32.mrb[14].mxu1 }
 0x86f   :  { %v4040_v44 = vpop.f32.mrb[15].mxu1  ;;  %v1126_v38 = vadd.f32 %v4038_v8, %v4017_v39 }
 0x870   :  { %v1121_v29 = vadd.f32 %v4017_v39, %v4040_v44 }
 0x88e   :  { %v1293_v46 = vpop.f32.mrb[16].mxu1 }
 0x88f   :  { %v1297_v47 = vadd.f32 %v1293_v46, %v1096_v45  ;;  %v2626_v48 = vpop.f32.mrb[17].mxu1 }
 0x891   :  { %3374 = vtanh.f32 %v1297_v47 }
 0x89b   :  { %v3375_v49 = vpop.eup %3374 }
 0x89c   :  { %2660 = vmatmul.mubr.f32.vlgmr.msra.gmra.mrb[18].mxu0 %v3375_v49 }
 0x89d   :  { %3226 = vmatpush3.bf16.msra.mxu0 %v3929_v62  ;;  %2729 = vmatprep.mubr.msk.f32.mxu0 %vm3561_vm0, %v3562_v1 }
 0x89e   :  { %3227 = vmatprep.subr.bf16.mxu0 %v3560_v0 }
 0x8a1   :  { %3229 = vmatpush3.bf16.msra.mxu0 %v3933_v3 }
 0x8a2   :  { %3230 = vmatprep.subr.bf16.mxu0 %v3560_v0 }
 0x8a5   :  { %3232 = vmatpush3.bf16.msra.mxu0 %v3937_v6 }
 0x8a6   :  { %3233 = vmatprep.subr.bf16.mxu0 %v3560_v0 }
 0x8a9   :  { %3235 = vmatpush3.bf16.msra.mxu0 %v3941_v12 }
 0x8aa   :  { %3236 = vmatprep.subr.bf16.mxu0 %v3560_v0 }
 0x8ad   :  { %3238 = vmatpush3.bf16.msra.mxu0 %v3945_v16 }
 0x8ae   :  { %3239 = vmatprep.subr.bf16.mxu0 %v3560_v0 }
 0x8b1   :  { %3241 = vmatpush3.bf16.msra.mxu0 %v3949_v19 }
 0x8b2   :  { %3242 = vmatprep.subr.bf16.mxu0 %v3560_v0 }
 0x8b5   :  { %3244 = vmatpush3.bf16.msra.mxu0 %v3953_v23 }
 0x8b6   :  { %3245 = vmatprep.subr.bf16.mxu0 %v3560_v0 }
 0x8b9   :  { %3247 = vmatpush3.bf16.msra.mxu0 %v3957_v26 }
 0x8ba   :  { %3272 = vmatprep.subr.bf16.mxu0 %v3560_v0 }
 0x96f   :  { %v1366_v51 = vpop.f32.mrb[18].mxu0 }
 0x970   :  { %v1370_v52 = vadd.f32 %v1366_v51, %v1101_v50  ;;  %v2661_v53 = vpop.f32.mrb[19].mxu0 }
 0x972   :  { %3376 = vtanh.f32 %v1370_v52 }
 0x97c   :  { %v3377_v54 = vpop.eup %3376 }
 0x97d   :  { %2695 = vmatmul.mubr.f32.vlgmr.msra.gmra.mrb[18].mxu1 %v3377_v54 }
 0x97e   :  { %3250 = vmatpush3.bf16.msra.mxu1 %v3929_v62  ;;  %2764 = vmatprep.mubr.msk.f32.mxu1 %vm3561_vm0, %v3562_v1 }
 0x97f   :  { %3251 = vmatprep.subr.bf16.mxu1 %v3560_v0 }
 0x982   :  { %3253 = vmatpush3.bf16.msra.mxu1 %v3933_v3 }
 0x983   :  { %3254 = vmatprep.subr.bf16.mxu1 %v3560_v0 }
 0x986   :  { %3256 = vmatpush3.bf16.msra.mxu1 %v3937_v6 }
 0x987   :  { %3257 = vmatprep.subr.bf16.mxu1 %v3560_v0 }
 0x98a   :  { %3259 = vmatpush3.bf16.msra.mxu1 %v3941_v12 }
 0x98b   :  { %3260 = vmatprep.subr.bf16.mxu1 %v3560_v0 }
 0x98e   :  { %3262 = vmatpush3.bf16.msra.mxu1 %v3945_v16 }
 0x98f   :  { %3263 = vmatprep.subr.bf16.mxu1 %v3560_v0 }
 0x992   :  { %3265 = vmatpush3.bf16.msra.mxu1 %v3949_v19 }
 0x993   :  { %3266 = vmatprep.subr.bf16.mxu1 %v3560_v0 }
 0x996   :  { %3268 = vmatpush3.bf16.msra.mxu1 %v3953_v23 }
 0x997   :  { %3269 = vmatprep.subr.bf16.mxu1 %v3560_v0 }
 0x99a   :  { %3271 = vmatpush3.bf16.msra.mxu1 %v3957_v26 }
 0x99b   :  { %3296 = vmatprep.subr.bf16.mxu1 %v3560_v0 }
 0xa50   :  { %v1439_v56 = vpop.f32.mrb[18].mxu1 }
 0xa51   :  { %v1443_v57 = vadd.f32 %v1439_v56, %v1106_v55  ;;  %v2696_v59 = vpop.f32.mrb[19].mxu1 }
 0xa53   :  { %3378 = vtanh.f32 %v1443_v57 }
 0xa5d   :  { %v3379_v60 = vpop.eup %3378 }
 0xa5e   :  { %2730 = vmatmul.mubr.f32.vlgmr.msra.gmra.mrb[20].mxu0 %v3379_v60 }
 0xa5f   :  { %3274 = vmatpush3.bf16.msra.mxu0 %v3929_v62  ;;  %2799 = vmatprep.mubr.msk.f32.mxu0 %vm3561_vm0, %v3562_v1 }
 0xa60   :  { %3275 = vmatprep.subr.bf16.mxu0 %v3560_v0 }
 0xa63   :  { %3277 = vmatpush3.bf16.msra.mxu0 %v3933_v3 }
 0xa64   :  { %3278 = vmatprep.subr.bf16.mxu0 %v3560_v0 }
 0xa67   :  { %3280 = vmatpush3.bf16.msra.mxu0 %v3937_v6 }
 0xa68   :  { %3281 = vmatprep.subr.bf16.mxu0 %v3560_v0 }
 0xa6b   :  { %3283 = vmatpush3.bf16.msra.mxu0 %v3941_v12 }
 0xa6c   :  { %3284 = vmatprep.subr.bf16.mxu0 %v3560_v0 }
 0xa6f   :  { %3286 = vmatpush3.bf16.msra.mxu0 %v3945_v16 }
 0xa70   :  { %3287 = vmatprep.subr.bf16.mxu0 %v3560_v0 }
 0xa73   :  { %3289 = vmatpush3.bf16.msra.mxu0 %v3949_v19 }
 0xa74   :  { %3290 = vmatprep.subr.bf16.mxu0 %v3560_v0 }
 0xa77   :  { %3292 = vmatpush3.bf16.msra.mxu0 %v3953_v23 }
 0xa78   :  { %3293 = vmatprep.subr.bf16.mxu0 %v3560_v0 }
 0xa7b   :  { %3295 = vmatpush3.bf16.msra.mxu0 %v3957_v26 }
 0xa7c   :  { %3320 = vmatprep.subr.bf16.mxu0 %v3560_v0 }
 0xb31   :  { %v1512_v63 = vpop.f32.mrb[20].mxu0 }
 0xb32   :  { %v1516_v2 = vadd.f32 %v1512_v63, %v1111_v61  ;;  %v2731_v4 = vpop.f32.mrb[21].mxu0 }
 0xb34   :  { %3380 = vtanh.f32 %v1516_v2 }
 0xb3e   :  { %v3381_v5 = vpop.eup %3380 }
 0xb3f   :  { %2765 = vmatmul.mubr.f32.vlgmr.msra.gmra.mrb[20].mxu1 %v3381_v5 }
 0xb40   :  { %3298 = vmatpush3.bf16.msra.mxu1 %v3929_v62  ;;  %2834 = vmatprep.mubr.msk.f32.mxu1 %vm3561_vm0, %v3562_v1  ;;  %v1116_v62 = vadd.f32 %v3984_v21, %v4017_v39  ;;  %v1749_v21 = vld [vmem:[#allocation13 + $0x60] sm:$0xff] }
 0xb41   :  { %3299 = vmatprep.subr.bf16.mxu1 %v3560_v0  ;;  %v3339_v34 = vpack.c.bf16 %v1750_v28, %v1749_v21 }
 0xb44   :  { %3301 = vmatpush3.bf16.msra.mxu1 %v3933_v3 }
 0xb45   :  { %3302 = vmatprep.subr.bf16.mxu1 %v3560_v0 }
 0xb48   :  { %3304 = vmatpush3.bf16.msra.mxu1 %v3937_v6 }
 0xb49   :  { %3305 = vmatprep.subr.bf16.mxu1 %v3560_v0 }
 0xb4c   :  { %3307 = vmatpush3.bf16.msra.mxu1 %v3941_v12  ;;  %v1737_v12 = vld [vmem:[#allocation13] sm:$0xff] }
 0xb4d   :  { %3308 = vmatprep.subr.bf16.mxu1 %v3560_v0 }
 0xb50   :  { %3310 = vmatpush3.bf16.msra.mxu1 %v3945_v16  ;;  %v3321_v16 = vpack.c.bf16 %v1738_v13, %v1737_v12 }
 0xb51   :  { %3311 = vmatprep.subr.bf16.mxu1 %v3560_v0 }
 0xb54   :  { %3313 = vmatpush3.bf16.msra.mxu1 %v3949_v19  ;;  %v1741_v19 = vld [vmem:[#allocation13 + $0x20] sm:$0xff] }
 0xb55   :  { %3314 = vmatprep.subr.bf16.mxu1 %v3560_v0  ;;  %v3327_v22 = vpack.c.bf16 %v1742_v20, %v1741_v19 }
 0xb58   :  { %3316 = vmatpush3.bf16.msra.mxu1 %v3953_v23  ;;  %v1743_v23 = vld [vmem:[#allocation13 + $0x30] sm:$0xff] }
 0xb59   :  { %3317 = vmatprep.subr.bf16.mxu1 %v3560_v0  ;;  %v3330_v25 = vpack.c.bf16 %v1744_v24, %v1743_v23 }
 0xb5c   :  { %3319 = vmatpush3.bf16.msra.mxu1 %v3957_v26  ;;  %v1746_v26 = vld [vmem:[#allocation13 + $0x48] sm:$0xff] }
 0xc12   :  { %v1585_v3 = vpop.f32.mrb[20].mxu1 }
 0xc13   :  { %v1589_v6 = vadd.f32 %v1585_v3, %v1116_v62  ;;  %v2766_v7 = vpop.f32.mrb[21].mxu1 }
 0xc15   :  { %3382 = vtanh.f32 %v1589_v6 }
 0xc1f   :  { %v3383_v11 = vpop.eup %3382 }
 0xc20   :  { %2800 = vmatmul.mubr.f32.vlgmr.msra.gmra.mrb[22].mxu0 %v3383_v11 }
 0xc21   :  { %2869 = vmatprep.mubr.msk.f32.mxu0 %vm3561_vm0, %v3562_v1  ;;  %3322 = vmatpush3.bf16.msra.mxu0 %v3321_v16  ;;  %v1745_v1 = vld [vmem:[#allocation13 + $0x40] sm:$0xff] }
 0xc22   :  { %3323 = vmatprep.subr.bf16.mxu0 %v3560_v0  ;;  %v3333_v27 = vpack.c.bf16 %v1746_v26, %v1745_v1 }
 0xc25   :  { %3325 = vmatpush3.bf16.msra.mxu0 %v3324_v18 }
 0xc26   :  { %3326 = vmatprep.subr.bf16.mxu0 %v3560_v0 }
 0xc29   :  { %3328 = vmatpush3.bf16.msra.mxu0 %v3327_v22 }
 0xc2a   :  { %3329 = vmatprep.subr.bf16.mxu0 %v3560_v0 }
 0xc2d   :  { %3331 = vmatpush3.bf16.msra.mxu0 %v3330_v25 }
 0xc2e   :  { %3332 = vmatprep.subr.bf16.mxu0 %v3560_v0 }
 0xc31   :  { %3334 = vmatpush3.bf16.msra.mxu0 %v3333_v27 }
 0xc32   :  { %3335 = vmatprep.subr.bf16.mxu0 %v3560_v0 }
 0xc35   :  { %3337 = vmatpush3.bf16.msra.mxu0 %v3336_v15 }
 0xc36   :  { %3338 = vmatprep.subr.bf16.mxu0 %v3560_v0 }
 0xc39   :  { %3340 = vmatpush3.bf16.msra.mxu0 %v3339_v34 }
 0xc3a   :  { %3341 = vmatprep.subr.bf16.mxu0 %v3560_v0 }
 0xc3d   :  { %3343 = vmatpush3.bf16.msra.mxu0 %v3342_v37 }
 0xcf3   :  { %v1658_v30 = vpop.f32.mrb[22].mxu0 }
 0xcf4   :  { %v1662_v31 = vadd.f32 %v1658_v30, %v1121_v29  ;;  %v2801_v32 = vpop.f32.mrb[23].mxu0 }
 0xcf6   :  { %3384 = vtanh.f32 %v1662_v31 }
 0xd00   :  { %v3385_v10 = vpop.eup %3384 }
 0xd01   :  { %2835 = vmatmul.mubr.f32.vlgmr.msra.gmra.mrb[22].mxu1 %v3385_v10 }
 0xdd4   :  { %v1731_v40 = vpop.f32.mrb[22].mxu1 }
 0xdd5   :  { %v1735_v41 = vadd.f32 %v1731_v40, %v1126_v38  ;;  %v2836_v42 = vpop.f32.mrb[23].mxu1 }
 0xdd7   :  { %3386 = vtanh.f32 %v1735_v41 }
 0xde1   :  { %v3387_v43 = vpop.eup %3386 }
 0xde2   :  { %2870 = vmatmul.mubr.f32.vlgmr.msra.gmra.mrb[24].mxu0 %v3387_v43 }
 0xeb5   :  { %v1826_v44 = vpop.f32.mrb[24].mxu0 }
 0xeb6   :  { %v1827_v45 = vadd.f32 %v1851_v58, %v1826_v44  ;;  %v2871_v46 = vpop.f32.mrb[25].mxu0 }
 0xeb8   :  { %1830 = vst [vmem:[#allocation15] sm:$0xff] %v1827_v45 }
 0xeb9   :  { %3531 = shalt.err (!%p3528_p10)
}
 0xeba   :  { %s3532_s25 = scalar_lea.hbm %s4160_s9, 128 }
 0xebb   :  { %p3533_p11 = scmp.ne.s32.totalorder %s4160_s9, %s3532_s25  ;;  %p3536_p12 = scmp.lt.u32.totalorder %s3532_s25, %s4160_s9 }
 0xebd   :  { %p3538_p13 = pnand %p3536_p12, %p3533_p11 }
 0xebf   :  { %3541 = shalt.err (!%p3538_p13)
}
 0xec0   :  { %1840 = dma.vmem_to_hbm [thread:$0]  %s1838_s19, 128, %s4160_s9, [#allocation6]  }
 0xec1   :  { %3550 = dma.done.wait [#allocation6], 128  }
 0xec2   :  { %3551 = vsyncadd [#allocation6], 4294967168 }
 0xec3   :  { %1844 = vsyncpa [#allocation5], 1 }
 0xec4   :  { %1845 = vsyncpa [#allocation8], 1 }
 0xec5   :  { %1846 = vsyncpa [#allocation11], 1 }
 0xec6   :  { %1847 = vsyncpa [#allocation14], 1 }
 0xec7   :  { %1848 = vsyncpa [#allocation6], 1 }

// kernel: tpu_custom_call.1
= control target key start
LH: loop header
LB: loop body
LE: loop exit
PB: predicated region body
PF: predicated region fallthrough
CT: control target
= control target key end

     0   :  { %14 = vsyncpa [#allocation5], 0  ;;  %s4151_s0 = inlined_call_operand.hbm [shape: f32[8,8,128], index: 0, kind: input, shape index: {}]   ;;  %s4152_s1 = inlined_call_operand.hbm [shape: f32[128,128], index: 1, kind: input, shape index: {}]   ;;  %s4153_s2 = inlined_call_operand.hbm [shape: f32[128,128], index: 2, kind: input, shape index: {}]   ;;  %s4154_s3 = inlined_call_operand.vmem [shape: f32[1,128], index: 3, kind: input, shape index: {}]   ;;  %s4155_s4 = inlined_call_operand.hbm [shape: f32[128,128], index: 4, kind: input, shape index: {}]   ;;  %s4156_s5 = inlined_call_operand.hbm [shape: f32[128,128], index: 5, kind: input, shape index: {}]   ;;  %s4157_s6 = inlined_call_operand.vmem [shape: f32[1,128], index: 6, kind: input, shape index: {}]   ;;  %s4158_s7 = inlined_call_operand.hbm [shape: f32[128,128], index: 7, kind: input, shape index: {}]   ;;  %s4159_s8 = inlined_call_operand.vmem [shape: f32[1,128], index: 8, kind: input, shape index: {}]   ;;  %s4160_s9 = inlined_call_operand.hbm [shape: f32[8,128], index: 9, kind: output, shape index: {}]  }
   0x1   :  { %15 = vsyncpa [#allocation8], 0 }
   0x2   :  { %16 = vsyncpa [#allocation11], 0 }
   0x3   :  { %17 = vsyncpa [#allocation14], 0 }
   0x4   :  { %18 = vsyncpa [#allocation6], 0  ;;  %s3552_s30 = smov [#allocation7]   ;;  %s3553_s11 = smov [#allocation10]  }
   0x5   :  { %s36_s10 = sshll.u32 %s3552_s30, 4  ;;  %s62_s12 = sshll.u32 %s3553_s11, 4  ;;  %s37_s10 = int_to_ptr.vmem [resolvable:$true] %s36_s10  ;;  %s3614_s12 = int_to_ptr.vmem [resolvable:$true] %s62_s12 }
   0x6   :  { %s3388_s15 = scalar_lea.hbm %s4152_s1, 2048 }
   0x7   :  { %p3389_p0 = scmp.ne.s32.totalorder %s4152_s1, %s3388_s15  ;;  %p3392_p1 = scmp.lt.u32.totalorder %s3388_s15, %s4152_s1 }
   0x9   :  { %p3394_p2 = pnand %p3392_p1, %p3389_p0 }
   0xb   :  { %3397 = shalt.err (!%p3394_p2)
}
   0xc   :  { %s3398_s20 = scalar_lea.vmem %s37_s10, 2048  ;;  %p3403_p4 = scmp.lt.s32.totalorder %s37_s10, %s37_s10 }
   0xd   :  { %p3399_p3 = scmp.ne.s32.totalorder %s37_s10, %s3398_s20  ;;  %p3404_p5 = scmp.lt.s32.totalorder %s3398_s20, %s3398_s20 }
   0xf   :  { %p3405_p6 = por %p3404_p5, %p3403_p4 }
  0x11   :  { %p3406_p7 = pnand %p3405_p6, %p3399_p3 }
  0x13   :  { %3409 = shalt.err (!%p3406_p7)
}
  0x14   :  { %s3554_s21 = smov 128   ;;  %s3555_s22 = smov 8  }
  0x15   :  { %42 = dma.hbm_to_vmem [thread:$0]  %s4152_s1, 2048, %s37_s10, [#allocation8], %s3554_s21, %s3554_s21, %s3555_s22  }
  0x16   :  { %s3410_s27 = scalar_lea.hbm %s4155_s4, 2048 }
  0x17   :  { %p3411_p8 = scmp.ne.s32.totalorder %s4155_s4, %s3410_s27  ;;  %p3414_p9 = scmp.lt.u32.totalorder %s3410_s27, %s4155_s4 }
  0x19   :  { %p3416_p10 = pnand %p3414_p9, %p3411_p8 }
  0x1b   :  { %3419 = shalt.err (!%p3416_p10)
}
  0x1c   :  { %s3420_s13 = scalar_lea.vmem %s3614_s12, 2048  ;;  %p3425_p12 = scmp.lt.s32.totalorder %s3614_s12, %s3614_s12 }
  0x1d   :  { %p3421_p11 = scmp.ne.s32.totalorder %s3614_s12, %s3420_s13  ;;  %p3426_p13 = scmp.lt.s32.totalorder %s3420_s13, %s3420_s13 }
  0x1f   :  { %p3427_p0 = por %p3426_p13, %p3425_p12 }
  0x21   :  { %p3428_p1 = pnand %p3427_p0, %p3421_p11 }
  0x23   :  { %3431 = shalt.err (!%p3428_p1)
}
  0x24   :  { %68 = dma.hbm_to_vmem [thread:$0]  %s4155_s4, 2048, %s3614_s12, [#allocation11], %s3554_s21, %s3554_s21, %s3555_s22  }
  0x25   :  { %s3556_s14 = smov [#allocation4]   ;;  %s3557_s16 = smov [#allocation9]  }
  0x26   :  { %s24_s15 = sshll.u32 %s3556_s14, 4  ;;  %s48_s17 = sshll.u32 %s3557_s16, 4  ;;  %s25_s15 = int_to_ptr.vmem [resolvable:$true] %s24_s15  ;;  %s3651_s17 = int_to_ptr.vmem [resolvable:$true] %s48_s17 }
  0x27   :  { %s3432_s20 = scalar_lea.hbm %s4151_s0, 1024 }
  0x28   :  { %p3433_p2 = scmp.ne.s32.totalorder %s4151_s0, %s3432_s20  ;;  %p3436_p3 = scmp.lt.u32.totalorder %s3432_s20, %s4151_s0 }
  0x2a   :  { %p3438_p4 = pnand %p3436_p3, %p3433_p2 }
  0x2c   :  { %3441 = shalt.err (!%p3438_p4)
}
  0x2d   :  { %s3442_s4 = scalar_lea.vmem %s25_s15, 1024  ;;  %p3447_p6 = scmp.lt.s32.totalorder %s25_s15, %s25_s15 }
  0x2e   :  { %p3443_p5 = scmp.ne.s32.totalorder %s25_s15, %s3442_s4  ;;  %p3448_p7 = scmp.lt.s32.totalorder %s3442_s4, %s3442_s4 }
  0x30   :  { %p3449_p8 = por %p3448_p7, %p3447_p6 }
  0x32   :  { %p3450_p9 = pnand %p3449_p8, %p3443_p5 }
  0x34   :  { %3453 = shalt.err (!%p3450_p9)
}
  0x35   :  { %30 = dma.hbm_to_vmem [thread:$0]  %s4151_s0, 1024, %s25_s15, [#allocation5], %s3554_s21, %s3554_s21, %s3555_s22  }
  0x36   :  { %s3454_s30 = scalar_lea.hbm %s4153_s2, 2048 }
  0x37   :  { %p3455_p10 = scmp.ne.s32.totalorder %s4153_s2, %s3454_s30  ;;  %p3458_p11 = scmp.lt.u32.totalorder %s3454_s30, %s4153_s2 }
  0x39   :  { %p3460_p12 = pnand %p3458_p11, %p3455_p10 }
  0x3b   :  { %3463 = shalt.err (!%p3460_p12)
}
  0x3c   :  { %s3464_s14 = scalar_lea.vmem %s3651_s17, 2048  ;;  %p3469_p0 = scmp.lt.s32.totalorder %s3651_s17, %s3651_s17 }
  0x3d   :  { %p3465_p13 = scmp.ne.s32.totalorder %s3651_s17, %s3464_s14  ;;  %p3470_p1 = scmp.lt.s32.totalorder %s3464_s14, %s3464_s14 }
  0x3f   :  { %p3471_p2 = por %p3470_p1, %p3469_p0 }
  0x41   :  { %p3472_p3 = pnand %p3471_p2, %p3465_p13 }
  0x43   :  { %3475 = shalt.err (!%p3472_p3)
}
  0x44   :  { %54 = dma.hbm_to_vmem [thread:$0]  %s4153_s2, 2048, %s3651_s17, [#allocation8], %s3554_s21, %s3554_s21, %s3555_s22  }
  0x45   :  { %s3558_s16 = smov [#allocation12]   ;;  %s3559_s19 = smov [#allocation13]  }
  0x46   :  { %s74_s18 = sshll.u32 %s3558_s16, 4  ;;  %s88_s20 = sshll.u32 %s3559_s19, 4  ;;  %s75_s18 = int_to_ptr.vmem [resolvable:$true] %s74_s18  ;;  %s3688_s20 = int_to_ptr.vmem [resolvable:$true] %s88_s20 }
  0x47   :  { %s3476_s25 = scalar_lea.hbm %s4156_s5, 2048 }
  0x48   :  { %p3477_p4 = scmp.ne.s32.totalorder %s4156_s5, %s3476_s25  ;;  %p3480_p5 = scmp.lt.u32.totalorder %s3476_s25, %s4156_s5 }
  0x4a   :  { %p3482_p6 = pnand %p3480_p5, %p3477_p4 }
  0x4c   :  { %3485 = shalt.err (!%p3482_p6)
}
  0x4d   :  { %s3486_s2 = scalar_lea.vmem %s75_s18, 2048  ;;  %p3491_p8 = scmp.lt.s32.totalorder %s75_s18, %s75_s18 }
  0x4e   :  { %p3487_p7 = scmp.ne.s32.totalorder %s75_s18, %s3486_s2  ;;  %p3492_p9 = scmp.lt.s32.totalorder %s3486_s2, %s3486_s2 }
  0x50   :  { %p3493_p10 = por %p3492_p9, %p3491_p8 }
  0x52   :  { %p3494_p11 = pnand %p3493_p10, %p3487_p7 }
  0x54   :  { %3497 = shalt.err (!%p3494_p11)
}
  0x55   :  { %80 = dma.hbm_to_vmem [thread:$0]  %s4156_s5, 2048, %s75_s18, [#allocation11], %s3554_s21, %s3554_s21, %s3555_s22  }
  0x56   :  { %s3498_s11 = scalar_lea.hbm %s4158_s7, 2048 }
  0x57   :  { %p3499_p12 = scmp.ne.s32.totalorder %s4158_s7, %s3498_s11  ;;  %p3502_p13 = scmp.lt.u32.totalorder %s3498_s11, %s4158_s7 }
  0x59   :  { %p3504_p0 = pnand %p3502_p13, %p3499_p12 }
  0x5b   :  { %3507 = shalt.err (!%p3504_p0)
}
  0x5c   :  { %s3508_s0 = scalar_lea.vmem %s3688_s20, 2048  ;;  %p3513_p2 = scmp.lt.s32.totalorder %s3688_s20, %s3688_s20 }
  0x5d   :  { %p3509_p1 = scmp.ne.s32.totalorder %s3688_s20, %s3508_s0  ;;  %p3514_p3 = scmp.lt.s32.totalorder %s3508_s0, %s3508_s0 }
  0x5f   :  { %p3515_p4 = por %p3514_p3, %p3513_p2 }
  0x61   :  { %p3516_p5 = pnand %p3515_p4, %p3509_p1 }
  0x63   :  { %3519 = shalt.err (!%p3516_p5)
}
  0x64   :  { %94 = dma.hbm_to_vmem [thread:$0]  %s4158_s7, 2048, %s3688_s20, [#allocation14], %s3554_s21, %s3554_s21, %s3555_s22  }
  0x65   :  { %3542 = dma.done.wait [#allocation5], 1024  }
  0x66   :  { %3543 = vsyncadd [#allocation5], 4294966272 }
  0x67   :  { %3544 = dma.done.wait [#allocation8], 4096  }
  0x68   :  { %3545 = vsyncadd [#allocation8], 4294963200 }
  0x69   :  { %3546 = dma.done.wait [#allocation11], 4096  }
  0x6a   :  { %3547 = vsyncadd [#allocation11], 4294963200 }
  0x6b   :  { %3548 = dma.done.wait [#allocation14], 2048  }
  0x6c   :  { %3549 = vsyncadd [#allocation14], 4294965248  ;;  %v3560_v0 = vmov 0.0|0.0   ;;  %vm3561_vm0 = vmmov 0   ;;  %v3562_v1 = vmov 0.0   ;;  %v124_v2 = vld [vmem:[#allocation7] sm:$0xff] }
  0x6d   :  { %2904 = vmatprep.subr.bf16.mxu1 %v3560_v0  ;;  %2265 = vmatprep.mubr.msk.f32.mxu1 %vm3561_vm0, %v3562_v1  ;;  %v125_v3 = vld [vmem:[#allocation7 + $0x8] sm:$0xff]  ;;  %v260_v4 = vld [vmem:[#allocation9] sm:$0xff]  ;;  %v126_v7 = vld [vmem:[#allocation7 + $0x10] sm:$0xff]  ;;  %s3563_s18 = smov [#allocation15]  }
  0x6e   :  { %v2872_v5 = vpack.c.bf16 %v125_v3, %v124_v2  ;;  %v261_v6 = vld [vmem:[#allocation9 + $0x8] sm:$0xff]  ;;  %v127_v8 = vld [vmem:[#allocation7 + $0x18] sm:$0xff]  ;;  %v262_v11 = vld [vmem:[#allocation9 + $0x10] sm:$0xff]  ;;  %s1837_s19 = sshll.u32 %s3563_s18, 4  ;;  %s1838_s19 = int_to_ptr.vmem [resolvable:$true] %s1837_s19 }
  0x6f   :  { %v3728_v9 = vpack.c.bf16 %v261_v6, %v260_v4  ;;  %v2876_v10 = vpack.c.bf16 %v127_v8, %v126_v7  ;;  %v263_v12 = vld [vmem:[#allocation9 + $0x18] sm:$0xff]  ;;  %v128_v13 = vld [vmem:[#allocation7 + $0x20] sm:$0xff]  ;;  %v129_v14 = vld [vmem:[#allocation7 + $0x28] sm:$0xff]  ;;  %s3520_s20 = scalar_lea.vmem %s1838_s19, 128  ;;  %p3525_p7 = scmp.lt.s32.totalorder %s1838_s19, %s1838_s19 }
  0x70   :  { %2873 = vmatprep.subr.bf16.mxu0 %v2872_v5  ;;  %v3731_v15 = vpack.c.bf16 %v263_v12, %v262_v11  ;;  %v2880_v16 = vpack.c.bf16 %v129_v14, %v128_v13  ;;  %v264_v17 = vld [vmem:[#allocation9 + $0x20] sm:$0xff]  ;;  %v265_v18 = vld [vmem:[#allocation9 + $0x28] sm:$0xff]  ;;  %v130_v19 = vld [vmem:[#allocation7 + $0x30] sm:$0xff]  ;;  %p3521_p6 = scmp.ne.s32.totalorder %s1838_s19, %s3520_s20  ;;  %p3526_p8 = scmp.lt.s32.totalorder %s3520_s20, %s3520_s20 }
  0x71   :  { %2875 = vmatpush3.bf16.msra.mxu0 %v2872_v5  ;;  %2906 = vmatpush3.bf16.msra.mxu1 %v3728_v9  ;;  %v131_v20 = vld [vmem:[#allocation7 + $0x38] sm:$0xff]  ;;  %v3735_v21 = vpack.c.bf16 %v265_v18, %v264_v17  ;;  %v266_v23 = vld [vmem:[#allocation9 + $0x30] sm:$0xff]  ;;  %v132_v25 = vld [vmem:[#allocation7 + $0x40] sm:$0xff] }
  0x72   :  { %2877 = vmatprep.subr.bf16.mxu0 %v2876_v10  ;;  %2907 = vmatprep.subr.bf16.mxu1 %v3560_v0  ;;  %v2884_v22 = vpack.c.bf16 %v131_v20, %v130_v19  ;;  %v267_v24 = vld [vmem:[#allocation9 + $0x38] sm:$0xff]  ;;  %v133_v26 = vld [vmem:[#allocation7 + $0x48] sm:$0xff]  ;;  %v116_v27 = vld [vmem:[#allocation4] sm:$0xff]  ;;  %p3527_p9 = por %p3526_p8, %p3525_p7 }
  0x73   :  { %2221 = vmatprep.mubr.f32.mxu0 %v116_v27  ;;  %v3739_v28 = vpack.c.bf16 %v267_v24, %v266_v23  ;;  %v2888_v29 = vpack.c.bf16 %v133_v26, %v132_v25  ;;  %v268_v30 = vld [vmem:[#allocation9 + $0x40] sm:$0xff]  ;;  %v269_v31 = vld [vmem:[#allocation9 + $0x48] sm:$0xff]  ;;  %v134_v32 = vld [vmem:[#allocation7 + $0x50] sm:$0xff] }
  0x74   :  { %v135_v33 = vld [vmem:[#allocation7 + $0x58] sm:$0xff]  ;;  %v3743_v34 = vpack.c.bf16 %v269_v31, %v268_v30  ;;  %v270_v36 = vld [vmem:[#allocation9 + $0x50] sm:$0xff]  ;;  %v136_v38 = vld [vmem:[#allocation7 + $0x60] sm:$0xff]  ;;  %p3528_p10 = pnand %p3527_p9, %p3521_p6 }
  0x75   :  { %2879 = vmatpush3.bf16.msra.mxu0 %v2876_v10  ;;  %2909 = vmatpush3.bf16.msra.mxu1 %v3731_v15  ;;  %v2892_v35 = vpack.c.bf16 %v135_v33, %v134_v32  ;;  %v271_v37 = vld [vmem:[#allocation9 + $0x58] sm:$0xff]  ;;  %v137_v39 = vld [vmem:[#allocation7 + $0x68] sm:$0xff]  ;;  %v272_v42 = vld [vmem:[#allocation9 + $0x60] sm:$0xff] }
  0x76   :  { %2881 = vmatprep.subr.bf16.mxu0 %v2880_v16  ;;  %2910 = vmatprep.subr.bf16.mxu1 %v3560_v0  ;;  %v3747_v40 = vpack.c.bf16 %v271_v37, %v270_v36  ;;  %v2896_v41 = vpack.c.bf16 %v137_v39, %v136_v38  ;;  %v273_v43 = vld [vmem:[#allocation9 + $0x68] sm:$0xff]  ;;  %v138_v44 = vld [vmem:[#allocation7 + $0x70] sm:$0xff]  ;;  %v139_v45 = vld [vmem:[#allocation7 + $0x78] sm:$0xff] }
  0x77   :  { %v3751_v46 = vpack.c.bf16 %v273_v43, %v272_v42  ;;  %v2900_v47 = vpack.c.bf16 %v139_v45, %v138_v44  ;;  %v274_v48 = vld [vmem:[#allocation9 + $0x70] sm:$0xff]  ;;  %v275_v49 = vld [vmem:[#allocation9 + $0x78] sm:$0xff]  ;;  %v117_v51 = vld [vmem:[#allocation4 + $0x8] sm:$0xff] }
  0x78   :  { %v3755_v50 = vpack.c.bf16 %v275_v49, %v274_v48  ;;  %v118_v52 = vld [vmem:[#allocation4 + $0x10] sm:$0xff]  ;;  %v119_v53 = vld [vmem:[#allocation4 + $0x18] sm:$0xff]  ;;  %v120_v54 = vld [vmem:[#allocation4 + $0x20] sm:$0xff] }
  0x79   :  { %2883 = vmatpush3.bf16.msra.mxu0 %v2880_v16  ;;  %2912 = vmatpush3.bf16.msra.mxu1 %v3735_v21  ;;  %v121_v55 = vld [vmem:[#allocation4 + $0x28] sm:$0xff]  ;;  %v122_v56 = vld [vmem:[#allocation4 + $0x30] sm:$0xff]  ;;  %v123_v57 = vld [vmem:[#allocation4 + $0x38] sm:$0xff] }
  0x7a   :  { %2885 = vmatprep.subr.bf16.mxu0 %v2884_v22  ;;  %2913 = vmatprep.subr.bf16.mxu1 %v3560_v0  ;;  %v3801_v58 = vld [vmem:[%s4154_s3] ss:$0 sm:$0xff]  ;;  %v1004_v37 = vld [vmem:[#allocation10 + $0x10] sm:$0xff]  ;;  %v1005_v38 = vld [vmem:[#allocation10 + $0x18] sm:$0xff] }
  0x7b   :  { %v3100_v39 = vpack.c.bf16 %v1005_v38, %v1004_v37  ;;  %v1007_v42 = vld [vmem:[#allocation10 + $0x28] sm:$0xff]  ;;  %v1008_v44 = vld [vmem:[#allocation10 + $0x30] sm:$0xff]  ;;  %v1009_v45 = vld [vmem:[#allocation10 + $0x38] sm:$0xff] }
  0x7c   :  { %v1011_v48 = vld [vmem:[#allocation10 + $0x48] sm:$0xff] }
  0x7d   :  { %2887 = vmatpush3.bf16.msra.mxu0 %v2884_v22  ;;  %2915 = vmatpush3.bf16.msra.mxu1 %v3739_v28 }
  0x7e   :  { %2889 = vmatprep.subr.bf16.mxu0 %v2888_v29  ;;  %2916 = vmatprep.subr.bf16.mxu1 %v3560_v0 }
  0x81   :  { %2891 = vmatpush3.bf16.msra.mxu0 %v2888_v29  ;;  %2918 = vmatpush3.bf16.msra.mxu1 %v3743_v34 }
  0x82   :  { %2893 = vmatprep.subr.bf16.mxu0 %v2892_v35  ;;  %2919 = vmatprep.subr.bf16.mxu1 %v3560_v0 }
  0x85   :  { %2895 = vmatpush3.bf16.msra.mxu0 %v2892_v35  ;;  %2921 = vmatpush3.bf16.msra.mxu1 %v3747_v40 }
  0x86   :  { %2897 = vmatprep.subr.bf16.mxu0 %v2896_v41  ;;  %2922 = vmatprep.subr.bf16.mxu1 %v3560_v0 }
  0x89   :  { %2899 = vmatpush3.bf16.msra.mxu0 %v2896_v41  ;;  %2924 = vmatpush3.bf16.msra.mxu1 %v3751_v46  ;;  %v1006_v41 = vld [vmem:[#allocation10 + $0x20] sm:$0xff] }
  0x8a   :  { %2901 = vmatprep.subr.bf16.mxu0 %v2900_v47  ;;  %2925 = vmatprep.subr.bf16.mxu1 %v3560_v0  ;;  %v3104_v43 = vpack.c.bf16 %v1007_v42, %v1006_v41 }
  0x8d   :  { %2903 = vmatpush3.bf16.msra.mxu0 %v2900_v47  ;;  %2927 = vmatpush3.bf16.msra.mxu1 %v3755_v50  ;;  %v1010_v47 = vld [vmem:[#allocation10 + $0x40] sm:$0xff] }
  0x8e   :  { %2928 = vmatprep.subr.bf16.mxu0 %v3560_v0  ;;  %2952 = vmatprep.subr.bf16.mxu1 %v3560_v0  ;;  %v3112_v49 = vpack.c.bf16 %v1011_v48, %v1010_v47 }
  0x90   :  { %2222 = vmatmul.mubr.f32.vlgmr.msra.gmra.mrb[0].mxu0 %v117_v51  ;;  %2266 = vmatmul.mubr.f32.vlgmr.msra.gmra.mrb[0].mxu1 %v3562_v1  ;;  %v1013_v51 = vld [vmem:[#allocation10 + $0x58] sm:$0xff] }
  0x91   :  { %2930 = vmatpush3.bf16.msra.mxu0 %v3728_v9  ;;  %2954 = vmatpush3.bf16.msra.mxu1 %v3728_v9 }
  0x92   :  { %2931 = vmatprep.subr.bf16.mxu0 %v3560_v0  ;;  %2955 = vmatprep.subr.bf16.mxu1 %v3560_v0 }
  0x93   :  { %2335 = vmatprep.mubr.msk.f32.mxu1 %vm3561_vm0, %v3562_v1  ;;  %2224 = vmatprep.mubr.f32.mxu0 %v118_v52 }
  0x94   :  { %2225 = vmatmul.mubr.f32.gmra.mrb[2].mxu0 %v119_v53  ;;  %v1014_v53 = vld [vmem:[#allocation10 + $0x60] sm:$0xff] }
  0x95   :  { %2933 = vmatpush3.bf16.msra.mxu0 %v3731_v15  ;;  %2957 = vmatpush3.bf16.msra.mxu1 %v3731_v15 }
  0x96   :  { %2934 = vmatprep.subr.bf16.mxu0 %v3560_v0  ;;  %2958 = vmatprep.subr.bf16.mxu1 %v3560_v0 }
  0x97   :  { %2227 = vmatprep.mubr.f32.mxu0 %v120_v54  ;;  %v1015_v54 = vld [vmem:[#allocation10 + $0x68] sm:$0xff] }
  0x98   :  { %2228 = vmatmul.mubr.f32.gmra.mrb[4].mxu0 %v121_v55  ;;  %v3120_v55 = vpack.c.bf16 %v1015_v54, %v1014_v53 }
  0x99   :  { %2936 = vmatpush3.bf16.msra.mxu0 %v3735_v21  ;;  %2960 = vmatpush3.bf16.msra.mxu1 %v3735_v21 }
  0x9a   :  { %2937 = vmatprep.subr.bf16.mxu0 %v3560_v0  ;;  %2961 = vmatprep.subr.bf16.mxu1 %v3560_v0 }
  0x9b   :  { %2230 = vmatprep.mubr.f32.mxu0 %v122_v56  ;;  %v1016_v56 = vld [vmem:[#allocation10 + $0x70] sm:$0xff] }
  0x9c   :  { %2231 = vmatmul.mubr.f32.gmra.mrb[6].mxu0 %v123_v57  ;;  %v1017_v57 = vld [vmem:[#allocation10 + $0x78] sm:$0xff] }
  0x9d   :  { %2939 = vmatpush3.bf16.msra.mxu0 %v3739_v28  ;;  %2963 = vmatpush3.bf16.msra.mxu1 %v3739_v28 }
  0x9e   :  { %2940 = vmatprep.subr.bf16.mxu0 %v3560_v0  ;;  %2964 = vmatprep.subr.bf16.mxu1 %v3560_v0 }
  0x9f   :  { %2300 = vmatprep.mubr.msk.f32.mxu0 %vm3561_vm0, %v3562_v1 }
  0xa1   :  { %2942 = vmatpush3.bf16.msra.mxu0 %v3743_v34  ;;  %2966 = vmatpush3.bf16.msra.mxu1 %v3743_v34 }
  0xa2   :  { %2943 = vmatprep.subr.bf16.mxu0 %v3560_v0  ;;  %2967 = vmatprep.subr.bf16.mxu1 %v3560_v0 }
  0xa5   :  { %2945 = vmatpush3.bf16.msra.mxu0 %v3747_v40  ;;  %2969 = vmatpush3.bf16.msra.mxu1 %v3747_v40 }
  0xa6   :  { %2946 = vmatprep.subr.bf16.mxu0 %v3560_v0  ;;  %2970 = vmatprep.subr.bf16.mxu1 %v3560_v0 }
  0xa9   :  { %2948 = vmatpush3.bf16.msra.mxu0 %v3751_v46  ;;  %2972 = vmatpush3.bf16.msra.mxu1 %v3751_v46 }
  0xaa   :  { %2949 = vmatprep.subr.bf16.mxu0 %v3560_v0  ;;  %2973 = vmatprep.subr.bf16.mxu1 %v3560_v0 }
  0xad   :  { %2951 = vmatpush3.bf16.msra.mxu0 %v3755_v50  ;;  %2975 = vmatpush3.bf16.msra.mxu1 %v3755_v50 }
  0xae   :  { %2976 = vmatprep.subr.bf16.mxu0 %v3560_v0  ;;  %3000 = vmatprep.subr.bf16.mxu1 %v3560_v0 }
 0x163   :  { %v2223_v59 = vpop.f32.mrb[0].mxu0  ;;  %v342_v60 = vpop.f32.mrb[0].mxu1 }
 0x164   :  { %v212_v61 = vpop.f32.mrb[1].mxu0  ;;  %v2267_v62 = vpop.f32.mrb[1].mxu1  ;;  %v218_v11 = vadd.f32 %v2223_v59, %v3801_v58  ;;  %v3124_v59 = vpack.c.bf16 %v1017_v57, %v1016_v56 }
 0x165   :  { %v213_v63 = vadd.f32 %v3801_v58, %v212_v61  ;;  %v1139_v61 = vld [vmem:[#allocation12 + $0x8] sm:$0xff] }
 0x167   :  { %v346_v2 = vadd.f32 %v342_v60, %v213_v63  ;;  %v2226_v4 = vpop.f32.mrb[2].mxu0  ;;  %v1138_v60 = vld [vmem:[#allocation12] sm:$0xff]  ;;  %v1140_v63 = vld [vmem:[#allocation12 + $0x10] sm:$0xff] }
 0x168   :  { %v222_v5 = vpop.f32.mrb[3].mxu0  ;;  %v228_v23 = vadd.f32 %v2226_v4, %v3801_v58  ;;  %v3929_v62 = vpack.c.bf16 %v1139_v61, %v1138_v60  ;;  %v1142_v4 = vld [vmem:[#allocation12 + $0x20] sm:$0xff] }
 0x169   :  { %3356 = vtanh.f32 %v346_v2  ;;  %v223_v17 = vadd.f32 %v3801_v58, %v222_v5  ;;  %v1141_v2 = vld [vmem:[#allocation12 + $0x18] sm:$0xff]  ;;  %v1143_v5 = vld [vmem:[#allocation12 + $0x28] sm:$0xff] }
 0x16b   :  { %v3825_v6 = vpop.f32.mrb[4].mxu0 }
 0x16c   :  { %v3827_v7 = vpop.f32.mrb[5].mxu0 }
 0x16d   :  { %v233_v29 = vadd.f32 %v3801_v58, %v3827_v7  ;;  %v1144_v7 = vld [vmem:[#allocation12 + $0x30] sm:$0xff] }
 0x16f   :  { %v3829_v8 = vpop.f32.mrb[6].mxu0 }
 0x170   :  { %v3831_v10 = vpop.f32.mrb[7].mxu0 }
 0x173   :  { %v3804_v3 = vpop.eup %3356 }
 0x174   :  { %2301 = vmatmul.mubr.f32.vlgmr.msra.gmra.mrb[8].mxu0 %v3804_v3 }
 0x175   :  { %2978 = vmatpush3.bf16.msra.mxu0 %v3728_v9  ;;  %2370 = vmatprep.mubr.msk.f32.mxu0 %vm3561_vm0, %v3562_v1 }
 0x176   :  { %2979 = vmatprep.subr.bf16.mxu0 %v3560_v0 }
 0x179   :  { %2981 = vmatpush3.bf16.msra.mxu0 %v3731_v15 }
 0x17a   :  { %2982 = vmatprep.subr.bf16.mxu0 %v3560_v0 }
 0x17d   :  { %2984 = vmatpush3.bf16.msra.mxu0 %v3735_v21 }
 0x17e   :  { %2985 = vmatprep.subr.bf16.mxu0 %v3560_v0 }
 0x181   :  { %2987 = vmatpush3.bf16.msra.mxu0 %v3739_v28 }
 0x182   :  { %2988 = vmatprep.subr.bf16.mxu0 %v3560_v0 }
 0x185   :  { %2990 = vmatpush3.bf16.msra.mxu0 %v3743_v34 }
 0x186   :  { %2991 = vmatprep.subr.bf16.mxu0 %v3560_v0 }
 0x189   :  { %2993 = vmatpush3.bf16.msra.mxu0 %v3747_v40 }
 0x18a   :  { %2994 = vmatprep.subr.bf16.mxu0 %v3560_v0 }
 0x18d   :  { %2996 = vmatpush3.bf16.msra.mxu0 %v3751_v46 }
 0x18e   :  { %2997 = vmatprep.subr.bf16.mxu0 %v3560_v0 }
 0x191   :  { %2999 = vmatpush3.bf16.msra.mxu0 %v3755_v50 }
 0x192   :  { %3024 = vmatprep.subr.bf16.mxu0 %v3560_v0 }
 0x247   :  { %v433_v12 = vpop.f32.mrb[8].mxu0 }
 0x248   :  { %v437_v13 = vadd.f32 %v433_v12, %v218_v11  ;;  %v2302_v14 = vpop.f32.mrb[9].mxu0  ;;  %v1145_v11 = vld [vmem:[#allocation12 + $0x38] sm:$0xff] }
 0x249   :  { %v3941_v12 = vpack.c.bf16 %v1145_v11, %v1144_v7  ;;  %v1147_v14 = vld [vmem:[#allocation12 + $0x48] sm:$0xff] }
 0x24a   :  { %3358 = vtanh.f32 %v437_v13  ;;  %v1146_v13 = vld [vmem:[#allocation12 + $0x40] sm:$0xff] }
 0x254   :  { %v3834_v16 = vpop.eup %3358 }
 0x255   :  { %2336 = vmatmul.mubr.f32.vlgmr.msra.gmra.mrb[2].mxu1 %v3834_v16 }
 0x256   :  { %3002 = vmatpush3.bf16.msra.mxu1 %v3728_v9  ;;  %2405 = vmatprep.mubr.msk.f32.mxu1 %vm3561_vm0, %v3562_v1 }
 0x257   :  { %3003 = vmatprep.subr.bf16.mxu1 %v3560_v0 }
 0x25a   :  { %3005 = vmatpush3.bf16.msra.mxu1 %v3731_v15 }
 0x25b   :  { %3006 = vmatprep.subr.bf16.mxu1 %v3560_v0 }
 0x25e   :  { %3008 = vmatpush3.bf16.msra.mxu1 %v3735_v21 }
 0x25f   :  { %3009 = vmatprep.subr.bf16.mxu1 %v3560_v0 }
 0x262   :  { %3011 = vmatpush3.bf16.msra.mxu1 %v3739_v28 }
 0x263   :  { %3012 = vmatprep.subr.bf16.mxu1 %v3560_v0 }
 0x266   :  { %3014 = vmatpush3.bf16.msra.mxu1 %v3743_v34 }
 0x267   :  { %3015 = vmatprep.subr.bf16.mxu1 %v3560_v0 }
 0x26a   :  { %3017 = vmatpush3.bf16.msra.mxu1 %v3747_v40 }
 0x26b   :  { %3018 = vmatprep.subr.bf16.mxu1 %v3560_v0 }
 0x26e   :  { %3020 = vmatpush3.bf16.msra.mxu1 %v3751_v46 }
 0x26f   :  { %3021 = vmatprep.subr.bf16.mxu1 %v3560_v0 }
 0x272   :  { %3023 = vmatpush3.bf16.msra.mxu1 %v3755_v50 }
 0x273   :  { %3048 = vmatprep.subr.bf16.mxu1 %v3560_v0 }
 0x328   :  { %v525_v18 = vpop.f32.mrb[2].mxu1 }
 0x329   :  { %v529_v19 = vadd.f32 %v525_v18, %v223_v17  ;;  %v2337_v20 = vpop.f32.mrb[3].mxu1  ;;  %v1148_v17 = vld [vmem:[#allocation12 + $0x50] sm:$0xff]  ;;  %v1149_v18 = vld [vmem:[#allocation12 + $0x58] sm:$0xff] }
 0x32a   :  { %v1150_v20 = vld [vmem:[#allocation12 + $0x60] sm:$0xff] }
 0x32b   :  { %3360 = vtanh.f32 %v529_v19  ;;  %v3949_v19 = vpack.c.bf16 %v1149_v18, %v1148_v17  ;;  %v1740_v17 = vld [vmem:[#allocation13 + $0x18] sm:$0xff] }
 0x335   :  { %v3856_v22 = vpop.eup %3360 }
 0x336   :  { %2371 = vmatmul.mubr.f32.vlgmr.msra.gmra.mrb[10].mxu0 %v3856_v22 }
 0x337   :  { %3026 = vmatpush3.bf16.msra.mxu0 %v3728_v9  ;;  %2440 = vmatprep.mubr.msk.f32.mxu0 %vm3561_vm0, %v3562_v1 }
 0x338   :  { %3027 = vmatprep.subr.bf16.mxu0 %v3560_v0 }
 0x33b   :  { %3029 = vmatpush3.bf16.msra.mxu0 %v3731_v15 }
 0x33c   :  { %3030 = vmatprep.subr.bf16.mxu0 %v3560_v0 }
 0x33f   :  { %3032 = vmatpush3.bf16.msra.mxu0 %v3735_v21 }
 0x340   :  { %3033 = vmatprep.subr.bf16.mxu0 %v3560_v0 }
 0x343   :  { %3035 = vmatpush3.bf16.msra.mxu0 %v3739_v28 }
 0x344   :  { %3036 = vmatprep.subr.bf16.mxu0 %v3560_v0 }
 0x347   :  { %3038 = vmatpush3.bf16.msra.mxu0 %v3743_v34 }
 0x348   :  { %3039 = vmatprep.subr.bf16.mxu0 %v3560_v0 }
 0x34b   :  { %3041 = vmatpush3.bf16.msra.mxu0 %v3747_v40 }
 0x34c   :  { %3042 = vmatprep.subr.bf16.mxu0 %v3560_v0 }
 0x34f   :  { %3044 = vmatpush3.bf16.msra.mxu0 %v3751_v46 }
 0x350   :  { %3045 = vmatprep.subr.bf16.mxu0 %v3560_v0 }
 0x353   :  { %3047 = vmatpush3.bf16.msra.mxu0 %v3755_v50 }
 0x354   :  { %3072 = vmatprep.subr.bf16.mxu0 %v3560_v0 }
 0x409   :  { %v617_v24 = vpop.f32.mrb[10].mxu0 }
 0x40a   :  { %v621_v25 = vadd.f32 %v617_v24, %v228_v23  ;;  %v2372_v26 = vpop.f32.mrb[11].mxu0  ;;  %v1152_v24 = vld [vmem:[#allocation12 + $0x70] sm:$0xff] }
 0x40c   :  { %3362 = vtanh.f32 %v621_v25  ;;  %v1153_v25 = vld [vmem:[#allocation12 + $0x78] sm:$0xff] }
 0x40d   :  { %v3957_v26 = vpack.c.bf16 %v1153_v25, %v1152_v24  ;;  %v1744_v24 = vld [vmem:[#allocation13 + $0x38] sm:$0xff] }
 0x416   :  { %v3878_v27 = vpop.eup %3362 }
 0x417   :  { %2406 = vmatmul.mubr.f32.vlgmr.msra.gmra.mrb[4].mxu1 %v3878_v27 }
 0x418   :  { %3050 = vmatpush3.bf16.msra.mxu1 %v3728_v9  ;;  %2475 = vmatprep.mubr.msk.f32.mxu1 %vm3561_vm0, %v3562_v1 }
 0x419   :  { %3051 = vmatprep.subr.bf16.mxu1 %v3560_v0 }
 0x41c   :  { %3053 = vmatpush3.bf16.msra.mxu1 %v3731_v15 }
 0x41d   :  { %3054 = vmatprep.subr.bf16.mxu1 %v3560_v0 }
 0x420   :  { %3056 = vmatpush3.bf16.msra.mxu1 %v3735_v21 }
 0x421   :  { %3057 = vmatprep.subr.bf16.mxu1 %v3560_v0 }
 0x424   :  { %3059 = vmatpush3.bf16.msra.mxu1 %v3739_v28 }
 0x425   :  { %3060 = vmatprep.subr.bf16.mxu1 %v3560_v0 }
 0x428   :  { %3062 = vmatpush3.bf16.msra.mxu1 %v3743_v34 }
 0x429   :  { %3063 = vmatprep.subr.bf16.mxu1 %v3560_v0 }
 0x42c   :  { %3065 = vmatpush3.bf16.msra.mxu1 %v3747_v40 }
 0x42d   :  { %3066 = vmatprep.subr.bf16.mxu1 %v3560_v0 }
 0x430   :  { %3068 = vmatpush3.bf16.msra.mxu1 %v3751_v46 }
 0x431   :  { %3069 = vmatprep.subr.bf16.mxu1 %v3560_v0 }
 0x434   :  { %3071 = vmatpush3.bf16.msra.mxu1 %v3755_v50 }
 0x4ea   :  { %v709_v30 = vpop.f32.mrb[4].mxu1 }
 0x4eb   :  { %v713_v31 = vadd.f32 %v709_v30, %v233_v29  ;;  %v2407_v32 = vpop.f32.mrb[5].mxu1 }
 0x4ed   :  { %3364 = vtanh.f32 %v713_v31 }
 0x4f7   :  { %v3900_v33 = vpop.eup %3364 }
 0x4f8   :  { %2441 = vmatmul.mubr.f32.vlgmr.msra.gmra.mrb[12].mxu0 %v3900_v33 }
 0x4f9   :  { %3074 = vmatpush3.bf16.msra.mxu0 %v3728_v9  ;;  %2510 = vmatprep.mubr.msk.f32.mxu0 %vm3561_vm0, %v3562_v1  ;;  %v1002_v9 = vld [vmem:[#allocation10] sm:$0xff] }
 0x4fa   :  { %3075 = vmatprep.subr.bf16.mxu0 %v3560_v0 }
 0x4fd   :  { %3077 = vmatpush3.bf16.msra.mxu0 %v3731_v15  ;;  %v1003_v15 = vld [vmem:[#allocation10 + $0x8] sm:$0xff] }
 0x4fe   :  { %3078 = vmatprep.subr.bf16.mxu0 %v3560_v0 }
 0x501   :  { %3080 = vmatpush3.bf16.msra.mxu0 %v3735_v21  ;;  %v3096_v21 = vpack.c.bf16 %v1003_v15, %v1002_v9 }
 0x502   :  { %3081 = vmatprep.subr.bf16.mxu0 %v3560_v0 }
 0x503   :  { %3097 = vmatprep.subr.bf16.mxu1 %v3096_v21 }
 0x505   :  { %3083 = vmatpush3.bf16.msra.mxu0 %v3739_v28  ;;  %v238_v28 = vadd.f32 %v3825_v6, %v3801_v58  ;;  %v3937_v6 = vpack.c.bf16 %v1143_v5, %v1142_v4 }
 0x506   :  { %3084 = vmatprep.subr.bf16.mxu0 %v3560_v0 }
 0x509   :  { %3086 = vmatpush3.bf16.msra.mxu0 %v3743_v34 }
 0x50a   :  { %3087 = vmatprep.subr.bf16.mxu0 %v3560_v0 }
 0x50d   :  { %3089 = vmatpush3.bf16.msra.mxu0 %v3747_v40 }
 0x50e   :  { %3090 = vmatprep.subr.bf16.mxu0 %v3560_v0 }
 0x511   :  { %3092 = vmatpush3.bf16.msra.mxu0 %v3751_v46  ;;  %v3108_v46 = vpack.c.bf16 %v1009_v45, %v1008_v44 }
 0x512   :  { %3093 = vmatprep.subr.bf16.mxu0 %v3560_v0 }
 0x515   :  { %3095 = vmatpush3.bf16.msra.mxu0 %v3755_v50  ;;  %v1012_v50 = vld [vmem:[#allocation10 + $0x50] sm:$0xff] }
 0x516   :  { %3128 = vmatprep.subr.bf16.mxu0 %v3560_v0  ;;  %v3116_v52 = vpack.c.bf16 %v1013_v51, %v1012_v50 }
 0x5cb   :  { %v801_v34 = vpop.f32.mrb[12].mxu0 }
 0x5cc   :  { %v805_v35 = vadd.f32 %v801_v34, %v238_v28  ;;  %v2442_v36 = vpop.f32.mrb[13].mxu0  ;;  %v248_v34 = vadd.f32 %v3829_v8, %v3801_v58 }
 0x5ce   :  { %3366 = vtanh.f32 %v805_v35 }
 0x5d8   :  { %v3367_v40 = vpop.eup %3366 }
 0x5d9   :  { %2476 = vmatmul.mubr.f32.vlgmr.msra.gmra.mrb[6].mxu1 %v3367_v40 }
 0x5da   :  { %3099 = vmatpush3.bf16.msra.mxu1 %v3096_v21  ;;  %2545 = vmatprep.mubr.f32.mxu1 %v3804_v3  ;;  %v3933_v3 = vpack.c.bf16 %v1141_v2, %v1140_v63 }
 0x5db   :  { %3101 = vmatprep.subr.bf16.mxu1 %v3100_v39 }
 0x5de   :  { %3103 = vmatpush3.bf16.msra.mxu1 %v3100_v39  ;;  %v4017_v39 = vld [vmem:[%s4157_s6] ss:$0 sm:$0xff] }
 0x5df   :  { %3105 = vmatprep.subr.bf16.mxu1 %v3104_v43 }
 0x5e2   :  { %3107 = vmatpush3.bf16.msra.mxu1 %v3104_v43 }
 0x5e3   :  { %3109 = vmatprep.subr.bf16.mxu1 %v3108_v46 }
 0x5e6   :  { %3111 = vmatpush3.bf16.msra.mxu1 %v3108_v46 }
 0x5e7   :  { %3113 = vmatprep.subr.bf16.mxu1 %v3112_v49 }
 0x5ea   :  { %3115 = vmatpush3.bf16.msra.mxu1 %v3112_v49 }
 0x5eb   :  { %3117 = vmatprep.subr.bf16.mxu1 %v3116_v52 }
 0x5ee   :  { %3119 = vmatpush3.bf16.msra.mxu1 %v3116_v52 }
 0x5ef   :  { %3121 = vmatprep.subr.bf16.mxu1 %v3120_v55 }
 0x5f2   :  { %3123 = vmatpush3.bf16.msra.mxu1 %v3120_v55 }
 0x5f3   :  { %3125 = vmatprep.subr.bf16.mxu1 %v3124_v59 }
 0x5f6   :  { %3127 = vmatpush3.bf16.msra.mxu1 %v3124_v59 }
 0x5f7   :  { %3152 = vmatprep.subr.bf16.mxu1 %v3560_v0 }
 0x5f9   :  { %2546 = vmatmul.mubr.f32.vlgmr.msra.gmra.mrb[8].mxu1 %v3834_v16  ;;  %v3945_v16 = vpack.c.bf16 %v1147_v14, %v1146_v13  ;;  %v1738_v13 = vld [vmem:[#allocation13 + $0x8] sm:$0xff]  ;;  %v1739_v14 = vld [vmem:[#allocation13 + $0x10] sm:$0xff] }
 0x5fa   :  { %2548 = vmatprep.mubr.f32.mxu1 %v3856_v22  ;;  %3154 = vmatpush3.bf16.msra.mxu1 %v3929_v62  ;;  %v1151_v22 = vld [vmem:[#allocation12 + $0x68] sm:$0xff]  ;;  %v3324_v18 = vpack.c.bf16 %v1740_v17, %v1739_v14 }
 0x5fb   :  { %3155 = vmatprep.subr.bf16.mxu1 %v3560_v0  ;;  %v3953_v23 = vpack.c.bf16 %v1151_v22, %v1150_v20  ;;  %v1742_v20 = vld [vmem:[#allocation13 + $0x28] sm:$0xff] }
 0x5fd   :  { %2549 = vmatmul.mubr.f32.gmra.mrb[10].mxu1 %v3878_v27  ;;  %v243_v27 = vadd.f32 %v3801_v58, %v3831_v10 }
 0x5fe   :  { %2551 = vmatprep.mubr.f32.mxu1 %v3900_v33  ;;  %3157 = vmatpush3.bf16.msra.mxu1 %v3933_v3 }
 0x5ff   :  { %3158 = vmatprep.subr.bf16.mxu1 %v3560_v0 }
 0x601   :  { %2552 = vmatmul.mubr.f32.gmra.mrb[12].mxu1 %v3367_v40 }
 0x602   :  { %3160 = vmatpush3.bf16.msra.mxu1 %v3937_v6 }
 0x603   :  { %3161 = vmatprep.subr.bf16.mxu1 %v3560_v0 }
 0x606   :  { %3163 = vmatpush3.bf16.msra.mxu1 %v3941_v12 }
 0x607   :  { %3164 = vmatprep.subr.bf16.mxu1 %v3560_v0 }
 0x60a   :  { %3166 = vmatpush3.bf16.msra.mxu1 %v3945_v16 }
 0x60b   :  { %3167 = vmatprep.subr.bf16.mxu1 %v3560_v0 }
 0x60e   :  { %3169 = vmatpush3.bf16.msra.mxu1 %v3949_v19 }
 0x60f   :  { %3170 = vmatprep.subr.bf16.mxu1 %v3560_v0 }
 0x612   :  { %3172 = vmatpush3.bf16.msra.mxu1 %v3953_v23 }
 0x613   :  { %3173 = vmatprep.subr.bf16.mxu1 %v3560_v0 }
 0x616   :  { %3175 = vmatpush3.bf16.msra.mxu1 %v3957_v26 }
 0x617   :  { %3200 = vmatprep.subr.bf16.mxu1 %v3560_v0 }
 0x6ac   :  { %v893_v29 = vpop.f32.mrb[6].mxu1 }
 0x6ad   :  { %v897_v30 = vadd.f32 %v893_v29, %v243_v27  ;;  %v2477_v31 = vpop.f32.mrb[7].mxu1 }
 0x6af   :  { %3368 = vtanh.f32 %v897_v30 }
 0x6b9   :  { %v3369_v32 = vpop.eup %3368 }
 0x6ba   :  { %2511 = vmatmul.mubr.f32.vlgmr.msra.gmra.mrb[14].mxu0 %v3369_v32  ;;  %2554 = vmatprep.mubr.f32.mxu1 %v3369_v32 }
 0x6bb   :  { %3130 = vmatpush3.bf16.msra.mxu0 %v3929_v62  ;;  %2589 = vmatprep.mubr.msk.f32.mxu0 %vm3561_vm0, %v3562_v1 }
 0x6bc   :  { %3131 = vmatprep.subr.bf16.mxu0 %v3560_v0 }
 0x6bf   :  { %3133 = vmatpush3.bf16.msra.mxu0 %v3933_v3 }
 0x6c0   :  { %3134 = vmatprep.subr.bf16.mxu0 %v3560_v0 }
 0x6c3   :  { %3136 = vmatpush3.bf16.msra.mxu0 %v3937_v6 }
 0x6c4   :  { %3137 = vmatprep.subr.bf16.mxu0 %v3560_v0 }
 0x6c7   :  { %3139 = vmatpush3.bf16.msra.mxu0 %v3941_v12 }
 0x6c8   :  { %3140 = vmatprep.subr.bf16.mxu0 %v3560_v0 }
 0x6cb   :  { %3142 = vmatpush3.bf16.msra.mxu0 %v3945_v16 }
 0x6cc   :  { %v3974_v10 = vpop.f32.mrb[8].mxu1  ;;  %3143 = vmatprep.subr.bf16.mxu0 %v3560_v0 }
 0x6cd   :  { %v1090_v33 = vpop.f32.mrb[9].mxu1  ;;  %v1096_v45 = vadd.f32 %v3974_v10, %v4017_v39 }
 0x6ce   :  { %v1091_v40 = vadd.f32 %v4017_v39, %v1090_v33  ;;  %v1747_v33 = vld [vmem:[#allocation13 + $0x50] sm:$0xff] }
 0x6cf   :  { %3145 = vmatpush3.bf16.msra.mxu0 %v3949_v19 }
 0x6d0   :  { %v3978_v9 = vpop.f32.mrb[10].mxu1  ;;  %3146 = vmatprep.subr.bf16.mxu0 %v3560_v0 }
 0x6d1   :  { %v3981_v15 = vpop.f32.mrb[11].mxu1  ;;  %v1106_v55 = vadd.f32 %v3978_v9, %v4017_v39  ;;  %v1748_v9 = vld [vmem:[#allocation13 + $0x58] sm:$0xff] }
 0x6d2   :  { %v1101_v50 = vadd.f32 %v4017_v39, %v3981_v15  ;;  %v3336_v15 = vpack.c.bf16 %v1748_v9, %v1747_v33 }
 0x6d3   :  { %3148 = vmatpush3.bf16.msra.mxu0 %v3953_v23 }
 0x6d4   :  { %v3984_v21 = vpop.f32.mrb[12].mxu1  ;;  %3149 = vmatprep.subr.bf16.mxu0 %v3560_v0 }
 0x6d5   :  { %v3987_v28 = vpop.f32.mrb[13].mxu1 }
 0x6d6   :  { %v1111_v61 = vadd.f32 %v4017_v39, %v3987_v28  ;;  %v1750_v28 = vld [vmem:[#allocation13 + $0x68] sm:$0xff] }
 0x6d7   :  { %3151 = vmatpush3.bf16.msra.mxu0 %v3957_v26 }
 0x6d8   :  { %3176 = vmatprep.subr.bf16.mxu0 %v3560_v0 }
 0x6da   :  { %2590 = vmatmul.mubr.f32.vlgmr.msra.gmra.mrb[16].mxu0 %v3562_v1 }
 0x6db   :  { %3178 = vmatpush3.bf16.msra.mxu0 %v3929_v62  ;;  %2659 = vmatprep.mubr.msk.f32.mxu0 %vm3561_vm0, %v3562_v1 }
 0x6dc   :  { %3179 = vmatprep.subr.bf16.mxu0 %v3560_v0 }
 0x6df   :  { %3181 = vmatpush3.bf16.msra.mxu0 %v3933_v3 }
 0x6e0   :  { %3182 = vmatprep.subr.bf16.mxu0 %v3560_v0 }
 0x6e3   :  { %3184 = vmatpush3.bf16.msra.mxu0 %v3937_v6 }
 0x6e4   :  { %3185 = vmatprep.subr.bf16.mxu0 %v3560_v0 }
 0x6e7   :  { %3187 = vmatpush3.bf16.msra.mxu0 %v3941_v12 }
 0x6e8   :  { %3188 = vmatprep.subr.bf16.mxu0 %v3560_v0 }
 0x6eb   :  { %3190 = vmatpush3.bf16.msra.mxu0 %v3945_v16 }
 0x6ec   :  { %3191 = vmatprep.subr.bf16.mxu0 %v3560_v0 }
 0x6ef   :  { %3193 = vmatpush3.bf16.msra.mxu0 %v3949_v19 }
 0x6f0   :  { %3194 = vmatprep.subr.bf16.mxu0 %v3560_v0 }
 0x6f3   :  { %3196 = vmatpush3.bf16.msra.mxu0 %v3953_v23 }
 0x6f4   :  { %3197 = vmatprep.subr.bf16.mxu0 %v3560_v0 }
 0x6f7   :  { %3199 = vmatpush3.bf16.msra.mxu0 %v3957_v26 }
 0x6f8   :  { %3224 = vmatprep.subr.bf16.mxu0 %v3560_v0 }
 0x78d   :  { %v985_v35 = vpop.f32.mrb[14].mxu0 }
 0x78e   :  { %v989_v36 = vadd.f32 %v985_v35, %v248_v34  ;;  %v2512_v37 = vpop.f32.mrb[15].mxu0  ;;  %v1751_v35 = vld [vmem:[#allocation13 + $0x70] sm:$0xff] }
 0x790   :  { %3370 = vtanh.f32 %v989_v36  ;;  %v1752_v36 = vld [vmem:[#allocation13 + $0x78] sm:$0xff] }
 0x791   :  { %v3342_v37 = vpack.c.bf16 %v1752_v36, %v1751_v35 }
 0x79a   :  { %v3371_v38 = vpop.eup %3370 }
 0x79b   :  { %2555 = vmatmul.mubr.f32.gmra.mrb[14].mxu1 %v3371_v38 }
 0x79c   :  { %2624 = vmatprep.mubr.msk.f32.mxu1 %vm3561_vm0, %v3562_v1 }
 0x7ad   :  { %v1220_v41 = vpop.f32.mrb[16].mxu0 }
 0x7ae   :  { %v1224_v42 = vadd.f32 %v1220_v41, %v1091_v40  ;;  %v2591_v43 = vpop.f32.mrb[17].mxu0 }
 0x7b0   :  { %3372 = vtanh.f32 %v1224_v42 }
 0x7ba   :  { %v3373_v58 = vpop.eup %3372 }
 0x7bb   :  { %2625 = vmatmul.mubr.f32.vlgmr.msra.gmra.mrb[16].mxu1 %v3373_v58  ;;  %v1851_v58 = vld [vmem:[%s4159_s8] ss:$0 sm:$0xff] }
 0x7bc   :  { %3202 = vmatpush3.bf16.msra.mxu1 %v3929_v62  ;;  %2694 = vmatprep.mubr.msk.f32.mxu1 %vm3561_vm0, %v3562_v1 }
 0x7bd   :  { %3203 = vmatprep.subr.bf16.mxu1 %v3560_v0 }
 0x7c0   :  { %3205 = vmatpush3.bf16.msra.mxu1 %v3933_v3 }
 0x7c1   :  { %3206 = vmatprep.subr.bf16.mxu1 %v3560_v0 }
 0x7c4   :  { %3208 = vmatpush3.bf16.msra.mxu1 %v3937_v6 }
 0x7c5   :  { %3209 = vmatprep.subr.bf16.mxu1 %v3560_v0 }
 0x7c8   :  { %3211 = vmatpush3.bf16.msra.mxu1 %v3941_v12 }
 0x7c9   :  { %3212 = vmatprep.subr.bf16.mxu1 %v3560_v0 }
 0x7cc   :  { %3214 = vmatpush3.bf16.msra.mxu1 %v3945_v16 }
 0x7cd   :  { %3215 = vmatprep.subr.bf16.mxu1 %v3560_v0 }
 0x7d0   :  { %3217 = vmatpush3.bf16.msra.mxu1 %v3949_v19 }
 0x7d1   :  { %3218 = vmatprep.subr.bf16.mxu1 %v3560_v0 }
 0x7d4   :  { %3220 = vmatpush3.bf16.msra.mxu1 %v3953_v23 }
 0x7d5   :  { %3221 = vmatprep.subr.bf16.mxu1 %v3560_v0 }
 0x7d8   :  { %3223 = vmatpush3.bf16.msra.mxu1 %v3957_v26 }
 0x7d9   :  { %3248 = vmatprep.subr.bf16.mxu1 %v3560_v0 }
 0x86e   :  { %v4038_v8 = vpop.f32.mrb[14].mxu1 }
 0x86f   :  { %v4040_v44 = vpop.f32.mrb[15].mxu1  ;;  %v1126_v38 = vadd.f32 %v4038_v8, %v4017_v39 }
 0x870   :  { %v1121_v29 = vadd.f32 %v4017_v39, %v4040_v44 }
 0x88e   :  { %v1293_v46 = vpop.f32.mrb[16].mxu1 }
 0x88f   :  { %v1297_v47 = vadd.f32 %v1293_v46, %v1096_v45  ;;  %v2626_v48 = vpop.f32.mrb[17].mxu1 }
 0x891   :  { %3374 = vtanh.f32 %v1297_v47 }
 0x89b   :  { %v3375_v49 = vpop.eup %3374 }
 0x89c   :  { %2660 = vmatmul.mubr.f32.vlgmr.msra.gmra.mrb[18].mxu0 %v3375_v49 }
 0x89d   :  { %3226 = vmatpush3.bf16.msra.mxu0 %v3929_v62  ;;  %2729 = vmatprep.mubr.msk.f32.mxu0 %vm3561_vm0, %v3562_v1 }
 0x89e   :  { %3227 = vmatprep.subr.bf16.mxu0 %v3560_v0 }
 0x8a1   :  { %3229 = vmatpush3.bf16.msra.mxu0 %v3933_v3 }
 0x8a2   :  { %3230 = vmatprep.subr.bf16.mxu0 %v3560_v0 }
 0x8a5   :  { %3232 = vmatpush3.bf16.msra.mxu0 %v3937_v6 }
 0x8a6   :  { %3233 = vmatprep.subr.bf16.mxu0 %v3560_v0 }
 0x8a9   :  { %3235 = vmatpush3.bf16.msra.mxu0 %v3941_v12 }
 0x8aa   :  { %3236 = vmatprep.subr.bf16.mxu0 %v3560_v0 }
 0x8ad   :  { %3238 = vmatpush3.bf16.msra.mxu0 %v3945_v16 }
 0x8ae   :  { %3239 = vmatprep.subr.bf16.mxu0 %v3560_v0 }
 0x8b1   :  { %3241 = vmatpush3.bf16.msra.mxu0 %v3949_v19 }
 0x8b2   :  { %3242 = vmatprep.subr.bf16.mxu0 %v3560_v0 }
 0x8b5   :  { %3244 = vmatpush3.bf16.msra.mxu0 %v3953_v23 }
 0x8b6   :  { %3245 = vmatprep.subr.bf16.mxu0 %v3560_v0 }
 0x8b9   :  { %3247 = vmatpush3.bf16.msra.mxu0 %v3957_v26 }
 0x8ba   :  { %3272 = vmatprep.subr.bf16.mxu0 %v3560_v0 }
 0x96f   :  { %v1366_v51 = vpop.f32.mrb[18].mxu0 }
 0x970   :  { %v1370_v52 = vadd.f32 %v1366_v51, %v1101_v50  ;;  %v2661_v53 = vpop.f32.mrb[19].mxu0 }
 0x972   :  { %3376 = vtanh.f32 %v1370_v52 }
 0x97c   :  { %v3377_v54 = vpop.eup %3376 }
 0x97d   :  { %2695 = vmatmul.mubr.f32.vlgmr.msra.gmra.mrb[18].mxu1 %v3377_v54 }
 0x97e   :  { %3250 = vmatpush3.bf16.msra.mxu1 %v3929_v62  ;;  %2764 = vmatprep.mubr.msk.f32.mxu1 %vm3561_vm0, %v3562_v1 }
 0x97f   :  { %3251 = vmatprep.subr.bf16.mxu1 %v3560_v0 }
 0x982   :  { %3253 = vmatpush3.bf16.msra.mxu1 %v3933_v3 }
 0x983   :  { %3254 = vmatprep.subr.bf16.mxu1 %v3560_v0 }
 0x986   :  { %3256 = vmatpush3.bf16.msra.mxu1 %v3937_v6 }
 0x987   :  { %3257 = vmatprep.subr.bf16.mxu1 %v3560_v0 }
 0x98a   :  { %3259 = vmatpush3.bf16.msra.mxu1 %v3941_v12 }
 0x98b   :  { %3260 = vmatprep.subr.bf16.mxu1 %v3560_v0 }
 0x98e   :  { %3262 = vmatpush3.bf16.msra.mxu1 %v3945_v16 }
 0x98f   :  { %3263 = vmatprep.subr.bf16.mxu1 %v3560_v0 }
 0x992   :  { %3265 = vmatpush3.bf16.msra.mxu1 %v3949_v19 }
 0x993   :  { %3266 = vmatprep.subr.bf16.mxu1 %v3560_v0 }
 0x996   :  { %3268 = vmatpush3.bf16.msra.mxu1 %v3953_v23 }
 0x997   :  { %3269 = vmatprep.subr.bf16.mxu1 %v3560_v0 }
 0x99a   :  { %3271 = vmatpush3.bf16.msra.mxu1 %v3957_v26 }
 0x99b   :  { %3296 = vmatprep.subr.bf16.mxu1 %v3560_v0 }
 0xa50   :  { %v1439_v56 = vpop.f32.mrb[18].mxu1 }
 0xa51   :  { %v1443_v57 = vadd.f32 %v1439_v56, %v1106_v55  ;;  %v2696_v59 = vpop.f32.mrb[19].mxu1 }
 0xa53   :  { %3378 = vtanh.f32 %v1443_v57 }
 0xa5d   :  { %v3379_v60 = vpop.eup %3378 }
 0xa5e   :  { %2730 = vmatmul.mubr.f32.vlgmr.msra.gmra.mrb[20].mxu0 %v3379_v60 }
 0xa5f   :  { %3274 = vmatpush3.bf16.msra.mxu0 %v3929_v62  ;;  %2799 = vmatprep.mubr.msk.f32.mxu0 %vm3561_vm0, %v3562_v1 }
 0xa60   :  { %3275 = vmatprep.subr.bf16.mxu0 %v3560_v0 }
 0xa63   :  { %3277 = vmatpush3.bf16.msra.mxu0 %v3933_v3 }
 0xa64   :  { %3278 = vmatprep.subr.bf16.mxu0 %v3560_v0 }
 0xa67   :  { %3280 = vmatpush3.bf16.msra.mxu0 %v3937_v6 }
 0xa68   :  { %3281 = vmatprep.subr.bf16.mxu0 %v3560_v0 }
 0xa6b   :  { %3283 = vmatpush3.bf16.msra.mxu0 %v3941_v12 }
 0xa6c   :  { %3284 = vmatprep.subr.bf16.mxu0 %v3560_v0 }
 0xa6f   :  { %3286 = vmatpush3.bf16.msra.mxu0 %v3945_v16 }
 0xa70   :  { %3287 = vmatprep.subr.bf16.mxu0 %v3560_v0 }
 0xa73   :  { %3289 = vmatpush3.bf16.msra.mxu0 %v3949_v19 }
 0xa74   :  { %3290 = vmatprep.subr.bf16.mxu0 %v3560_v0 }
 0xa77   :  { %3292 = vmatpush3.bf16.msra.mxu0 %v3953_v23 }
 0xa78   :  { %3293 = vmatprep.subr.bf16.mxu0 %v3560_v0 }
 0xa7b   :  { %3295 = vmatpush3.bf16.msra.mxu0 %v3957_v26 }
 0xa7c   :  { %3320 = vmatprep.subr.bf16.mxu0 %v3560_v0 }
 0xb31   :  { %v1512_v63 = vpop.f32.mrb[20].mxu0 }
 0xb32   :  { %v1516_v2 = vadd.f32 %v1512_v63, %v1111_v61  ;;  %v2731_v4 = vpop.f32.mrb[21].mxu0 }
 0xb34   :  { %3380 = vtanh.f32 %v1516_v2 }
 0xb3e   :  { %v3381_v5 = vpop.eup %3380 }
 0xb3f   :  { %2765 = vmatmul.mubr.f32.vlgmr.msra.gmra.mrb[20].mxu1 %v3381_v5 }
 0xb40   :  { %3298 = vmatpush3.bf16.msra.mxu1 %v3929_v62  ;;  %2834 = vmatprep.mubr.msk.f32.mxu1 %vm3561_vm0, %v3562_v1  ;;  %v1116_v62 = vadd.f32 %v3984_v21, %v4017_v39  ;;  %v1749_v21 = vld [vmem:[#allocation13 + $0x60] sm:$0xff] }
 0xb41   :  { %3299 = vmatprep.subr.bf16.mxu1 %v3560_v0  ;;  %v3339_v34 = vpack.c.bf16 %v1750_v28, %v1749_v21 }
 0xb44   :  { %3301 = vmatpush3.bf16.msra.mxu1 %v3933_v3 }
 0xb45   :  { %3302 = vmatprep.subr.bf16.mxu1 %v3560_v0 }
 0xb48   :  { %3304 = vmatpush3.bf16.msra.mxu1 %v3937_v6 }
 0xb49   :  { %3305 = vmatprep.subr.bf16.mxu1 %v3560_v0 }
 0xb4c   :  { %3307 = vmatpush3.bf16.msra.mxu1 %v3941_v12  ;;  %v1737_v12 = vld [vmem:[#allocation13] sm:$0xff] }
 0xb4d   :  { %3308 = vmatprep.subr.bf16.mxu1 %v3560_v0 }
 0xb50   :  { %3310 = vmatpush3.bf16.msra.mxu1 %v3945_v16  ;;  %v3321_v16 = vpack.c.bf16 %v1738_v13, %v1737_v12 }
 0xb51   :  { %3311 = vmatprep.subr.bf16.mxu1 %v3560_v0 }
 0xb54   :  { %3313 = vmatpush3.bf16.msra.mxu1 %v3949_v19  ;;  %v1741_v19 = vld [vmem:[#allocation13 + $0x20] sm:$0xff] }
 0xb55   :  { %3314 = vmatprep.subr.bf16.mxu1 %v3560_v0  ;;  %v3327_v22 = vpack.c.bf16 %v1742_v20, %v1741_v19 }
 0xb58   :  { %3316 = vmatpush3.bf16.msra.mxu1 %v3953_v23  ;;  %v1743_v23 = vld [vmem:[#allocation13 + $0x30] sm:$0xff] }
 0xb59   :  { %3317 = vmatprep.subr.bf16.mxu1 %v3560_v0  ;;  %v3330_v25 = vpack.c.bf16 %v1744_v24, %v1743_v23 }
 0xb5c   :  { %3319 = vmatpush3.bf16.msra.mxu1 %v3957_v26  ;;  %v1746_v26 = vld [vmem:[#allocation13 + $0x48] sm:$0xff] }
 0xc12   :  { %v1585_v3 = vpop.f32.mrb[20].mxu1 }
 0xc13   :  { %v1589_v6 = vadd.f32 %v1585_v3, %v1116_v62  ;;  %v2766_v7 = vpop.f32.mrb[21].mxu1 }
 0xc15   :  { %3382 = vtanh.f32 %v1589_v6 }
 0xc1f   :  { %v3383_v11 = vpop.eup %3382 }
 0xc20   :  { %2800 = vmatmul.mubr.f32.vlgmr.msra.gmra.mrb[22].mxu0 %v3383_v11 }
 0xc21   :  { %2869 = vmatprep.mubr.msk.f32.mxu0 %vm3561_vm0, %v3562_v1  ;;  %3322 = vmatpush3.bf16.msra.mxu0 %v3321_v16  ;;  %v1745_v1 = vld [vmem:[#allocation13 + $0x40] sm:$0xff] }
 0xc22   :  { %3323 = vmatprep.subr.bf16.mxu0 %v3560_v0  ;;  %v3333_v27 = vpack.c.bf16 %v1746_v26, %v1745_v1 }
 0xc25   :  { %3325 = vmatpush3.bf16.msra.mxu0 %v3324_v18 }
 0xc26   :  { %3326 = vmatprep.subr.bf16.mxu0 %v3560_v0 }
 0xc29   :  { %3328 = vmatpush3.bf16.msra.mxu0 %v3327_v22 }
 0xc2a   :  { %3329 = vmatprep.subr.bf16.mxu0 %v3560_v0 }
 0xc2d   :  { %3331 = vmatpush3.bf16.msra.mxu0 %v3330_v25 }
 0xc2e   :  { %3332 = vmatprep.subr.bf16.mxu0 %v3560_v0 }
 0xc31   :  { %3334 = vmatpush3.bf16.msra.mxu0 %v3333_v27 }
 0xc32   :  { %3335 = vmatprep.subr.bf16.mxu0 %v3560_v0 }
 0xc35   :  { %3337 = vmatpush3.bf16.msra.mxu0 %v3336_v15 }
 0xc36   :  { %3338 = vmatprep.subr.bf16.mxu0 %v3560_v0 }
 0xc39   :  { %3340 = vmatpush3.bf16.msra.mxu0 %v3339_v34 }
 0xc3a   :  { %3341 = vmatprep.subr.bf16.mxu0 %v3560_v0 }
 0xc3d   :  { %3343 = vmatpush3.bf16.msra.mxu0 %v3342_v37 }
 0xcf3   :  { %v1658_v30 = vpop.f32.mrb[22].mxu0 }
 0xcf4   :  { %v1662_v31 = vadd.f32 %v1658_v30, %v1121_v29  ;;  %v2801_v32 = vpop.f32.mrb[23].mxu0 }
 0xcf6   :  { %3384 = vtanh.f32 %v1662_v31 }
 0xd00   :  { %v3385_v10 = vpop.eup %3384 }
 0xd01   :  { %2835 = vmatmul.mubr.f32.vlgmr.msra.gmra.mrb[22].mxu1 %v3385_v10 }
 0xdd4   :  { %v1731_v40 = vpop.f32.mrb[22].mxu1 }
 0xdd5   :  { %v1735_v41 = vadd.f32 %v1731_v40, %v1126_v38  ;;  %v2836_v42 = vpop.f32.mrb[23].mxu1 }
 0xdd7   :  { %3386 = vtanh.f32 %v1735_v41 }
 0xde1   :  { %v3387_v43 = vpop.eup %3386 }
 0xde2   :  { %2870 = vmatmul.mubr.f32.vlgmr.msra.gmra.mrb[24].mxu0 %v3387_v43 }
 0xeb5   :  { %v1826_v44 = vpop.f32.mrb[24].mxu0 }
 0xeb6   :  { %v1827_v45 = vadd.f32 %v1851_v58, %v1826_v44  ;;  %v2871_v46 = vpop.f32.mrb[25].mxu0 }
 0xeb8   :  { %1830 = vst [vmem:[#allocation15] sm:$0xff] %v1827_v45 }
 0xeb9   :  { %3531 = shalt.err (!%p3528_p10)
}
 0xeba   :  { %s3532_s25 = scalar_lea.hbm %s4160_s9, 128 }
 0xebb   :  { %p3533_p11 = scmp.ne.s32.totalorder %s4160_s9, %s3532_s25  ;;  %p3536_p12 = scmp.lt.u32.totalorder %s3532_s25, %s4160_s9 }
 0xebd   :  { %p3538_p13 = pnand %p3536_p12, %p3533_p11 }
 0xebf   :  { %3541 = shalt.err (!%p3538_p13)
}
 0xec0   :  { %1840 = dma.vmem_to_hbm [thread:$0]  %s1838_s19, 128, %s4160_s9, [#allocation6]  }
 0xec1   :  { %3550 = dma.done.wait [#allocation6], 128  }
 0xec2   :  { %3551 = vsyncadd [#allocation6], 4294967168 }
 0xec3   :  { %1844 = vsyncpa [#allocation5], 1 }
 0xec4   :  { %1845 = vsyncpa [#allocation8], 1 }
 0xec5   :  { %1846 = vsyncpa [#allocation11], 1 }
 0xec6   :  { %1847 = vsyncpa [#allocation14], 1 }
 0xec7   :  { %1848 = vsyncpa [#allocation6], 1 }

</bundles_post_ra>
